<compile_context>
chip_gen: v5e
topology: v5e:2x2
jax: 0.10.0
libtpu: 0.0.40
codegen_flags: <defaults>
</compile_context>

<pallas_src>
import functools

import jax
import jax.numpy as jnp
from jax.experimental import pallas as pl
from jax.experimental.pallas import tpu as pltpu


# ------------------------------------------------------------------
# generation-aware defaults
# ------------------------------------------------------------------
def _hw_defaults():
    try:
        kind = jax.devices()[0].device_kind.lower()
    except Exception:
        kind = ""
    if ("v4" in kind) or ("v5" in kind) or ("v6" in kind):
        # 128 MiB VMEM generations: big tiles, high VMEM limit.
        return dict(vmem=100 * 1024 * 1024, tm=512, tn=512, tk=1024, attn_bb=8)
    # v7x (64 MiB VMEM) / unknown: conservative.
    return dict(vmem=48 * 1024 * 1024, tm=256, tn=256, tk=512, attn_bb=4)


_HW = _hw_defaults()


def _compiler_params(sem):
    return pltpu.CompilerParams(dimension_semantics=sem,
                                vmem_limit_bytes=_HW["vmem"])


# ------------------------------------------------------------------
# small helpers
# ------------------------------------------------------------------
def _round_up(x, m):
    return (x + m - 1) // m * m


def _pick_tile(dim, target, multiple):
    """Largest divisor of `dim` <= target that is a multiple of `multiple`;
    falls back to the full dim (full-extent block is always legal)."""
    cap = min(dim, target)
    t = (cap // multiple) * multiple
    while t >= multiple:
        if dim % t == 0:
            return t
        t -= multiple
    return dim


def _row_tiling(M, target):
    """Row-tile for the M axis: returns (tm, Mp) with tm | Mp, tm % 8 == 0,
    Mp >= M.  Prefers an exact divisor (no padding); otherwise pads M."""
    m8 = _round_up(M, 8)
    if m8 <= target:
        return m8, m8
    t = (target // 8) * 8
    cand = t
    while cand >= max(8, t // 2):
        if M % cand == 0:
            return cand, M
        cand -= 8
    return t, _round_up(M, t)


def _pad_rows(a, Mp):
    if a.shape[0] == Mp:
        return a
    return jnp.pad(a, ((0, Mp - a.shape[0]),) + ((0, 0),) * (a.ndim - 1))


def _pad_axis(a, axis, new):
    if a.shape[axis] == new:
        return a
    pads = [(0, 0)] * a.ndim
    pads[axis] = (0, new - a.shape[axis])
    return jnp.pad(a, pads)


def _pick_batch_chunk(B, target):
    """Largest divisor of B <= target that leaves a grid extent >= 2 (megacore);
    falls back to B."""
    best = None
    for d in range(1, min(B, target) + 1):
        if B % d == 0 and B // d >= 2:
            best = d
    return best if best is not None else B


# ------------------------------------------------------------------
# Pallas kernels
# ------------------------------------------------------------------
def _mm_kernel(*refs, activation, has_residual):
    """Tiled matmul: f32 accumulation over K grid, bias (+act) (+residual)."""
    if has_residual:
        x_ref, w_ref, b_ref, res_ref, o_ref, acc_ref = refs
    else:
        x_ref, w_ref, b_ref, o_ref, acc_ref = refs
        res_ref = None
    k = pl.program_id(2)

    @pl.when(k == 0)
    def _():
        acc_ref[...] = jnp.zeros_like(acc_ref)

    acc_ref[...] += jnp.dot(x_ref[...], w_ref[...],
                            preferred_element_type=jnp.float32)

    @pl.when(k == pl.num_programs(2) - 1)
    def _():
        out = acc_ref[...] + b_ref[...]
        if activation == "quick_gelu":            # x * sigmoid(1.702 x)
            out = out * jax.nn.sigmoid(1.702 * out)
        if res_ref is not None:
            out = out + res_ref[...].astype(jnp.float32)
        o_ref[...] = out.astype(o_ref.dtype)


def pallas_matmul(x, w, b, *, activation=None, residual=None,
                  out_dtype=jnp.bfloat16):
    """y = x @ w + b (+act) (+residual).  bf16 MXU operands, bf16 activations."""
    M, K = x.shape
    N = w.shape[1]
    x = x.astype(jnp.bfloat16)
    w = w.astype(jnp.bfloat16)
    b2 = b.reshape(1, N).astype(jnp.float32)

    tm, Mp = _row_tiling(M, _HW["tm"])
    tn = _pick_tile(N, _HW["tn"], 128)
    tk = _pick_tile(K, _HW["tk"], 128)
    xp = _pad_rows(x, Mp)

    in_specs = [
        pl.BlockSpec((tm, tk), lambda i, j, k: (i, k)),
        pl.BlockSpec((tk, tn), lambda i, j, k: (k, j)),
        pl.BlockSpec((1, tn), lambda i, j, k: (0, j)),
    ]
    args = [xp, w, b2]
    if residual is not None:
        in_specs.append(pl.BlockSpec((tm, tn), lambda i, j, k: (i, j)))
        args.append(_pad_rows(residual.astype(jnp.bfloat16), Mp))

    out = pl.pallas_call(
        functools.partial(_mm_kernel, activation=activation,
                          has_residual=residual is not None),
        grid=(Mp // tm, N // tn, K // tk),
        in_specs=in_specs,
        out_specs=pl.BlockSpec((tm, tn), lambda i, j, k: (i, j)),
        out_shape=jax.ShapeDtypeStruct((Mp, N), out_dtype),
        scratch_shapes=[pltpu.VMEM((tm, tn), jnp.float32)],
        compiler_params=_compiler_params(("parallel", "parallel", "arbitrary")),
    )(*args)
    return out[:M] if Mp != M else out


def _ln_mm_kernel(x_ref, g_ref, bln_ref, w_ref, b_ref, o_ref, xn_ref,
                  *, activation, eps):
    """Fused LayerNorm + matmul.  LN computed once per row tile (cached in a
    bf16 VMEM scratch under j == 0) and reused for every N tile."""
    j = pl.program_id(1)

    @pl.when(j == 0)
    def _():
        x = x_ref[...].astype(jnp.float32)                 # (tm, K)
        mean = jnp.mean(x, axis=-1, keepdims=True)
        xc = x - mean
        var = jnp.mean(xc * xc, axis=-1, keepdims=True)
        xn = xc * jax.lax.rsqrt(var + eps) * g_ref[...] + bln_ref[...]
        xn_ref[...] = xn.astype(jnp.bfloat16)

    out = jnp.dot(xn_ref[...], w_ref[...], preferred_element_type=jnp.float32)
    out = out + b_ref[...]
    if activation == "quick_gelu":
        out = out * jax.nn.sigmoid(1.702 * out)
    o_ref[...] = out.astype(o_ref.dtype)


def pallas_ln_matmul(x, gamma, beta, w, b, *, activation=None, eps=1e-5,
                     out_dtype=jnp.bfloat16):
    """y = LayerNorm(x) @ w + b (+act).  Feature dim K kept in one block."""
    M, K = x.shape
    N = w.shape[1]
    w = w.astype(jnp.bfloat16)

    tm, Mp = _row_tiling(M, _HW["tm"])
    tn = _pick_tile(N, _HW["tn"], 128)
    xp = _pad_rows(x, Mp)

    out = pl.pallas_call(
        functools.partial(_ln_mm_kernel, activation=activation, eps=eps),
        grid=(Mp // tm, N // tn),
        in_specs=[
            pl.BlockSpec((tm, K), lambda i, j: (i, 0)),
            pl.BlockSpec((1, K), lambda i, j: (0, 0)),
            pl.BlockSpec((1, K), lambda i, j: (0, 0)),
            pl.BlockSpec((K, tn), lambda i, j: (0, j)),
            pl.BlockSpec((1, tn), lambda i, j: (0, j)),
        ],
        out_specs=pl.BlockSpec((tm, tn), lambda i, j: (i, j)),
        out_shape=jax.ShapeDtypeStruct((Mp, N), out_dtype),
        scratch_shapes=[pltpu.VMEM((tm, K), jnp.bfloat16)],
        # N axis "arbitrary": the xn scratch is carried across j.
        compiler_params=_compiler_params(("parallel", "arbitrary")),
    )(xp, gamma.reshape(1, K).astype(jnp.float32),
      beta.reshape(1, K).astype(jnp.float32), w,
      b.reshape(1, N).astype(jnp.float32))
    return out[:M] if Mp != M else out


def _ln_kernel(x_ref, g_ref, b_ref, o_ref, *, eps):
    x = x_ref[...].astype(jnp.float32)
    mean = jnp.mean(x, axis=-1, keepdims=True)
    xc = x - mean
    var = jnp.mean(xc * xc, axis=-1, keepdims=True)
    o_ref[...] = (xc * jax.lax.rsqrt(var + eps) * g_ref[...]
                  + b_ref[...]).astype(o_ref.dtype)


def pallas_layernorm(x, gamma, beta, eps=1e-5, out_dtype=jnp.bfloat16):
    """Standalone (row-tiled) LayerNorm; only used for ln_pre."""
    M, C = x.shape
    tm, Mp = _row_tiling(M, 1024)
    xp = _pad_rows(x, Mp)
    out = pl.pallas_call(
        functools.partial(_ln_kernel, eps=eps),
        grid=(Mp // tm,),
        in_specs=[pl.BlockSpec((tm, C), lambda i: (i, 0)),
                  pl.BlockSpec((1, C), lambda i: (0, 0)),
                  pl.BlockSpec((1, C), lambda i: (0, 0))],
        out_specs=pl.BlockSpec((tm, C), lambda i: (i, 0)),
        out_shape=jax.ShapeDtypeStruct((Mp, C), out_dtype),
        compiler_params=_compiler_params(("parallel",)),
    )(xp, gamma.reshape(1, C).astype(jnp.float32),
      beta.reshape(1, C).astype(jnp.float32))
    return out[:M] if Mp != M else out


def _bn_stats_kernel(x_ref, mean_ref, var_ref, sum_sc, sq_sc, *, total_rows):
    """Per-channel mean / biased variance, accumulated over the row grid;
    finalized only on the last step."""
    i = pl.program_id(0)

    @pl.when(i == 0)
    def _():
        sum_sc[...] = jnp.zeros_like(sum_sc)
        sq_sc[...] = jnp.zeros_like(sq_sc)

    x = x_ref[...].astype(jnp.float32)
    sum_sc[...] += jnp.sum(x, axis=0, keepdims=True)
    sq_sc[...] += jnp.sum(x * x, axis=0, keepdims=True)

    @pl.when(i == pl.num_programs(0) - 1)
    def _():
        mean = sum_sc[...] * (1.0 / total_rows)
        mean_ref[...] = mean
        # clamp: E[x^2] - mean^2 can go slightly negative from cancellation
        var_ref[...] = jnp.maximum(sq_sc[...] * (1.0 / total_rows) - mean * mean,
                                   0.0)


def pallas_bn_stats(x, tm_target=512):
    """Training-mode BatchNorm statistics over rows of x:(M,C)."""
    # TODO(synk): eval-mode BatchNorm (running mean/var) is not implemented;
    # this matches the module's default (training) forward behavior.
    M, C = x.shape
    tm = _pick_tile(M, tm_target, 8)
    mean, var = pl.pallas_call(
        functools.partial(_bn_stats_kernel, total_rows=M),
        grid=(M // tm,),
        in_specs=[pl.BlockSpec((tm, C), lambda i: (i, 0))],
        out_specs=[pl.BlockSpec((1, C), lambda i: (0, 0)),
                   pl.BlockSpec((1, C), lambda i: (0, 0))],
        out_shape=[jax.ShapeDtypeStruct((1, C), jnp.float32),
                   jax.ShapeDtypeStruct((1, C), jnp.float32)],
        scratch_shapes=[pltpu.VMEM((1, C), jnp.float32),
                        pltpu.VMEM((1, C), jnp.float32)],
        compiler_params=_compiler_params(("arbitrary",)),
    )(x)
    return mean, var


def _attn_kernel(qkv_ref, o_ref, *, num_heads):
    """Self-attention for a chunk of batch elements, all heads per grid step.

    The attention scale is pre-folded into the Q projection weights, so no
    per-element scale multiply; the softmax divide runs on the EUP via
    pl.reciprocal; per-head outputs are packed and stored once, lane-dense.
    """
    Bb, L, C3 = qkv_ref.shape
    C = C3 // 3
    Dh = C // num_heads
    outs = []
    for h in range(num_heads):
        q = qkv_ref[:, :, h * Dh:(h + 1) * Dh]                 # (Bb, L, Dh) bf16
        k = qkv_ref[:, :, C + h * Dh:C + (h + 1) * Dh]
        v = qkv_ref[:, :, 2 * C + h * Dh:2 * C + (h + 1) * Dh]
        s = jnp.einsum('bqd,bkd->bqk', q, k,
                       preferred_element_type=jnp.float32)     # (Bb, L, L)
        s = s - jnp.max(s, axis=-1, keepdims=True)
        p = jnp.exp(s)
        p = p * pl.reciprocal(jnp.sum(p, axis=-1, keepdims=True), approx=True)
        o = jnp.einsum('bqk,bkd->bqd', p.astype(jnp.bfloat16), v,
                       preferred_element_type=jnp.float32)
        outs.append(o.astype(o_ref.dtype))
    o_ref[...] = jnp.concatenate(outs, axis=-1)                # one dense store


def pallas_attention(qkv, num_heads):
    """qkv: (B, L, 3C) -> (B, L, C)."""
    B, L, C3 = qkv.shape
    C = C3 // 3
    bb = _pick_batch_chunk(B, _HW["attn_bb"])
    return pl.pallas_call(
        functools.partial(_attn_kernel, num_heads=num_heads),
        grid=(B // bb,),
        in_specs=[pl.BlockSpec((bb, L, C3), lambda i: (i, 0, 0))],
        out_specs=pl.BlockSpec((bb, L, C), lambda i: (i, 0, 0)),
        out_shape=jax.ShapeDtypeStruct((B, L, C), jnp.bfloat16),
        compiler_params=_compiler_params(("parallel",)),
    )(qkv.astype(jnp.bfloat16))


def _dwconv_kernel(x_ref, w_ref, b_ref, o_ref):
    """3-tap depthwise conv along T (Conv3d kernel (3,1,1), groups=C, pad 1).
    Zero boundary handled with direct slice loads/stores (no shifted copies)."""
    T = x_ref.shape[1]
    w0 = w_ref[0, :].astype(jnp.float32)
    w1 = w_ref[1, :].astype(jnp.float32)
    w2 = w_ref[2, :].astype(jnp.float32)
    b = b_ref[0, :].astype(jnp.float32)
    if T == 1:
        o_ref[0, 0] = (w1 * x_ref[0, 0].astype(jnp.float32) + b).astype(o_ref.dtype)
        return
    # t = 0 (left neighbor is zero padding)
    o_ref[0, 0] = (w1 * x_ref[0, 0].astype(jnp.float32)
                   + w2 * x_ref[0, 1].astype(jnp.float32) + b).astype(o_ref.dtype)
    # t = T-1 (right neighbor is zero padding)
    o_ref[0, T - 1] = (w0 * x_ref[0, T - 2].astype(jnp.float32)
                       + w1 * x_ref[0, T - 1].astype(jnp.float32)
                       + b).astype(o_ref.dtype)
    if T > 2:
        xl = x_ref[0, 0:T - 2].astype(jnp.float32)
        xm = x_ref[0, 1:T - 1].astype(jnp.float32)
        xr = x_ref[0, 2:T].astype(jnp.float32)
        o_ref[0, 1:T - 1] = (w0 * xl + w1 * xm + w2 * xr + b).astype(o_ref.dtype)


def pallas_dwconv_temporal(x, w_taps, b, tp_target=512):
    """x: (N, T, P, C); w_taps: (3, C); b: (C,).  Works directly on the
    (N, T, P, C) layout — no transpose round trips."""
    N, T, P, C = x.shape
    tp = _pick_tile(P, tp_target, 8)
    return pl.pallas_call(
        _dwconv_kernel,
        grid=(N, P // tp),
        in_specs=[pl.BlockSpec((1, T, tp, C), lambda n, j: (n, 0, j, 0)),
                  pl.BlockSpec((3, C), lambda n, j: (0, 0)),
                  pl.BlockSpec((1, C), lambda n, j: (0, 0))],
        out_specs=pl.BlockSpec((1, T, tp, C), lambda n, j: (n, 0, j, 0)),
        out_shape=jax.ShapeDtypeStruct((N, T, P, C), jnp.bfloat16),
        compiler_params=_compiler_params(("parallel", "parallel")),
    )(x.astype(jnp.bfloat16), w_taps.astype(jnp.float32),
      b.reshape(1, C).astype(jnp.float32))


# ------------------------------------------------------------------
# Model pieces (glue in plain JAX, math in Pallas)
# ------------------------------------------------------------------
def temporal_module(x, p, N, T, P):
    """MyTempModule + residual.  x: (N, T, P, C) channel-last, bf16."""
    C = x.shape[-1]
    re_dp = p["conv1_w"].shape[1]
    flat = x.reshape(N * T * P, C)

    # BatchNorm3d (training-mode batch stats) folded into the 1x1x1 conv1.
    mean, var = pallas_bn_stats(flat)
    inv = jax.lax.rsqrt(var[0] + 1e-5)                      # (C,)
    a = p["bn_g"] * inv
    c = p["bn_b"] - mean[0] * a
    w1_eff = (a[:, None] * p["conv1_w"]).astype(jnp.bfloat16)   # (C, re_dp)
    b1_eff = c @ p["conv1_w"] + p["conv1_b"]                     # (re_dp,)

    h = pallas_matmul(flat, w1_eff, b1_eff)                 # 1x1x1 conv, bf16 out
    h = h.reshape(N, T, P, re_dp)
    h = pallas_dwconv_temporal(h, p["dw_w"], p["dw_b"])     # (3,1,1) depthwise
    h = h.reshape(N * T * P, re_dp)
    # final 1x1x1 conv with fused residual add (x + pos_embed(x))
    out = pallas_matmul(h, p["conv3_w"], p["conv3_b"], residual=flat)
    return out.reshape(N, T, P, C)


def encoder_layer(x, p, cfg, idx):
    """TransformerEncoderLayer.forward.  x: (N, T, L, C) -> (N*T, L, C)."""
    N, T, L, C = x.shape
    P = L - 1
    H = cfg["num_heads"]

    if idx in cfg["layers_with_temporal_before_attn"]:
        temp = temporal_module(x[:, :, 1:, :], p["tm1"], N, T, P)
        x = jnp.concatenate([x[:, :, 0:1, :], temp], axis=2)

    x2 = x.reshape(N * T * L, C)
    # fused LayerNorm(norm1) + QKV projection (attention scale folded into Q)
    qkv = pallas_ln_matmul(x2, p["norm1_g"], p["norm1_b"], p["qkv_w"], p["qkv_b"])
    attn = pallas_attention(qkv.reshape(N * T, L, 3 * C), H)
    # out projection with fused residual add
    x2 = pallas_matmul(attn.reshape(N * T * L, C), p["out_w"], p["out_b"],
                       residual=x2)

    if idx in cfg["layers_with_temporal_before_ffn"]:
        x4 = x2.reshape(N, T, L, C)
        temp = temporal_module(x4[:, :, 1:, :], p["tm2"], N, T, P)
        x4 = jnp.concatenate([x4[:, :, 0:1, :], temp], axis=2)
        x2 = x4.reshape(N * T * L, C)

    # fused LayerNorm(norm2) + fc1 + QuickGELU, then fc2 with fused residual
    h = pallas_ln_matmul(x2, p["norm2_g"], p["norm2_b"], p["fc1_w"], p["fc1_b"],
                         activation="quick_gelu")
    x2 = pallas_matmul(h, p["fc2_w"], p["fc2_b"], residual=x2)
    return x2.reshape(N * T, L, C)


def vit_forward(x5, params, cfg):
    """VisionTransformer.forward.  x5: (N, 3, T, H, W) -> list of (N,T,L,C)."""
    N, Cin, T, Hin, Win = x5.shape
    ph, pw = cfg["patch_size"]
    nH, nW = Hin // ph, Win // pw
    C = cfg["feature_dim"]
    # (N, C, T, H, W) -> (N*T, C, H, W);  conv1 (stride == kernel) == patches @ W
    x2d = jnp.transpose(x5, (0, 2, 1, 3, 4)).reshape(N * T, Cin, Hin, Win)
    patches = x2d.reshape(N * T, Cin, nH, ph, nW, pw)
    patches = jnp.transpose(patches, (0, 2, 4, 1, 3, 5))
    patches = patches.reshape(N * T * nH * nW, Cin * ph * pw)
    tok = pallas_matmul(patches, params["conv1_w"], params["conv1_b"])
    tok = tok.reshape(N * T, nH * nW, C)

    cls = jnp.broadcast_to(params["cls_token"].astype(tok.dtype).reshape(1, 1, C),
                           (N * T, 1, C))
    tok = jnp.concatenate([cls, tok], axis=1)               # (N*T, L, C)
    tok = tok + params["pos_embed"][None].astype(tok.dtype)
    L = tok.shape[1]
    if cfg["ln_pre"]:
        tok = pallas_layernorm(tok.reshape(N * T * L, C),
                               params["ln_pre_g"],
                               params["ln_pre_b"]).reshape(N * T, L, C)
    else:
        tok = tok.astype(jnp.bfloat16)
    x = tok.reshape(N, T, L, C)
    feats = []
    for i, blk in enumerate(params["blocks"]):
        x = encoder_layer(x, blk, cfg, i).reshape(N, T, L, C)
        feats.append(x)
    return feats


def evl_forward(x, params, cfg):
    """EVL.forward.  x: (N*T, 3, H, W) -> list of (N, T, L, C) features."""
    # torch does x.squeeze(); flatten any extra leading singleton dims without
    # risking dropping a real size-1 batch/channel axis.
    if x.ndim > 4:
        x = x.reshape((-1,) + x.shape[-3:])
    NT, Cin, Hn, Wn = x.shape
    T = cfg["num_frames"]
    N = NT // T
    x = jnp.transpose(x.reshape(N, T, Cin, Hn, Wn), (0, 2, 1, 3, 4))
    feats = vit_forward(x, params, cfg)
    return feats[-cfg["decoder_num_layers"]:]


# ------------------------------------------------------------------
# Deterministic parameter initialization (shapes per the module __init__).
# Weights stored pre-transposed (in, out), QKV pre-concatenated with the
# attention scale folded into Q, bf16 where they feed the MXU, and the
# temporal branch width zero-padded to a lane-dense multiple of 128.
# ------------------------------------------------------------------
def init_params(key, cfg):
    C = cfg["feature_dim"]
    H = cfg["num_heads"]
    mlp_dim = round(cfg["mlp_factor"] * C)
    re_d = int(C // cfg["dw_reduction"])
    re_dp = _round_up(re_d, 128)
    ph, pw = cfg["patch_size"]
    nH = cfg["input_size"][0] // ph
    nW = cfg["input_size"][1] // pw
    L = nH * nW + 1
    keys = iter(jax.random.split(key, 4096))
    bf16 = jnp.bfloat16

    def nrm(shape, s=0.02, dtype=jnp.float32):
        return (s * jax.random.normal(next(keys), shape)).astype(dtype)

    def temporal_params():
        return dict(
            bn_g=jnp.ones((C,), jnp.float32), bn_b=jnp.zeros((C,), jnp.float32),
            conv1_w=_pad_axis(nrm((C, re_d)), 1, re_dp),   # f32: BN folded at runtime
            conv1_b=_pad_axis(nrm((re_d,)), 0, re_dp),
            dw_w=_pad_axis(nrm((3, re_d)), 1, re_dp),
            dw_b=_pad_axis(nrm((re_d,)), 0, re_dp),
            # faithful to the module: last 1x1x1 conv is zero-initialized
            # (temporal branch is an exact no-op at init, kernels still run).
            conv3_w=jnp.zeros((re_dp, C), bf16),
            conv3_b=jnp.zeros((C,), jnp.float32),
        )

    scale = (C // H) ** -0.5
    blocks = []
    for i in range(cfg["num_layers"]):
        qkv_w = nrm((C, 3 * C))
        qkv_w = qkv_w.at[:, :C].multiply(scale)            # fold 1/sqrt(Dh) into Q
        qkv_b = jnp.zeros((3 * C,), jnp.float32)           # zero bias (scale no-op)
        blk = dict(
            qkv_w=qkv_w.astype(bf16), qkv_b=qkv_b,
            out_w=nrm((C, C), dtype=bf16), out_b=jnp.zeros((C,), jnp.float32),
            fc1_w=nrm((C, mlp_dim), dtype=bf16), fc1_b=nrm((mlp_dim,), 1e-6),
            fc2_w=nrm((mlp_dim, C), dtype=bf16), fc2_b=nrm((C,), 1e-6),
            norm1_g=jnp.ones((C,), jnp.float32), norm1_b=jnp.zeros((C,), jnp.float32),
            norm2_g=jnp.ones((C,), jnp.float32), norm2_b=jnp.zeros((C,), jnp.float32),
        )
        if i in cfg["layers_with_temporal_before_attn"]:
            blk["tm1"] = temporal_params()
        if i in cfg["layers_with_temporal_before_ffn"]:
            blk["tm2"] = temporal_params()
        blocks.append(blk)

    return dict(
        # patch-embed weight == torch conv1.weight.reshape(C, 3*ph*pw).T
        conv1_w=nrm((3 * ph * pw, C), dtype=bf16),
        conv1_b=jnp.zeros((C,), jnp.float32),        # conv1 has no bias
        cls_token=nrm((C,)),
        pos_embed=nrm((L, C)),
        ln_pre_g=jnp.ones((C,), jnp.float32),
        ln_pre_b=jnp.zeros((C,), jnp.float32),
        blocks=blocks,
    )


# ------------------------------------------------------------------
if __name__ == "__main__":
    # Small, shape-consistent configuration (scaled-down ViT-B/16 style).
    cfg = dict(
        num_frames=2,
        feature_dim=128,
        input_size=(16, 16),
        patch_size=(8, 8),          # -> 2x2 patches, L = 5 tokens
        num_heads=4,
        num_layers=4,
        mlp_factor=4.0,
        dw_reduction=1.5,           # MyTempModule default
        ln_pre=True,                # 'clip' backbone type
        decoder_num_layers=2,
        layers_with_temporal_before_attn=[2, 3],
        layers_with_temporal_before_ffn=[],
    )

    key = jax.random.PRNGKey(0)
    pkey, xkey = jax.random.split(key)
    params = init_params(pkey, cfg)

    N = 2
    T = cfg["num_frames"]
    # EVL input: (N*T, 3, H, W)  (NCHW, like the PyTorch module)
    x = jax.random.normal(xkey, (N * T, 3, 16, 16), jnp.float32)

    fwd = jax.jit(functools.partial(evl_forward, cfg=cfg))
    feats = fwd(x, params)
    feats = [jax.block_until_ready(f) for f in feats]

    assert len(feats) == cfg["decoder_num_layers"]
    L = ((cfg["input_size"][0] // cfg["patch_size"][0])
         * (cfg["input_size"][1] // cfg["patch_size"][1]) + 1)
    for f in feats:
        assert f.shape == (N, T, L, cfg["feature_dim"])
        assert bool(jnp.all(jnp.isfinite(f.astype(jnp.float32))))
    print("KERNEL_OK")
</pallas_src>

<mosaic_0001>
module attributes {stable_mosaic.version = 11 : i64} {
  func.func @_ln_kernel(%arg0: i32, %arg1: memref<24x128xbf16, #tpu.memory_space<vmem>>, %arg2: memref<1x128xf32, #tpu.memory_space<vmem>>, %arg3: memref<1x128xf32, #tpu.memory_space<vmem>>, %arg4: memref<24x128xbf16, #tpu.memory_space<vmem>>) attributes {dimension_semantics = [#tpu.dimension_semantics<parallel>], iteration_bounds = array<i64: 1>, scalar_prefetch = 0 : i64, scratch_operands = 0 : i64, tpu.core_type = #tpu.core_type<tc>, window_params = [{transform_indices = @transform_0, window_bounds = array<i64: 24, 128>}, {pipeline_mode = #tpu.pipeline_mode<synchronous>, transform_indices = @transform_1, window_bounds = array<i64: 1, 128>}, {pipeline_mode = #tpu.pipeline_mode<synchronous>, transform_indices = @transform_2, window_bounds = array<i64: 1, 128>}, {transform_indices = @transform_3, window_bounds = array<i64: 24, 128>}]} {
    %c0 = arith.constant 0 : index
    %c0_0 = arith.constant 0 : index
    %0 = vector.load %arg1[%c0, %c0_0] : memref<24x128xbf16, #tpu.memory_space<vmem>>, vector<24x128xbf16>
    %1 = arith.extf %0 : vector<24x128xbf16> to vector<24x128xf32>
    %cst = arith.constant dense<0.000000e+00> : vector<24xf32>
    %2 = vector.multi_reduction <add>, %1, %cst [1] : vector<24x128xf32> to vector<24xf32>
    %3 = vector.shape_cast %2 : vector<24xf32> to vector<24x1xf32>
    %cst_1 = arith.constant 1.280000e+02 : f32
    %4 = vector.broadcast %cst_1 : f32 to vector<24x1xf32>
    %5 = arith.divf %3, %4 : vector<24x1xf32>
    %6 = vector.broadcast %5 : vector<24x1xf32> to vector<24x128xf32>
    %7 = arith.subf %1, %6 : vector<24x128xf32>
    %8 = arith.mulf %7, %7 : vector<24x128xf32>
    %cst_2 = arith.constant dense<0.000000e+00> : vector<24xf32>
    %9 = vector.multi_reduction <add>, %8, %cst_2 [1] : vector<24x128xf32> to vector<24xf32>
    %10 = vector.shape_cast %9 : vector<24xf32> to vector<24x1xf32>
    %cst_3 = arith.constant 1.280000e+02 : f32
    %11 = vector.broadcast %cst_3 : f32 to vector<24x1xf32>
    %12 = arith.divf %10, %11 : vector<24x1xf32>
    %cst_4 = arith.constant 9.99999974E-6 : f32
    %13 = vector.broadcast %cst_4 : f32 to vector<24x1xf32>
    %14 = arith.addf %12, %13 : vector<24x1xf32>
    %15 = math.rsqrt %14 : vector<24x1xf32>
    %16 = vector.broadcast %15 : vector<24x1xf32> to vector<24x128xf32>
    %17 = arith.mulf %7, %16 : vector<24x128xf32>
    %c0_5 = arith.constant 0 : index
    %c0_6 = arith.constant 0 : index
    %18 = vector.load %arg2[%c0_5, %c0_6] : memref<1x128xf32, #tpu.memory_space<vmem>>, vector<1x128xf32>
    %19 = vector.broadcast %18 : vector<1x128xf32> to vector<24x128xf32>
    %20 = arith.mulf %17, %19 : vector<24x128xf32>
    %c0_7 = arith.constant 0 : index
    %c0_8 = arith.constant 0 : index
    %21 = vector.load %arg3[%c0_7, %c0_8] : memref<1x128xf32, #tpu.memory_space<vmem>>, vector<1x128xf32>
    %22 = vector.broadcast %21 : vector<1x128xf32> to vector<24x128xf32>
    %23 = arith.addf %20, %22 : vector<24x128xf32>
    %24 = arith.truncf %23 : vector<24x128xf32> to vector<24x128xbf16>
    %c0_9 = arith.constant 0 : index
    %c0_10 = arith.constant 0 : index
    %25 = vector.load %arg4[%c0_9, %c0_10] : memref<24x128xbf16, #tpu.memory_space<vmem>>, vector<24x128xbf16>
    tpu.vector_store %arg4[%c0_9, %c0_10], %24 {strides = array<i32>} : memref<24x128xbf16, #tpu.memory_space<vmem>>, vector<24x128xbf16>,
    return
  }
  func.func @transform_0(%arg0: i32) -> (i32, i32) {
    %c0_i32 = arith.constant 0 : i32
    %c0_i32_0 = arith.constant 0 : i32
    return %arg0, %c0_i32 : i32, i32
  }
  func.func @transform_1(%arg0: i32) -> (i32, i32) {
    %c0_i32 = arith.constant 0 : i32
    %c0_i32_0 = arith.constant 0 : i32
    %c0_i32_1 = arith.constant 0 : i32
    return %c0_i32, %c0_i32_0 : i32, i32
  }
  func.func @transform_2(%arg0: i32) -> (i32, i32) {
    %c0_i32 = arith.constant 0 : i32
    %c0_i32_0 = arith.constant 0 : i32
    %c0_i32_1 = arith.constant 0 : i32
    return %c0_i32, %c0_i32_0 : i32, i32
  }
  func.func @transform_3(%arg0: i32) -> (i32, i32) {
    %c0_i32 = arith.constant 0 : i32
    %c0_i32_0 = arith.constant 0 : i32
    return %arg0, %c0_i32 : i32, i32
  }
}

module attributes {stable_mosaic.version = 11 : i64} {
  func.func @_mm_kernel(%arg0: i32, %arg1: i32, %arg2: i32, %arg3: memref<16x192xbf16, #tpu.memory_space<vmem>>, %arg4: memref<192x128xbf16, #tpu.memory_space<vmem>>, %arg5: memref<1x128xf32, #tpu.memory_space<vmem>>, %arg6: memref<16x128xbf16, #tpu.memory_space<vmem>>, %arg7: memref<16x128xf32, #tpu.memory_space<vmem>>) attributes {dimension_semantics = [#tpu.dimension_semantics<parallel>, #tpu.dimension_semantics<parallel>, #tpu.dimension_semantics<arbitrary>], iteration_bounds = array<i64: 1, 1, 1>, scalar_prefetch = 0 : i64, scratch_operands = 1 : i64, tpu.core_type = #tpu.core_type<tc>, window_params = [{transform_indices = @transform_0, window_bounds = array<i64: 16, 192>}, {transform_indices = @transform_1, window_bounds = array<i64: 192, 128>}, {transform_indices = @transform_2, window_bounds = array<i64: 1, 128>}, {transform_indices = @transform_3, window_bounds = array<i64: 16, 128>}]} {
    %c0_i32 = arith.constant 0 : i32
    %0 = arith.cmpi eq, %arg2, %c0_i32 : i32
    %1 = arith.extui %0 : i1 to i32
    %c0_i32_0 = arith.constant 0 : i32
    %2 = arith.cmpi ne, %1, %c0_i32_0 : i32
    scf.if %2 {
      %cst_10 = arith.constant 0.000000e+00 : f32
      %12 = vector.broadcast %cst_10 : f32 to vector<16x128xf32>
      %c0_11 = arith.constant 0 : index
      %c0_12 = arith.constant 0 : index
      %13 = vector.load %arg7[%c0_11, %c0_12] : memref<16x128xf32, #tpu.memory_space<vmem>>, vector<16x128xf32>
      tpu.vector_store %arg7[%c0_11, %c0_12], %12 {strides = array<i32>} : memref<16x128xf32, #tpu.memory_space<vmem>>, vector<16x128xf32>,
    } else {
    }
    %c0 = arith.constant 0 : index
    %c0_1 = arith.constant 0 : index
    %3 = vector.load %arg7[%c0, %c0_1] : memref<16x128xf32, #tpu.memory_space<vmem>>, vector<16x128xf32>
    %c0_2 = arith.constant 0 : index
    %c0_3 = arith.constant 0 : index
    %4 = vector.load %arg3[%c0_2, %c0_3] : memref<16x192xbf16, #tpu.memory_space<vmem>>, vector<16x192xbf16>
    %c0_4 = arith.constant 0 : index
    %c0_5 = arith.constant 0 : index
    %5 = vector.load %arg4[%c0_4, %c0_5] : memref<192x128xbf16, #tpu.memory_space<vmem>>, vector<192x128xbf16>
    %cst = arith.constant dense<0.000000e+00> : vector<16x128xf32>
    %6 = tpu.matmul %4, %5, %cst {dimension_numbers = #tpu.dot_dimension_numbers<[1], [0], [0], [1], [0, 0, 1, 1], [], []>} : vector<16x192xbf16>, vector<192x128xbf16>, vector<16x128xf32> -> vector<16x128xf32>
    %7 = arith.addf %3, %6 : vector<16x128xf32>
    %c0_6 = arith.constant 0 : index
    %c0_7 = arith.constant 0 : index
    %8 = vector.load %arg7[%c0_6, %c0_7] : memref<16x128xf32, #tpu.memory_space<vmem>>, vector<16x128xf32>
    tpu.vector_store %arg7[%c0_6, %c0_7], %7 {strides = array<i32>} : memref<16x128xf32, #tpu.memory_space<vmem>>, vector<16x128xf32>,
    %c0_i32_8 = arith.constant 0 : i32
    %9 = arith.cmpi eq, %arg2, %c0_i32_8 : i32
    %10 = arith.extui %9 : i1 to i32
    %c0_i32_9 = arith.constant 0 : i32
    %11 = arith.cmpi ne, %10, %c0_i32_9 : i32
    scf.if %11 {
      %c0_10 = arith.constant 0 : index
      %c0_11 = arith.constant 0 : index
      %12 = vector.load %arg7[%c0_10, %c0_11] : memref<16x128xf32, #tpu.memory_space<vmem>>, vector<16x128xf32>
      %c0_12 = arith.constant 0 : index
      %c0_13 = arith.constant 0 : index
      %13 = vector.load %arg5[%c0_12, %c0_13] : memref<1x128xf32, #tpu.memory_space<vmem>>, vector<1x128xf32>
      %14 = vector.broadcast %13 : vector<1x128xf32> to vector<16x128xf32>
      %15 = arith.addf %12, %14 : vector<16x128xf32>
      %16 = arith.truncf %15 : vector<16x128xf32> to vector<16x128xbf16>
      %c0_14 = arith.constant 0 : index
      %c0_15 = arith.constant 0 : index
      %17 = vector.load %arg6[%c0_14, %c0_15] : memref<16x128xbf16, #tpu.memory_space<vmem>>, vector<16x128xbf16>
      tpu.vector_store %arg6[%c0_14, %c0_15], %16 {strides = array<i32>} : memref<16x128xbf16, #tpu.memory_space<vmem>>, vector<16x128xbf16>,
    } else {
    }
    return
  }
  func.func @transform_0(%arg0: i32, %arg1: i32, %arg2: i32) -> (i32, i32) {
    %c0_i32 = arith.constant 0 : i32
    return %arg0, %arg2 : i32, i32
  }
  func.func @transform_1(%arg0: i32, %arg1: i32, %arg2: i32) -> (i32, i32) {
    %c0_i32 = arith.constant 0 : i32
    return %arg2, %arg1 : i32, i32
  }
  func.func @transform_2(%arg0: i32, %arg1: i32, %arg2: i32) -> (i32, i32) {
    %c0_i32 = arith.constant 0 : i32
    %c0_i32_0 = arith.constant 0 : i32
    return %c0_i32, %arg1 : i32, i32
  }
  func.func @transform_3(%arg0: i32, %arg1: i32, %arg2: i32) -> (i32, i32) {
    %c0_i32 = arith.constant 0 : i32
    return %arg0, %arg1 : i32, i32
  }
}

module attributes {stable_mosaic.version = 11 : i64} {
  func.func @_ln_mm_kernel(%arg0: i32, %arg1: i32, %arg2: memref<24x128xbf16, #tpu.memory_space<vmem>>, %arg3: memref<1x128xf32, #tpu.memory_space<vmem>>, %arg4: memref<1x128xf32, #tpu.memory_space<vmem>>, %arg5: memref<128x128xbf16, #tpu.memory_space<vmem>>, %arg6: memref<1x128xf32, #tpu.memory_space<vmem>>, %arg7: memref<24x128xbf16, #tpu.memory_space<vmem>>, %arg8: memref<24x128xbf16, #tpu.memory_space<vmem>>) attributes {dimension_semantics = [#tpu.dimension_semantics<parallel>, #tpu.dimension_semantics<arbitrary>], iteration_bounds = array<i64: 1, 3>, scalar_prefetch = 0 : i64, scratch_operands = 1 : i64, tpu.core_type = #tpu.core_type<tc>, window_params = [{transform_indices = @transform_0, window_bounds = array<i64: 24, 128>}, {pipeline_mode = #tpu.pipeline_mode<synchronous>, transform_indices = @transform_1, window_bounds = array<i64: 1, 128>}, {pipeline_mode = #tpu.pipeline_mode<synchronous>, transform_indices = @transform_2, window_bounds = array<i64: 1, 128>}, {transform_indices = @transform_3, window_bounds = array<i64: 128, 128>}, {transform_indices = @transform_4, window_bounds = array<i64: 1, 128>}, {transform_indices = @transform_5, window_bounds = array<i64: 24, 128>}]} {
    %c0_i32 = arith.constant 0 : i32
    %0 = arith.cmpi eq, %arg1, %c0_i32 : i32
    %1 = arith.extui %0 : i1 to i32
    %c0_i32_0 = arith.constant 0 : i32
    %2 = arith.cmpi ne, %1, %c0_i32_0 : i32
    scf.if %2 {
      %c0_8 = arith.constant 0 : index
      %c0_9 = arith.constant 0 : index
      %11 = vector.load %arg2[%c0_8, %c0_9] : memref<24x128xbf16, #tpu.memory_space<vmem>>, vector<24x128xbf16>
      %12 = arith.extf %11 : vector<24x128xbf16> to vector<24x128xf32>
      %cst_10 = arith.constant dense<0.000000e+00> : vector<24xf32>
      %13 = vector.multi_reduction <add>, %12, %cst_10 [1] : vector<24x128xf32> to vector<24xf32>
      %14 = vector.shape_cast %13 : vector<24xf32> to vector<24x1xf32>
      %cst_11 = arith.constant 1.280000e+02 : f32
      %15 = vector.broadcast %cst_11 : f32 to vector<24x1xf32>
      %16 = arith.divf %14, %15 : vector<24x1xf32>
      %17 = vector.broadcast %16 : vector<24x1xf32> to vector<24x128xf32>
      %18 = arith.subf %12, %17 : vector<24x128xf32>
      %19 = arith.mulf %18, %18 : vector<24x128xf32>
      %cst_12 = arith.constant dense<0.000000e+00> : vector<24xf32>
      %20 = vector.multi_reduction <add>, %19, %cst_12 [1] : vector<24x128xf32> to vector<24xf32>
      %21 = vector.shape_cast %20 : vector<24xf32> to vector<24x1xf32>
      %cst_13 = arith.constant 1.280000e+02 : f32
      %22 = vector.broadcast %cst_13 : f32 to vector<24x1xf32>
      %23 = arith.divf %21, %22 : vector<24x1xf32>
      %cst_14 = arith.constant 9.99999974E-6 : f32
      %24 = vector.broadcast %cst_14 : f32 to vector<24x1xf32>
      %25 = arith.addf %23, %24 : vector<24x1xf32>
      %26 = math.rsqrt %25 : vector<24x1xf32>
      %27 = vector.broadcast %26 : vector<24x1xf32> to vector<24x128xf32>
      %28 = arith.mulf %18, %27 : vector<24x128xf32>
      %c0_15 = arith.constant 0 : index
      %c0_16 = arith.constant 0 : index
      %29 = vector.load %arg3[%c0_15, %c0_16] : memref<1x128xf32, #tpu.memory_space<vmem>>, vector<1x128xf32>
      %30 = vector.broadcast %29 : vector<1x128xf32> to vector<24x128xf32>
      %31 = arith.mulf %28, %30 : vector<24x128xf32>
      %c0_17 = arith.constant 0 : index
      %c0_18 = arith.constant 0 : index
      %32 = vector.load %arg4[%c0_17, %c0_18] : memref<1x128xf32, #tpu.memory_space<vmem>>, vector<1x128xf32>
      %33 = vector.broadcast %32 : vector<1x128xf32> to vector<24x128xf32>
      %34 = arith.addf %31, %33 : vector<24x128xf32>
      %35 = arith.truncf %34 : vector<24x128xf32> to vector<24x128xbf16>
      %c0_19 = arith.constant 0 : index
      %c0_20 = arith.constant 0 : index
      %36 = vector.load %arg8[%c0_19, %c0_20] : memref<24x128xbf16, #tpu.memory_space<vmem>>, vector<24x128xbf16>
      tpu.vector_store %arg8[%c0_19, %c0_20], %35 {strides = array<i32>} : memref<24x128xbf16, #tpu.memory_space<vmem>>, vector<24x128xbf16>,
    } else {
    }
    %c0 = arith.constant 0 : index
    %c0_1 = arith.constant 0 : index
    %3 = vector.load %arg8[%c0, %c0_1] : memref<24x128xbf16, #tpu.memory_space<vmem>>, vector<24x128xbf16>
    %c0_2 = arith.constant 0 : index
    %c0_3 = arith.constant 0 : index
    %4 = vector.load %arg5[%c0_2, %c0_3] : memref<128x128xbf16, #tpu.memory_space<vmem>>, vector<128x128xbf16>
    %cst = arith.constant dense<0.000000e+00> : vector<24x128xf32>
    %5 = tpu.matmul %3, %4, %cst {dimension_numbers = #tpu.dot_dimension_numbers<[1], [0], [0], [1], [0, 0, 1, 1], [], []>} : vector<24x128xbf16>, vector<128x128xbf16>, vector<24x128xf32> -> vector<24x128xf32>
    %c0_4 = arith.constant 0 : index
    %c0_5 = arith.constant 0 : index
    %6 = vector.load %arg6[%c0_4, %c0_5] : memref<1x128xf32, #tpu.memory_space<vmem>>, vector<1x128xf32>
    %7 = vector.broadcast %6 : vector<1x128xf32> to vector<24x128xf32>
    %8 = arith.addf %5, %7 : vector<24x128xf32>
    %9 = arith.truncf %8 : vector<24x128xf32> to vector<24x128xbf16>
    %c0_6 = arith.constant 0 : index
    %c0_7 = arith.constant 0 : index
    %10 = vector.load %arg7[%c0_6, %c0_7] : memref<24x128xbf16, #tpu.memory_space<vmem>>, vector<24x128xbf16>
    tpu.vector_store %arg7[%c0_6, %c0_7], %9 {strides = array<i32>} : memref<24x128xbf16, #tpu.memory_space<vmem>>, vector<24x128xbf16>,
    return
  }
  func.func @transform_0(%arg0: i32, %arg1: i32) -> (i32, i32) {
    %c0_i32 = arith.constant 0 : i32
    %c0_i32_0 = arith.constant 0 : i32
    return %arg0, %c0_i32 : i32, i32
  }
  func.func @transform_1(%arg0: i32, %arg1: i32) -> (i32, i32) {
    %c0_i32 = arith.constant 0 : i32
    %c0_i32_0 = arith.constant 0 : i32
    %c0_i32_1 = arith.constant 0 : i32
    return %c0_i32, %c0_i32_0 : i32, i32
  }
  func.func @transform_2(%arg0: i32, %arg1: i32) -> (i32, i32) {
    %c0_i32 = arith.constant 0 : i32
    %c0_i32_0 = arith.constant 0 : i32
    %c0_i32_1 = arith.constant 0 : i32
    return %c0_i32, %c0_i32_0 : i32, i32
  }
  func.func @transform_3(%arg0: i32, %arg1: i32) -> (i32, i32) {
    %c0_i32 = arith.constant 0 : i32
    %c0_i32_0 = arith.constant 0 : i32
    return %c0_i32, %arg1 : i32, i32
  }
  func.func @transform_4(%arg0: i32, %arg1: i32) -> (i32, i32) {
    %c0_i32 = arith.constant 0 : i32
    %c0_i32_0 = arith.constant 0 : i32
    return %c0_i32, %arg1 : i32, i32
  }
  func.func @transform_5(%arg0: i32, %arg1: i32) -> (i32, i32) {
    %c0_i32 = arith.constant 0 : i32
    return %arg0, %arg1 : i32, i32
  }
}

module attributes {stable_mosaic.version = 11 : i64} {
  func.func @_attn_kernel(%arg0: i32, %arg1: memref<2x5x384xbf16, #tpu.memory_space<vmem>>, %arg2: memref<2x5x128xbf16, #tpu.memory_space<vmem>>) attributes {dimension_semantics = [#tpu.dimension_semantics<parallel>], iteration_bounds = array<i64: 2>, scalar_prefetch = 0 : i64, scratch_operands = 0 : i64, tpu.core_type = #tpu.core_type<tc>, window_params = [{transform_indices = @transform_0, window_bounds = array<i64: 2, 5, 384>}, {transform_indices = @transform_1, window_bounds = array<i64: 2, 5, 128>}]} {
    %c0 = arith.constant 0 : index
    %c0_0 = arith.constant 0 : index
    %c0_1 = arith.constant 0 : index
    %0 = vector.load %arg1[%c0, %c0_0, %c0_1] : memref<2x5x384xbf16, #tpu.memory_space<vmem>>, vector<2x5x32xbf16>
    %c0_2 = arith.constant 0 : index
    %c0_3 = arith.constant 0 : index
    %c128 = arith.constant 128 : index
    %1 = vector.load %arg1[%c0_2, %c0_3, %c128] : memref<2x5x384xbf16, #tpu.memory_space<vmem>>, vector<2x5x32xbf16>
    %c0_4 = arith.constant 0 : index
    %c0_5 = arith.constant 0 : index
    %c256 = arith.constant 256 : index
    %2 = vector.load %arg1[%c0_4, %c0_5, %c256] : memref<2x5x384xbf16, #tpu.memory_space<vmem>>, vector<2x5x32xbf16>
    "tpu.trace_start"() <{level = 10 : i32, message = "bqd,bkd->bqk"}> : () -> ()
    %cst = arith.constant dense<0.000000e+00> : vector<2x5x5xf32>
    %3 = tpu.matmul %0, %1, %cst {dimension_numbers = #tpu.dot_dimension_numbers<[2], [2], [1], [1], [0, 0, 0, 1, 1, 1], [0], [0]>} : vector<2x5x32xbf16>, vector<2x5x32xbf16>, vector<2x5x5xf32> -> vector<2x5x5xf32>
    "tpu.trace_stop"() : () -> ()
    %cst_6 = arith.constant dense<0xFF800000> : vector<2x5xf32>
    %4 = vector.multi_reduction <maximumf>, %3, %cst_6 [2] : vector<2x5x5xf32> to vector<2x5xf32>
    %5 = vector.shape_cast %4 : vector<2x5xf32> to vector<2x5x1xf32>
    %6 = vector.broadcast %5 : vector<2x5x1xf32> to vector<2x5x5xf32>
    %7 = arith.subf %3, %6 : vector<2x5x5xf32>
    %8 = math.exp %7 : vector<2x5x5xf32>
    %cst_7 = arith.constant dense<0.000000e+00> : vector<2x5xf32>
    %9 = vector.multi_reduction <add>, %8, %cst_7 [2] : vector<2x5x5xf32> to vector<2x5xf32>
    %10 = vector.shape_cast %9 : vector<2x5xf32> to vector<2x5x1xf32>
    %11 = tpu.reciprocal %10 {approx = true} : vector<2x5x1xf32> -> vector<2x5x1xf32>
    %12 = vector.broadcast %11 : vector<2x5x1xf32> to vector<2x5x5xf32>
    %13 = arith.mulf %8, %12 : vector<2x5x5xf32>
    %14 = arith.truncf %13 : vector<2x5x5xf32> to vector<2x5x5xbf16>
    "tpu.trace_start"() <{level = 10 : i32, message = "bqk,bkd->bqd"}> : () -> ()
    %cst_8 = arith.constant dense<0.000000e+00> : vector<2x5x32xf32>
    %15 = tpu.matmul %14, %2, %cst_8 {dimension_numbers = #tpu.dot_dimension_numbers<[2], [1], [1], [2], [0, 0, 0, 1, 1, 2], [0], [0]>} : vector<2x5x5xbf16>, vector<2x5x32xbf16>, vector<2x5x32xf32> -> vector<2x5x32xf32>
    "tpu.trace_stop"() : () -> ()
    %16 = arith.truncf %15 : vector<2x5x32xf32> to vector<2x5x32xbf16>
    %c0_9 = arith.constant 0 : index
    %c0_10 = arith.constant 0 : index
    %c32 = arith.constant 32 : index
    %17 = vector.load %arg1[%c0_9, %c0_10, %c32] : memref<2x5x384xbf16, #tpu.memory_space<vmem>>, vector<2x5x32xbf16>
    %c0_11 = arith.constant 0 : index
    %c0_12 = arith.constant 0 : index
    %c160 = arith.constant 160 : index
    %18 = vector.load %arg1[%c0_11, %c0_12, %c160] : memref<2x5x384xbf16, #tpu.memory_space<vmem>>, vector<2x5x32xbf16>
    %c0_13 = arith.constant 0 : index
    %c0_14 = arith.constant 0 : index
    %c288 = arith.constant 288 : index
    %19 = vector.load %arg1[%c0_13, %c0_14, %c288] : memref<2x5x384xbf16, #tpu.memory_space<vmem>>, vector<2x5x32xbf16>
    "tpu.trace_start"() <{level = 10 : i32, message = "bqd,bkd->bqk"}> : () -> ()
    %cst_15 = arith.constant dense<0.000000e+00> : vector<2x5x5xf32>
    %20 = tpu.matmul %17, %18, %cst_15 {dimension_numbers = #tpu.dot_dimension_numbers<[2], [2], [1], [1], [0, 0, 0, 1, 1, 1], [0], [0]>} : vector<2x5x32xbf16>, vector<2x5x32xbf16>, vector<2x5x5xf32> -> vector<2x5x5xf32>
    "tpu.trace_stop"() : () -> ()
    %cst_16 = arith.constant dense<0xFF800000> : vector<2x5xf32>
    %21 = vector.multi_reduction <maximumf>, %20, %cst_16 [2] : vector<2x5x5xf32> to vector<2x5xf32>
    %22 = vector.shape_cast %21 : vector<2x5xf32> to vector<2x5x1xf32>
    %23 = vector.broadcast %22 : vector<2x5x1xf32> to vector<2x5x5xf32>
    %24 = arith.subf %20, %23 : vector<2x5x5xf32>
    %25 = math.exp %24 : vector<2x5x5xf32>
    %cst_17 = arith.constant dense<0.000000e+00> : vector<2x5xf32>
    %26 = vector.multi_reduction <add>, %25, %cst_17 [2] : vector<2x5x5xf32> to vector<2x5xf32>
    %27 = vector.shape_cast %26 : vector<2x5xf32> to vector<2x5x1xf32>
    %28 = tpu.reciprocal %27 {approx = true} : vector<2x5x1xf32> -> vector<2x5x1xf32>
    %29 = vector.broadcast %28 : vector<2x5x1xf32> to vector<2x5x5xf32>
    %30 = arith.mulf %25, %29 : vector<2x5x5xf32>
    %31 = arith.truncf %30 : vector<2x5x5xf32> to vector<2x5x5xbf16>
    "tpu.trace_start"() <{level = 10 : i32, message = "bqk,bkd->bqd"}> : () -> ()
    %cst_18 = arith.constant dense<0.000000e+00> : vector<2x5x32xf32>
    %32 = tpu.matmul %31, %19, %cst_18 {dimension_numbers = #tpu.dot_dimension_numbers<[2], [1], [1], [2], [0, 0, 0, 1, 1, 2], [0], [0]>} : vector<2x5x5xbf16>, vector<2x5x32xbf16>, vector<2x5x32xf32> -> vector<2x5x32xf32>
    "tpu.trace_stop"() : () -> ()
    %33 = arith.truncf %32 : vector<2x5x32xf32> to vector<2x5x32xbf16>
    %c0_19 = arith.constant 0 : index
    %c0_20 = arith.constant 0 : index
    %c64 = arith.constant 64 : index
    %34 = vector.load %arg1[%c0_19, %c0_20, %c64] : memref<2x5x384xbf16, #tpu.memory_space<vmem>>, vector<2x5x32xbf16>
    %c0_21 = arith.constant 0 : index
    %c0_22 = arith.constant 0 : index
    %c192 = arith.constant 192 : index
    %35 = vector.load %arg1[%c0_21, %c0_22, %c192] : memref<2x5x384xbf16, #tpu.memory_space<vmem>>, vector<2x5x32xbf16>
    %c0_23 = arith.constant 0 : index
    %c0_24 = arith.constant 0 : index
    %c320 = arith.constant 320 : index
    %36 = vector.load %arg1[%c0_23, %c0_24, %c320] : memref<2x5x384xbf16, #tpu.memory_space<vmem>>, vector<2x5x32xbf16>
    "tpu.trace_start"() <{level = 10 : i32, message = "bqd,bkd->bqk"}> : () -> ()
    %cst_25 = arith.constant dense<0.000000e+00> : vector<2x5x5xf32>
    %37 = tpu.matmul %34, %35, %cst_25 {dimension_numbers = #tpu.dot_dimension_numbers<[2], [2], [1], [1], [0, 0, 0, 1, 1, 1], [0], [0]>} : vector<2x5x32xbf16>, vector<2x5x32xbf16>, vector<2x5x5xf32> -> vector<2x5x5xf32>
    "tpu.trace_stop"() : () -> ()
    %cst_26 = arith.constant dense<0xFF800000> : vector<2x5xf32>
    %38 = vector.multi_reduction <maximumf>, %37, %cst_26 [2] : vector<2x5x5xf32> to vector<2x5xf32>
    %39 = vector.shape_cast %38 : vector<2x5xf32> to vector<2x5x1xf32>
    %40 = vector.broadcast %39 : vector<2x5x1xf32> to vector<2x5x5xf32>
    %41 = arith.subf %37, %40 : vector<2x5x5xf32>
    %42 = math.exp %41 : vector<2x5x5xf32>
    %cst_27 = arith.constant dense<0.000000e+00> : vector<2x5xf32>
    %43 = vector.multi_reduction <add>, %42, %cst_27 [2] : vector<2x5x5xf32> to vector<2x5xf32>
    %44 = vector.shape_cast %43 : vector<2x5xf32> to vector<2x5x1xf32>
    %45 = tpu.reciprocal %44 {approx = true} : vector<2x5x1xf32> -> vector<2x5x1xf32>
    %46 = vector.broadcast %45 : vector<2x5x1xf32> to vector<2x5x5xf32>
    %47 = arith.mulf %42, %46 : vector<2x5x5xf32>
    %48 = arith.truncf %47 : vector<2x5x5xf32> to vector<2x5x5xbf16>
    "tpu.trace_start"() <{level = 10 : i32, message = "bqk,bkd->bqd"}> : () -> ()
    %cst_28 = arith.constant dense<0.000000e+00> : vector<2x5x32xf32>
    %49 = tpu.matmul %48, %36, %cst_28 {dimension_numbers = #tpu.dot_dimension_numbers<[2], [1], [1], [2], [0, 0, 0, 1, 1, 2], [0], [0]>} : vector<2x5x5xbf16>, vector<2x5x32xbf16>, vector<2x5x32xf32> -> vector<2x5x32xf32>
    "tpu.trace_stop"() : () -> ()
    %50 = arith.truncf %49 : vector<2x5x32xf32> to vector<2x5x32xbf16>
    %c0_29 = arith.constant 0 : index
    %c0_30 = arith.constant 0 : index
    %c96 = arith.constant 96 : index
    %51 = vector.load %arg1[%c0_29, %c0_30, %c96] : memref<2x5x384xbf16, #tpu.memory_space<vmem>>, vector<2x5x32xbf16>
    %c0_31 = arith.constant 0 : index
    %c0_32 = arith.constant 0 : index
    %c224 = arith.constant 224 : index
    %52 = vector.load %arg1[%c0_31, %c0_32, %c224] : memref<2x5x384xbf16, #tpu.memory_space<vmem>>, vector<2x5x32xbf16>
    %c0_33 = arith.constant 0 : index
    %c0_34 = arith.constant 0 : index
    %c352 = arith.constant 352 : index
    %53 = vector.load %arg1[%c0_33, %c0_34, %c352] : memref<2x5x384xbf16, #tpu.memory_space<vmem>>, vector<2x5x32xbf16>
    "tpu.trace_start"() <{level = 10 : i32, message = "bqd,bkd->bqk"}> : () -> ()
    %cst_35 = arith.constant dense<0.000000e+00> : vector<2x5x5xf32>
    %54 = tpu.matmul %51, %52, %cst_35 {dimension_numbers = #tpu.dot_dimension_numbers<[2], [2], [1], [1], [0, 0, 0, 1, 1, 1], [0], [0]>} : vector<2x5x32xbf16>, vector<2x5x32xbf16>, vector<2x5x5xf32> -> vector<2x5x5xf32>
    "tpu.trace_stop"() : () -> ()
    %cst_36 = arith.constant dense<0xFF800000> : vector<2x5xf32>
    %55 = vector.multi_reduction <maximumf>, %54, %cst_36 [2] : vector<2x5x5xf32> to vector<2x5xf32>
    %56 = vector.shape_cast %55 : vector<2x5xf32> to vector<2x5x1xf32>
    %57 = vector.broadcast %56 : vector<2x5x1xf32> to vector<2x5x5xf32>
    %58 = arith.subf %54, %57 : vector<2x5x5xf32>
    %59 = math.exp %58 : vector<2x5x5xf32>
    %cst_37 = arith.constant dense<0.000000e+00> : vector<2x5xf32>
    %60 = vector.multi_reduction <add>, %59, %cst_37 [2] : vector<2x5x5xf32> to vector<2x5xf32>
    %61 = vector.shape_cast %60 : vector<2x5xf32> to vector<2x5x1xf32>
    %62 = tpu.reciprocal %61 {approx = true} : vector<2x5x1xf32> -> vector<2x5x1xf32>
    %63 = vector.broadcast %62 : vector<2x5x1xf32> to vector<2x5x5xf32>
    %64 = arith.mulf %59, %63 : vector<2x5x5xf32>
    %65 = arith.truncf %64 : vector<2x5x5xf32> to vector<2x5x5xbf16>
    "tpu.trace_start"() <{level = 10 : i32, message = "bqk,bkd->bqd"}> : () -> ()
    %cst_38 = arith.constant dense<0.000000e+00> : vector<2x5x32xf32>
    %66 = tpu.matmul %65, %53, %cst_38 {dimension_numbers = #tpu.dot_dimension_numbers<[2], [1], [1], [2], [0, 0, 0, 1, 1, 2], [0], [0]>} : vector<2x5x5xbf16>, vector<2x5x32xbf16>, vector<2x5x32xf32> -> vector<2x5x32xf32>
    "tpu.trace_stop"() : () -> ()
    %67 = arith.truncf %66 : vector<2x5x32xf32> to vector<2x5x32xbf16>
    %68 = tpu.concatenate %16, %33, %50, %67 in 2 : vector<2x5x32xbf16>, vector<2x5x32xbf16>, vector<2x5x32xbf16>, vector<2x5x32xbf16> -> vector<2x5x128xbf16>
    %c0_39 = arith.constant 0 : index
    %c0_40 = arith.constant 0 : index
    %c0_41 = arith.constant 0 : index
    %69 = vector.load %arg2[%c0_39, %c0_40, %c0_41] : memref<2x5x128xbf16, #tpu.memory_space<vmem>>, vector<2x5x128xbf16>
    tpu.vector_store %arg2[%c0_39, %c0_40, %c0_41], %68 {strides = array<i32>} : memref<2x5x128xbf16, #tpu.memory_space<vmem>>, vector<2x5x128xbf16>,
    return
  }
  func.func @transform_0(%arg0: i32) -> (i32, i32, i32) {
    %c0_i32 = arith.constant 0 : i32
    %c0_i32_0 = arith.constant 0 : i32
    %c0_i32_1 = arith.constant 0 : i32
    return %arg0, %c0_i32, %c0_i32_0 : i32, i32, i32
  }
  func.func @transform_1(%arg0: i32) -> (i32, i32, i32) {
    %c0_i32 = arith.constant 0 : i32
    %c0_i32_0 = arith.constant 0 : i32
    %c0_i32_1 = arith.constant 0 : i32
    return %arg0, %c0_i32, %c0_i32_0 : i32, i32, i32
  }
}

module attributes {stable_mosaic.version = 11 : i64} {
  func.func @_mm_kernel(%arg0: i32, %arg1: i32, %arg2: i32, %arg3: memref<24x128xbf16, #tpu.memory_space<vmem>>, %arg4: memref<128x128xbf16, #tpu.memory_space<vmem>>, %arg5: memref<1x128xf32, #tpu.memory_space<vmem>>, %arg6: memref<24x128xbf16, #tpu.memory_space<vmem>>, %arg7: memref<24x128xbf16, #tpu.memory_space<vmem>>, %arg8: memref<24x128xf32, #tpu.memory_space<vmem>>) attributes {dimension_semantics = [#tpu.dimension_semantics<parallel>, #tpu.dimension_semantics<parallel>, #tpu.dimension_semantics<arbitrary>], iteration_bounds = array<i64: 1, 1, 1>, scalar_prefetch = 0 : i64, scratch_operands = 1 : i64, tpu.core_type = #tpu.core_type<tc>, window_params = [{transform_indices = @transform_0, window_bounds = array<i64: 24, 128>}, {transform_indices = @transform_1, window_bounds = array<i64: 128, 128>}, {transform_indices = @transform_2, window_bounds = array<i64: 1, 128>}, {transform_indices = @transform_3, window_bounds = array<i64: 24, 128>}, {transform_indices = @transform_4, window_bounds = array<i64: 24, 128>}]} {
    %c0_i32 = arith.constant 0 : i32
    %0 = arith.cmpi eq, %arg2, %c0_i32 : i32
    %1 = arith.extui %0 : i1 to i32
    %c0_i32_0 = arith.constant 0 : i32
    %2 = arith.cmpi ne, %1, %c0_i32_0 : i32
    scf.if %2 {
      %cst_10 = arith.constant 0.000000e+00 : f32
      %12 = vector.broadcast %cst_10 : f32 to vector<24x128xf32>
      %c0_11 = arith.constant 0 : index
      %c0_12 = arith.constant 0 : index
      %13 = vector.load %arg8[%c0_11, %c0_12] : memref<24x128xf32, #tpu.memory_space<vmem>>, vector<24x128xf32>
      tpu.vector_store %arg8[%c0_11, %c0_12], %12 {strides = array<i32>} : memref<24x128xf32, #tpu.memory_space<vmem>>, vector<24x128xf32>,
    } else {
    }
    %c0 = arith.constant 0 : index
    %c0_1 = arith.constant 0 : index
    %3 = vector.load %arg8[%c0, %c0_1] : memref<24x128xf32, #tpu.memory_space<vmem>>, vector<24x128xf32>
    %c0_2 = arith.constant 0 : index
    %c0_3 = arith.constant 0 : index
    %4 = vector.load %arg3[%c0_2, %c0_3] : memref<24x128xbf16, #tpu.memory_space<vmem>>, vector<24x128xbf16>
    %c0_4 = arith.constant 0 : index
    %c0_5 = arith.constant 0 : index
    %5 = vector.load %arg4[%c0_4, %c0_5] : memref<128x128xbf16, #tpu.memory_space<vmem>>, vector<128x128xbf16>
    %cst = arith.constant dense<0.000000e+00> : vector<24x128xf32>
    %6 = tpu.matmul %4, %5, %cst {dimension_numbers = #tpu.dot_dimension_numbers<[1], [0], [0], [1], [0, 0, 1, 1], [], []>} : vector<24x128xbf16>, vector<128x128xbf16>, vector<24x128xf32> -> vector<24x128xf32>
    %7 = arith.addf %3, %6 : vector<24x128xf32>
    %c0_6 = arith.constant 0 : index
    %c0_7 = arith.constant 0 : index
    %8 = vector.load %arg8[%c0_6, %c0_7] : memref<24x128xf32, #tpu.memory_space<vmem>>, vector<24x128xf32>
    tpu.vector_store %arg8[%c0_6, %c0_7], %7 {strides = array<i32>} : memref<24x128xf32, #tpu.memory_space<vmem>>, vector<24x128xf32>,
    %c0_i32_8 = arith.constant 0 : i32
    %9 = arith.cmpi eq, %arg2, %c0_i32_8 : i32
    %10 = arith.extui %9 : i1 to i32
    %c0_i32_9 = arith.constant 0 : i32
    %11 = arith.cmpi ne, %10, %c0_i32_9 : i32
    scf.if %11 {
      %c0_10 = arith.constant 0 : index
      %c0_11 = arith.constant 0 : index
      %12 = vector.load %arg8[%c0_10, %c0_11] : memref<24x128xf32, #tpu.memory_space<vmem>>, vector<24x128xf32>
      %c0_12 = arith.constant 0 : index
      %c0_13 = arith.constant 0 : index
      %13 = vector.load %arg5[%c0_12, %c0_13] : memref<1x128xf32, #tpu.memory_space<vmem>>, vector<1x128xf32>
      %14 = vector.broadcast %13 : vector<1x128xf32> to vector<24x128xf32>
      %15 = arith.addf %12, %14 : vector<24x128xf32>
      %c0_14 = arith.constant 0 : index
      %c0_15 = arith.constant 0 : index
      %16 = vector.load %arg6[%c0_14, %c0_15] : memref<24x128xbf16, #tpu.memory_space<vmem>>, vector<24x128xbf16>
      %17 = arith.extf %16 : vector<24x128xbf16> to vector<24x128xf32>
      %18 = arith.addf %15, %17 : vector<24x128xf32>
      %19 = arith.truncf %18 : vector<24x128xf32> to vector<24x128xbf16>
      %c0_16 = arith.constant 0 : index
      %c0_17 = arith.constant 0 : index
      %20 = vector.load %arg7[%c0_16, %c0_17] : memref<24x128xbf16, #tpu.memory_space<vmem>>, vector<24x128xbf16>
      tpu.vector_store %arg7[%c0_16, %c0_17], %19 {strides = array<i32>} : memref<24x128xbf16, #tpu.memory_space<vmem>>, vector<24x128xbf16>,
    } else {
    }
    return
  }
  func.func @transform_0(%arg0: i32, %arg1: i32, %arg2: i32) -> (i32, i32) {
    %c0_i32 = arith.constant 0 : i32
    return %arg0, %arg2 : i32, i32
  }
  func.func @transform_1(%arg0: i32, %arg1: i32, %arg2: i32) -> (i32, i32) {
    %c0_i32 = arith.constant 0 : i32
    return %arg2, %arg1 : i32, i32
  }
  func.func @transform_2(%arg0: i32, %arg1: i32, %arg2: i32) -> (i32, i32) {
    %c0_i32 = arith.constant 0 : i32
    %c0_i32_0 = arith.constant 0 : i32
    return %c0_i32, %arg1 : i32, i32
  }
  func.func @transform_3(%arg0: i32, %arg1: i32, %arg2: i32) -> (i32, i32) {
    %c0_i32 = arith.constant 0 : i32
    return %arg0, %arg1 : i32, i32
  }
  func.func @transform_4(%arg0: i32, %arg1: i32, %arg2: i32) -> (i32, i32) {
    %c0_i32 = arith.constant 0 : i32
    return %arg0, %arg1 : i32, i32
  }
}

module attributes {stable_mosaic.version = 11 : i64} {
  func.func @_ln_mm_kernel(%arg0: i32, %arg1: i32, %arg2: memref<24x128xbf16, #tpu.memory_space<vmem>>, %arg3: memref<1x128xf32, #tpu.memory_space<vmem>>, %arg4: memref<1x128xf32, #tpu.memory_space<vmem>>, %arg5: memref<128x256xbf16, #tpu.memory_space<vmem>>, %arg6: memref<1x256xf32, #tpu.memory_space<vmem>>, %arg7: memref<24x256xbf16, #tpu.memory_space<vmem>>, %arg8: memref<24x128xbf16, #tpu.memory_space<vmem>>) attributes {dimension_semantics = [#tpu.dimension_semantics<parallel>, #tpu.dimension_semantics<arbitrary>], iteration_bounds = array<i64: 1, 2>, scalar_prefetch = 0 : i64, scratch_operands = 1 : i64, tpu.core_type = #tpu.core_type<tc>, window_params = [{transform_indices = @transform_0, window_bounds = array<i64: 24, 128>}, {pipeline_mode = #tpu.pipeline_mode<synchronous>, transform_indices = @transform_1, window_bounds = array<i64: 1, 128>}, {pipeline_mode = #tpu.pipeline_mode<synchronous>, transform_indices = @transform_2, window_bounds = array<i64: 1, 128>}, {transform_indices = @transform_3, window_bounds = array<i64: 128, 256>}, {transform_indices = @transform_4, window_bounds = array<i64: 1, 256>}, {transform_indices = @transform_5, window_bounds = array<i64: 24, 256>}]} {
    %c0_i32 = arith.constant 0 : i32
    %0 = arith.cmpi eq, %arg1, %c0_i32 : i32
    %1 = arith.extui %0 : i1 to i32
    %c0_i32_0 = arith.constant 0 : i32
    %2 = arith.cmpi ne, %1, %c0_i32_0 : i32
    scf.if %2 {
      %c0_10 = arith.constant 0 : index
      %c0_11 = arith.constant 0 : index
      %19 = vector.load %arg2[%c0_10, %c0_11] : memref<24x128xbf16, #tpu.memory_space<vmem>>, vector<24x128xbf16>
      %20 = arith.extf %19 : vector<24x128xbf16> to vector<24x128xf32>
      %cst_12 = arith.constant dense<0.000000e+00> : vector<24xf32>
      %21 = vector.multi_reduction <add>, %20, %cst_12 [1] : vector<24x128xf32> to vector<24xf32>
      %22 = vector.shape_cast %21 : vector<24xf32> to vector<24x1xf32>
      %cst_13 = arith.constant 1.280000e+02 : f32
      %23 = vector.broadcast %cst_13 : f32 to vector<24x1xf32>
      %24 = arith.divf %22, %23 : vector<24x1xf32>
      %25 = vector.broadcast %24 : vector<24x1xf32> to vector<24x128xf32>
      %26 = arith.subf %20, %25 : vector<24x128xf32>
      %27 = arith.mulf %26, %26 : vector<24x128xf32>
      %cst_14 = arith.constant dense<0.000000e+00> : vector<24xf32>
      %28 = vector.multi_reduction <add>, %27, %cst_14 [1] : vector<24x128xf32> to vector<24xf32>
      %29 = vector.shape_cast %28 : vector<24xf32> to vector<24x1xf32>
      %cst_15 = arith.constant 1.280000e+02 : f32
      %30 = vector.broadcast %cst_15 : f32 to vector<24x1xf32>
      %31 = arith.divf %29, %30 : vector<24x1xf32>
      %cst_16 = arith.constant 9.99999974E-6 : f32
      %32 = vector.broadcast %cst_16 : f32 to vector<24x1xf32>
      %33 = arith.addf %31, %32 : vector<24x1xf32>
      %34 = math.rsqrt %33 : vector<24x1xf32>
      %35 = vector.broadcast %34 : vector<24x1xf32> to vector<24x128xf32>
      %36 = arith.mulf %26, %35 : vector<24x128xf32>
      %c0_17 = arith.constant 0 : index
      %c0_18 = arith.constant 0 : index
      %37 = vector.load %arg3[%c0_17, %c0_18] : memref<1x128xf32, #tpu.memory_space<vmem>>, vector<1x128xf32>
      %38 = vector.broadcast %37 : vector<1x128xf32> to vector<24x128xf32>
      %39 = arith.mulf %36, %38 : vector<24x128xf32>
      %c0_19 = arith.constant 0 : index
      %c0_20 = arith.constant 0 : index
      %40 = vector.load %arg4[%c0_19, %c0_20] : memref<1x128xf32, #tpu.memory_space<vmem>>, vector<1x128xf32>
      %41 = vector.broadcast %40 : vector<1x128xf32> to vector<24x128xf32>
      %42 = arith.addf %39, %41 : vector<24x128xf32>
      %43 = arith.truncf %42 : vector<24x128xf32> to vector<24x128xbf16>
      %c0_21 = arith.constant 0 : index
      %c0_22 = arith.constant 0 : index
      %44 = vector.load %arg8[%c0_21, %c0_22] : memref<24x128xbf16, #tpu.memory_space<vmem>>, vector<24x128xbf16>
      tpu.vector_store %arg8[%c0_21, %c0_22], %43 {strides = array<i32>} : memref<24x128xbf16, #tpu.memory_space<vmem>>, vector<24x128xbf16>,
    } else {
    }
    %c0 = arith.constant 0 : index
    %c0_1 = arith.constant 0 : index
    %3 = vector.load %arg8[%c0, %c0_1] : memref<24x128xbf16, #tpu.memory_space<vmem>>, vector<24x128xbf16>
    %c0_2 = arith.constant 0 : index
    %c0_3 = arith.constant 0 : index
    %4 = vector.load %arg5[%c0_2, %c0_3] : memref<128x256xbf16, #tpu.memory_space<vmem>>, vector<128x256xbf16>
    %cst = arith.constant dense<0.000000e+00> : vector<24x256xf32>
    %5 = tpu.matmul %3, %4, %cst {dimension_numbers = #tpu.dot_dimension_numbers<[1], [0], [0], [1], [0, 0, 1, 1], [], []>} : vector<24x128xbf16>, vector<128x256xbf16>, vector<24x256xf32> -> vector<24x256xf32>
    %c0_4 = arith.constant 0 : index
    %c0_5 = arith.constant 0 : index
    %6 = vector.load %arg6[%c0_4, %c0_5] : memref<1x256xf32, #tpu.memory_space<vmem>>, vector<1x256xf32>
    %7 = vector.broadcast %6 : vector<1x256xf32> to vector<24x256xf32>
    %8 = arith.addf %5, %7 : vector<24x256xf32>
    %cst_6 = arith.constant 1.702000e+00 : f32
    %9 = vector.broadcast %cst_6 : f32 to vector<24x256xf32>
    %10 = arith.mulf %9, %8 : vector<24x256xf32>
    %11 = arith.negf %10 : vector<24x256xf32>
    %12 = math.exp %11 : vector<24x256xf32>
    %cst_7 = arith.constant 1.000000e+00 : f32
    %13 = vector.broadcast %cst_7 : f32 to vector<24x256xf32>
    %14 = arith.addf %13, %12 : vector<24x256xf32>
    %15 = arith.divf %13, %14 : vector<24x256xf32>
    %16 = arith.mulf %8, %15 : vector<24x256xf32>
    %17 = arith.truncf %16 : vector<24x256xf32> to vector<24x256xbf16>
    %c0_8 = arith.constant 0 : index
    %c0_9 = arith.constant 0 : index
    %18 = vector.load %arg7[%c0_8, %c0_9] : memref<24x256xbf16, #tpu.memory_space<vmem>>, vector<24x256xbf16>
    tpu.vector_store %arg7[%c0_8, %c0_9], %17 {strides = array<i32>} : memref<24x256xbf16, #tpu.memory_space<vmem>>, vector<24x256xbf16>,
    return
  }
  func.func @transform_0(%arg0: i32, %arg1: i32) -> (i32, i32) {
    %c0_i32 = arith.constant 0 : i32
    %c0_i32_0 = arith.constant 0 : i32
    return %arg0, %c0_i32 : i32, i32
  }
  func.func @transform_1(%arg0: i32, %arg1: i32) -> (i32, i32) {
    %c0_i32 = arith.constant 0 : i32
    %c0_i32_0 = arith.constant 0 : i32
    %c0_i32_1 = arith.constant 0 : i32
    return %c0_i32, %c0_i32_0 : i32, i32
  }
  func.func @transform_2(%arg0: i32, %arg1: i32) -> (i32, i32) {
    %c0_i32 = arith.constant 0 : i32
    %c0_i32_0 = arith.constant 0 : i32
    %c0_i32_1 = arith.constant 0 : i32
    return %c0_i32, %c0_i32_0 : i32, i32
  }
  func.func @transform_3(%arg0: i32, %arg1: i32) -> (i32, i32) {
    %c0_i32 = arith.constant 0 : i32
    %c0_i32_0 = arith.constant 0 : i32
    return %c0_i32, %arg1 : i32, i32
  }
  func.func @transform_4(%arg0: i32, %arg1: i32) -> (i32, i32) {
    %c0_i32 = arith.constant 0 : i32
    %c0_i32_0 = arith.constant 0 : i32
    return %c0_i32, %arg1 : i32, i32
  }
  func.func @transform_5(%arg0: i32, %arg1: i32) -> (i32, i32) {
    %c0_i32 = arith.constant 0 : i32
    return %arg0, %arg1 : i32, i32
  }
}

module attributes {stable_mosaic.version = 11 : i64} {
  func.func @_mm_kernel(%arg0: i32, %arg1: i32, %arg2: i32, %arg3: memref<24x512xbf16, #tpu.memory_space<vmem>>, %arg4: memref<512x128xbf16, #tpu.memory_space<vmem>>, %arg5: memref<1x128xf32, #tpu.memory_space<vmem>>, %arg6: memref<24x128xbf16, #tpu.memory_space<vmem>>, %arg7: memref<24x128xbf16, #tpu.memory_space<vmem>>, %arg8: memref<24x128xf32, #tpu.memory_space<vmem>>) attributes {dimension_semantics = [#tpu.dimension_semantics<parallel>, #tpu.dimension_semantics<parallel>, #tpu.dimension_semantics<arbitrary>], iteration_bounds = array<i64: 1, 1, 1>, scalar_prefetch = 0 : i64, scratch_operands = 1 : i64, tpu.core_type = #tpu.core_type<tc>, window_params = [{transform_indices = @transform_0, window_bounds = array<i64: 24, 512>}, {transform_indices = @transform_1, window_bounds = array<i64: 512, 128>}, {transform_indices = @transform_2, window_bounds = array<i64: 1, 128>}, {transform_indices = @transform_3, window_bounds = array<i64: 24, 128>}, {transform_indices = @transform_4, window_bounds = array<i64: 24, 128>}]} {
    %c0_i32 = arith.constant 0 : i32
    %0 = arith.cmpi eq, %arg2, %c0_i32 : i32
    %1 = arith.extui %0 : i1 to i32
    %c0_i32_0 = arith.constant 0 : i32
    %2 = arith.cmpi ne, %1, %c0_i32_0 : i32
    scf.if %2 {
      %cst_10 = arith.constant 0.000000e+00 : f32
      %12 = vector.broadcast %cst_10 : f32 to vector<24x128xf32>
      %c0_11 = arith.constant 0 : index
      %c0_12 = arith.constant 0 : index
      %13 = vector.load %arg8[%c0_11, %c0_12] : memref<24x128xf32, #tpu.memory_space<vmem>>, vector<24x128xf32>
      tpu.vector_store %arg8[%c0_11, %c0_12], %12 {strides = array<i32>} : memref<24x128xf32, #tpu.memory_space<vmem>>, vector<24x128xf32>,
    } else {
    }
    %c0 = arith.constant 0 : index
    %c0_1 = arith.constant 0 : index
    %3 = vector.load %arg8[%c0, %c0_1] : memref<24x128xf32, #tpu.memory_space<vmem>>, vector<24x128xf32>
    %c0_2 = arith.constant 0 : index
    %c0_3 = arith.constant 0 : index
    %4 = vector.load %arg3[%c0_2, %c0_3] : memref<24x512xbf16, #tpu.memory_space<vmem>>, vector<24x512xbf16>
    %c0_4 = arith.constant 0 : index
    %c0_5 = arith.constant 0 : index
    %5 = vector.load %arg4[%c0_4, %c0_5] : memref<512x128xbf16, #tpu.memory_space<vmem>>, vector<512x128xbf16>
    %cst = arith.constant dense<0.000000e+00> : vector<24x128xf32>
    %6 = tpu.matmul %4, %5, %cst {dimension_numbers = #tpu.dot_dimension_numbers<[1], [0], [0], [1], [0, 0, 1, 1], [], []>} : vector<24x512xbf16>, vector<512x128xbf16>, vector<24x128xf32> -> vector<24x128xf32>
    %7 = arith.addf %3, %6 : vector<24x128xf32>
    %c0_6 = arith.constant 0 : index
    %c0_7 = arith.constant 0 : index
    %8 = vector.load %arg8[%c0_6, %c0_7] : memref<24x128xf32, #tpu.memory_space<vmem>>, vector<24x128xf32>
    tpu.vector_store %arg8[%c0_6, %c0_7], %7 {strides = array<i32>} : memref<24x128xf32, #tpu.memory_space<vmem>>, vector<24x128xf32>,
    %c0_i32_8 = arith.constant 0 : i32
    %9 = arith.cmpi eq, %arg2, %c0_i32_8 : i32
    %10 = arith.extui %9 : i1 to i32
    %c0_i32_9 = arith.constant 0 : i32
    %11 = arith.cmpi ne, %10, %c0_i32_9 : i32
    scf.if %11 {
      %c0_10 = arith.constant 0 : index
      %c0_11 = arith.constant 0 : index
      %12 = vector.load %arg8[%c0_10, %c0_11] : memref<24x128xf32, #tpu.memory_space<vmem>>, vector<24x128xf32>
      %c0_12 = arith.constant 0 : index
      %c0_13 = arith.constant 0 : index
      %13 = vector.load %arg5[%c0_12, %c0_13] : memref<1x128xf32, #tpu.memory_space<vmem>>, vector<1x128xf32>
      %14 = vector.broadcast %13 : vector<1x128xf32> to vector<24x128xf32>
      %15 = arith.addf %12, %14 : vector<24x128xf32>
      %c0_14 = arith.constant 0 : index
      %c0_15 = arith.constant 0 : index
      %16 = vector.load %arg6[%c0_14, %c0_15] : memref<24x128xbf16, #tpu.memory_space<vmem>>, vector<24x128xbf16>
      %17 = arith.extf %16 : vector<24x128xbf16> to vector<24x128xf32>
      %18 = arith.addf %15, %17 : vector<24x128xf32>
      %19 = arith.truncf %18 : vector<24x128xf32> to vector<24x128xbf16>
      %c0_16 = arith.constant 0 : index
      %c0_17 = arith.constant 0 : index
      %20 = vector.load %arg7[%c0_16, %c0_17] : memref<24x128xbf16, #tpu.memory_space<vmem>>, vector<24x128xbf16>
      tpu.vector_store %arg7[%c0_16, %c0_17], %19 {strides = array<i32>} : memref<24x128xbf16, #tpu.memory_space<vmem>>, vector<24x128xbf16>,
    } else {
    }
    return
  }
  func.func @transform_0(%arg0: i32, %arg1: i32, %arg2: i32) -> (i32, i32) {
    %c0_i32 = arith.constant 0 : i32
    return %arg0, %arg2 : i32, i32
  }
  func.func @transform_1(%arg0: i32, %arg1: i32, %arg2: i32) -> (i32, i32) {
    %c0_i32 = arith.constant 0 : i32
    return %arg2, %arg1 : i32, i32
  }
  func.func @transform_2(%arg0: i32, %arg1: i32, %arg2: i32) -> (i32, i32) {
    %c0_i32 = arith.constant 0 : i32
    %c0_i32_0 = arith.constant 0 : i32
    return %c0_i32, %arg1 : i32, i32
  }
  func.func @transform_3(%arg0: i32, %arg1: i32, %arg2: i32) -> (i32, i32) {
    %c0_i32 = arith.constant 0 : i32
    return %arg0, %arg1 : i32, i32
  }
  func.func @transform_4(%arg0: i32, %arg1: i32, %arg2: i32) -> (i32, i32) {
    %c0_i32 = arith.constant 0 : i32
    return %arg0, %arg1 : i32, i32
  }
}

module attributes {stable_mosaic.version = 11 : i64} {
  func.func @_ln_mm_kernel(%arg0: i32, %arg1: i32, %arg2: memref<24x128xbf16, #tpu.memory_space<vmem>>, %arg3: memref<1x128xf32, #tpu.memory_space<vmem>>, %arg4: memref<1x128xf32, #tpu.memory_space<vmem>>, %arg5: memref<128x128xbf16, #tpu.memory_space<vmem>>, %arg6: memref<1x128xf32, #tpu.memory_space<vmem>>, %arg7: memref<24x128xbf16, #tpu.memory_space<vmem>>, %arg8: memref<24x128xbf16, #tpu.memory_space<vmem>>) attributes {dimension_semantics = [#tpu.dimension_semantics<parallel>, #tpu.dimension_semantics<arbitrary>], iteration_bounds = array<i64: 1, 3>, scalar_prefetch = 0 : i64, scratch_operands = 1 : i64, tpu.core_type = #tpu.core_type<tc>, window_params = [{transform_indices = @transform_0, window_bounds = array<i64: 24, 128>}, {pipeline_mode = #tpu.pipeline_mode<synchronous>, transform_indices = @transform_1, window_bounds = array<i64: 1, 128>}, {pipeline_mode = #tpu.pipeline_mode<synchronous>, transform_indices = @transform_2, window_bounds = array<i64: 1, 128>}, {transform_indices = @transform_3, window_bounds = array<i64: 128, 128>}, {transform_indices = @transform_4, window_bounds = array<i64: 1, 128>}, {transform_indices = @transform_5, window_bounds = array<i64: 24, 128>}]} {
    %c0_i32 = arith.constant 0 : i32
    %0 = arith.cmpi eq, %arg1, %c0_i32 : i32
    %1 = arith.extui %0 : i1 to i32
    %c0_i32_0 = arith.constant 0 : i32
    %2 = arith.cmpi ne, %1, %c0_i32_0 : i32
    scf.if %2 {
      %c0_8 = arith.constant 0 : index
      %c0_9 = arith.constant 0 : index
      %11 = vector.load %arg2[%c0_8, %c0_9] : memref<24x128xbf16, #tpu.memory_space<vmem>>, vector<24x128xbf16>
      %12 = arith.extf %11 : vector<24x128xbf16> to vector<24x128xf32>
      %cst_10 = arith.constant dense<0.000000e+00> : vector<24xf32>
      %13 = vector.multi_reduction <add>, %12, %cst_10 [1] : vector<24x128xf32> to vector<24xf32>
      %14 = vector.shape_cast %13 : vector<24xf32> to vector<24x1xf32>
      %cst_11 = arith.constant 1.280000e+02 : f32
      %15 = vector.broadcast %cst_11 : f32 to vector<24x1xf32>
      %16 = arith.divf %14, %15 : vector<24x1xf32>
      %17 = vector.broadcast %16 : vector<24x1xf32> to vector<24x128xf32>
      %18 = arith.subf %12, %17 : vector<24x128xf32>
      %19 = arith.mulf %18, %18 : vector<24x128xf32>
      %cst_12 = arith.constant dense<0.000000e+00> : vector<24xf32>
      %20 = vector.multi_reduction <add>, %19, %cst_12 [1] : vector<24x128xf32> to vector<24xf32>
      %21 = vector.shape_cast %20 : vector<24xf32> to vector<24x1xf32>
      %cst_13 = arith.constant 1.280000e+02 : f32
      %22 = vector.broadcast %cst_13 : f32 to vector<24x1xf32>
      %23 = arith.divf %21, %22 : vector<24x1xf32>
      %cst_14 = arith.constant 9.99999974E-6 : f32
      %24 = vector.broadcast %cst_14 : f32 to vector<24x1xf32>
      %25 = arith.addf %23, %24 : vector<24x1xf32>
      %26 = math.rsqrt %25 : vector<24x1xf32>
      %27 = vector.broadcast %26 : vector<24x1xf32> to vector<24x128xf32>
      %28 = arith.mulf %18, %27 : vector<24x128xf32>
      %c0_15 = arith.constant 0 : index
      %c0_16 = arith.constant 0 : index
      %29 = vector.load %arg3[%c0_15, %c0_16] : memref<1x128xf32, #tpu.memory_space<vmem>>, vector<1x128xf32>
      %30 = vector.broadcast %29 : vector<1x128xf32> to vector<24x128xf32>
      %31 = arith.mulf %28, %30 : vector<24x128xf32>
      %c0_17 = arith.constant 0 : index
      %c0_18 = arith.constant 0 : index
      %32 = vector.load %arg4[%c0_17, %c0_18] : memref<1x128xf32, #tpu.memory_space<vmem>>, vector<1x128xf32>
      %33 = vector.broadcast %32 : vector<1x128xf32> to vector<24x128xf32>
      %34 = arith.addf %31, %33 : vector<24x128xf32>
      %35 = arith.truncf %34 : vector<24x128xf32> to vector<24x128xbf16>
      %c0_19 = arith.constant 0 : index
      %c0_20 = arith.constant 0 : index
      %36 = vector.load %arg8[%c0_19, %c0_20] : memref<24x128xbf16, #tpu.memory_space<vmem>>, vector<24x128xbf16>
      tpu.vector_store %arg8[%c0_19, %c0_20], %35 {strides = array<i32>} : memref<24x128xbf16, #tpu.memory_space<vmem>>, vector<24x128xbf16>,
    } else {
    }
    %c0 = arith.constant 0 : index
    %c0_1 = arith.constant 0 : index
    %3 = vector.load %arg8[%c0, %c0_1] : memref<24x128xbf16, #tpu.memory_space<vmem>>, vector<24x128xbf16>
    %c0_2 = arith.constant 0 : index
    %c0_3 = arith.constant 0 : index
    %4 = vector.load %arg5[%c0_2, %c0_3] : memref<128x128xbf16, #tpu.memory_space<vmem>>, vector<128x128xbf16>
    %cst = arith.constant dense<0.000000e+00> : vector<24x128xf32>
    %5 = tpu.matmul %3, %4, %cst {dimension_numbers = #tpu.dot_dimension_numbers<[1], [0], [0], [1], [0, 0, 1, 1], [], []>} : vector<24x128xbf16>, vector<128x128xbf16>, vector<24x128xf32> -> vector<24x128xf32>
    %c0_4 = arith.constant 0 : index
    %c0_5 = arith.constant 0 : index
    %6 = vector.load %arg6[%c0_4, %c0_5] : memref<1x128xf32, #tpu.memory_space<vmem>>, vector<1x128xf32>
    %7 = vector.broadcast %6 : vector<1x128xf32> to vector<24x128xf32>
    %8 = arith.addf %5, %7 : vector<24x128xf32>
    %9 = arith.truncf %8 : vector<24x128xf32> to vector<24x128xbf16>
    %c0_6 = arith.constant 0 : index
    %c0_7 = arith.constant 0 : index
    %10 = vector.load %arg7[%c0_6, %c0_7] : memref<24x128xbf16, #tpu.memory_space<vmem>>, vector<24x128xbf16>
    tpu.vector_store %arg7[%c0_6, %c0_7], %9 {strides = array<i32>} : memref<24x128xbf16, #tpu.memory_space<vmem>>, vector<24x128xbf16>,
    return
  }
  func.func @transform_0(%arg0: i32, %arg1: i32) -> (i32, i32) {
    %c0_i32 = arith.constant 0 : i32
    %c0_i32_0 = arith.constant 0 : i32
    return %arg0, %c0_i32 : i32, i32
  }
  func.func @transform_1(%arg0: i32, %arg1: i32) -> (i32, i32) {
    %c0_i32 = arith.constant 0 : i32
    %c0_i32_0 = arith.constant 0 : i32
    %c0_i32_1 = arith.constant 0 : i32
    return %c0_i32, %c0_i32_0 : i32, i32
  }
  func.func @transform_2(%arg0: i32, %arg1: i32) -> (i32, i32) {
    %c0_i32 = arith.constant 0 : i32
    %c0_i32_0 = arith.constant 0 : i32
    %c0_i32_1 = arith.constant 0 : i32
    return %c0_i32, %c0_i32_0 : i32, i32
  }
  func.func @transform_3(%arg0: i32, %arg1: i32) -> (i32, i32) {
    %c0_i32 = arith.constant 0 : i32
    %c0_i32_0 = arith.constant 0 : i32
    return %c0_i32, %arg1 : i32, i32
  }
  func.func @transform_4(%arg0: i32, %arg1: i32) -> (i32, i32) {
    %c0_i32 = arith.constant 0 : i32
    %c0_i32_0 = arith.constant 0 : i32
    return %c0_i32, %arg1 : i32, i32
  }
  func.func @transform_5(%arg0: i32, %arg1: i32) -> (i32, i32) {
    %c0_i32 = arith.constant 0 : i32
    return %arg0, %arg1 : i32, i32
  }
}

module attributes {stable_mosaic.version = 11 : i64} {
  func.func @_bn_stats_kernel(%arg0: i32, %arg1: memref<16x128xbf16, #tpu.memory_space<vmem>>, %arg2: memref<1x128xf32, #tpu.memory_space<vmem>>, %arg3: memref<1x128xf32, #tpu.memory_space<vmem>>, %arg4: memref<1x128xf32, #tpu.memory_space<vmem>>, %arg5: memref<1x128xf32, #tpu.memory_space<vmem>>) attributes {dimension_semantics = [#tpu.dimension_semantics<arbitrary>], iteration_bounds = array<i64: 1>, scalar_prefetch = 0 : i64, scratch_operands = 2 : i64, tpu.core_type = #tpu.core_type<tc>, window_params = [{transform_indices = @transform_0, window_bounds = array<i64: 16, 128>}, {pipeline_mode = #tpu.pipeline_mode<synchronous>, transform_indices = @transform_1, window_bounds = array<i64: 1, 128>}, {pipeline_mode = #tpu.pipeline_mode<synchronous>, transform_indices = @transform_2, window_bounds = array<i64: 1, 128>}]} {
    %c0_i32 = arith.constant 0 : i32
    %0 = arith.cmpi eq, %arg0, %c0_i32 : i32
    %1 = arith.extui %0 : i1 to i32
    %c0_i32_0 = arith.constant 0 : i32
    %2 = arith.cmpi ne, %1, %c0_i32_0 : i32
    scf.if %2 {
      %cst_13 = arith.constant 0.000000e+00 : f32
      %19 = vector.broadcast %cst_13 : f32 to vector<1x128xf32>
      %c0_14 = arith.constant 0 : index
      %c0_15 = arith.constant 0 : index
      %20 = vector.load %arg4[%c0_14, %c0_15] : memref<1x128xf32, #tpu.memory_space<vmem>>, vector<1x128xf32>
      tpu.vector_store %arg4[%c0_14, %c0_15], %19 {strides = array<i32>} : memref<1x128xf32, #tpu.memory_space<vmem>>, vector<1x128xf32>,
      %cst_16 = arith.constant 0.000000e+00 : f32
      %21 = vector.broadcast %cst_16 : f32 to vector<1x128xf32>
      %c0_17 = arith.constant 0 : index
      %c0_18 = arith.constant 0 : index
      %22 = vector.load %arg5[%c0_17, %c0_18] : memref<1x128xf32, #tpu.memory_space<vmem>>, vector<1x128xf32>
      tpu.vector_store %arg5[%c0_17, %c0_18], %21 {strides = array<i32>} : memref<1x128xf32, #tpu.memory_space<vmem>>, vector<1x128xf32>,
    } else {
    }
    %c0 = arith.constant 0 : index
    %c0_1 = arith.constant 0 : index
    %3 = vector.load %arg1[%c0, %c0_1] : memref<16x128xbf16, #tpu.memory_space<vmem>>, vector<16x128xbf16>
    %4 = arith.extf %3 : vector<16x128xbf16> to vector<16x128xf32>
    %c0_2 = arith.constant 0 : index
    %c0_3 = arith.constant 0 : index
    %5 = vector.load %arg4[%c0_2, %c0_3] : memref<1x128xf32, #tpu.memory_space<vmem>>, vector<1x128xf32>
    %cst = arith.constant dense<0.000000e+00> : vector<128xf32>
    %6 = vector.multi_reduction <add>, %4, %cst [0] : vector<16x128xf32> to vector<128xf32>
    %7 = vector.shape_cast %6 : vector<128xf32> to vector<1x128xf32>
    %8 = arith.addf %5, %7 : vector<1x128xf32>
    %c0_4 = arith.constant 0 : index
    %c0_5 = arith.constant 0 : index
    %9 = vector.load %arg4[%c0_4, %c0_5] : memref<1x128xf32, #tpu.memory_space<vmem>>, vector<1x128xf32>
    tpu.vector_store %arg4[%c0_4, %c0_5], %8 {strides = array<i32>} : memref<1x128xf32, #tpu.memory_space<vmem>>, vector<1x128xf32>,
    %c0_6 = arith.constant 0 : index
    %c0_7 = arith.constant 0 : index
    %10 = vector.load %arg5[%c0_6, %c0_7] : memref<1x128xf32, #tpu.memory_space<vmem>>, vector<1x128xf32>
    %11 = arith.mulf %4, %4 : vector<16x128xf32>
    %cst_8 = arith.constant dense<0.000000e+00> : vector<128xf32>
    %12 = vector.multi_reduction <add>, %11, %cst_8 [0] : vector<16x128xf32> to vector<128xf32>
    %13 = vector.shape_cast %12 : vector<128xf32> to vector<1x128xf32>
    %14 = arith.addf %10, %13 : vector<1x128xf32>
    %c0_9 = arith.constant 0 : index
    %c0_10 = arith.constant 0 : index
    %15 = vector.load %arg5[%c0_9, %c0_10] : memref<1x128xf32, #tpu.memory_space<vmem>>, vector<1x128xf32>
    tpu.vector_store %arg5[%c0_9, %c0_10], %14 {strides = array<i32>} : memref<1x128xf32, #tpu.memory_space<vmem>>, vector<1x128xf32>,
    %c0_i32_11 = arith.constant 0 : i32
    %16 = arith.cmpi eq, %arg0, %c0_i32_11 : i32
    %17 = arith.extui %16 : i1 to i32
    %c0_i32_12 = arith.constant 0 : i32
    %18 = arith.cmpi ne, %17, %c0_i32_12 : i32
    scf.if %18 {
      %c0_13 = arith.constant 0 : index
      %c0_14 = arith.constant 0 : index
      %19 = vector.load %arg4[%c0_13, %c0_14] : memref<1x128xf32, #tpu.memory_space<vmem>>, vector<1x128xf32>
      %cst_15 = arith.constant 6.250000e-02 : f32
      %20 = vector.broadcast %cst_15 : f32 to vector<1x128xf32>
      %21 = arith.mulf %19, %20 : vector<1x128xf32>
      %c0_16 = arith.constant 0 : index
      %c0_17 = arith.constant 0 : index
      %22 = vector.load %arg2[%c0_16, %c0_17] : memref<1x128xf32, #tpu.memory_space<vmem>>, vector<1x128xf32>
      tpu.vector_store %arg2[%c0_16, %c0_17], %21 {strides = array<i32>} : memref<1x128xf32, #tpu.memory_space<vmem>>, vector<1x128xf32>,
      %c0_18 = arith.constant 0 : index
      %c0_19 = arith.constant 0 : index
      %23 = vector.load %arg5[%c0_18, %c0_19] : memref<1x128xf32, #tpu.memory_space<vmem>>, vector<1x128xf32>
      %cst_20 = arith.constant 6.250000e-02 : f32
      %24 = vector.broadcast %cst_20 : f32 to vector<1x128xf32>
      %25 = arith.mulf %23, %24 : vector<1x128xf32>
      %26 = arith.mulf %21, %21 : vector<1x128xf32>
      %27 = arith.subf %25, %26 : vector<1x128xf32>
      %cst_21 = arith.constant 0.000000e+00 : f32
      %28 = vector.broadcast %cst_21 : f32 to vector<1x128xf32>
      %29 = arith.maximumf %27, %28 : vector<1x128xf32>
      %c0_22 = arith.constant 0 : index
      %c0_23 = arith.constant 0 : index
      %30 = vector.load %arg3[%c0_22, %c0_23] : memref<1x128xf32, #tpu.memory_space<vmem>>, vector<1x128xf32>
      tpu.vector_store %arg3[%c0_22, %c0_23], %29 {strides = array<i32>} : memref<1x128xf32, #tpu.memory_space<vmem>>, vector<1x128xf32>,
    } else {
    }
    return
  }
  func.func @transform_0(%arg0: i32) -> (i32, i32) {
    %c0_i32 = arith.constant 0 : i32
    %c0_i32_0 = arith.constant 0 : i32
    return %arg0, %c0_i32 : i32, i32
  }
  func.func @transform_1(%arg0: i32) -> (i32, i32) {
    %c0_i32 = arith.constant 0 : i32
    %c0_i32_0 = arith.constant 0 : i32
    %c0_i32_1 = arith.constant 0 : i32
    return %c0_i32, %c0_i32_0 : i32, i32
  }
  func.func @transform_2(%arg0: i32) -> (i32, i32) {
    %c0_i32 = arith.constant 0 : i32
    %c0_i32_0 = arith.constant 0 : i32
    %c0_i32_1 = arith.constant 0 : i32
    return %c0_i32, %c0_i32_0 : i32, i32
  }
}

module attributes {stable_mosaic.version = 11 : i64} {
  func.func @_dwconv_kernel(%arg0: i32, %arg1: i32, %arg2: memref<1x2x4x128xbf16, #tpu.memory_space<vmem>>, %arg3: memref<3x128xf32, #tpu.memory_space<vmem>>, %arg4: memref<1x128xf32, #tpu.memory_space<vmem>>, %arg5: memref<1x2x4x128xbf16, #tpu.memory_space<vmem>>) attributes {dimension_semantics = [#tpu.dimension_semantics<parallel>, #tpu.dimension_semantics<parallel>], iteration_bounds = array<i64: 2, 1>, scalar_prefetch = 0 : i64, scratch_operands = 0 : i64, tpu.core_type = #tpu.core_type<tc>, window_params = [{transform_indices = @transform_0, window_bounds = array<i64: 1, 2, 4, 128>}, {pipeline_mode = #tpu.pipeline_mode<synchronous>, transform_indices = @transform_1, window_bounds = array<i64: 3, 128>}, {pipeline_mode = #tpu.pipeline_mode<synchronous>, transform_indices = @transform_2, window_bounds = array<i64: 1, 128>}, {transform_indices = @transform_3, window_bounds = array<i64: 1, 2, 4, 128>}]} {
    %c0 = arith.constant 0 : index
    %c0_0 = arith.constant 0 : index
    %0 = vector.load %arg3[%c0, %c0_0] : memref<3x128xf32, #tpu.memory_space<vmem>>, vector<1x128xf32>
    %1 = vector.shape_cast %0 : vector<1x128xf32> to vector<128xf32>
    %c1 = arith.constant 1 : index
    %c0_1 = arith.constant 0 : index
    %2 = vector.load %arg3[%c1, %c0_1] : memref<3x128xf32, #tpu.memory_space<vmem>>, vector<1x128xf32>
    %3 = vector.shape_cast %2 : vector<1x128xf32> to vector<128xf32>
    %c2 = arith.constant 2 : index
    %c0_2 = arith.constant 0 : index
    %4 = vector.load %arg3[%c2, %c0_2] : memref<3x128xf32, #tpu.memory_space<vmem>>, vector<1x128xf32>
    %5 = vector.shape_cast %4 : vector<1x128xf32> to vector<128xf32>
    %c0_3 = arith.constant 0 : index
    %c0_4 = arith.constant 0 : index
    %6 = vector.load %arg4[%c0_3, %c0_4] : memref<1x128xf32, #tpu.memory_space<vmem>>, vector<1x128xf32>
    %7 = vector.shape_cast %6 : vector<1x128xf32> to vector<128xf32>
    %c0_5 = arith.constant 0 : index
    %c0_6 = arith.constant 0 : index
    %c0_7 = arith.constant 0 : index
    %c0_8 = arith.constant 0 : index
    %8 = vector.load %arg2[%c0_5, %c0_6, %c0_7, %c0_8] : memref<1x2x4x128xbf16, #tpu.memory_space<vmem>>, vector<1x1x4x128xbf16>
    %9 = vector.shape_cast %8 : vector<1x1x4x128xbf16> to vector<4x128xbf16>
    %10 = arith.extf %9 : vector<4x128xbf16> to vector<4x128xf32>
    %11 = vector.shape_cast %3 : vector<128xf32> to vector<1x128xf32>
    %12 = vector.broadcast %11 : vector<1x128xf32> to vector<4x128xf32>
    %13 = arith.mulf %12, %10 : vector<4x128xf32>
    %c0_9 = arith.constant 0 : index
    %c1_10 = arith.constant 1 : index
    %c0_11 = arith.constant 0 : index
    %c0_12 = arith.constant 0 : index
    %14 = vector.load %arg2[%c0_9, %c1_10, %c0_11, %c0_12] : memref<1x2x4x128xbf16, #tpu.memory_space<vmem>>, vector<1x1x4x128xbf16>
    %15 = vector.shape_cast %14 : vector<1x1x4x128xbf16> to vector<4x128xbf16>
    %16 = arith.extf %15 : vector<4x128xbf16> to vector<4x128xf32>
    %17 = vector.shape_cast %5 : vector<128xf32> to vector<1x128xf32>
    %18 = vector.broadcast %17 : vector<1x128xf32> to vector<4x128xf32>
    %19 = arith.mulf %18, %16 : vector<4x128xf32>
    %20 = arith.addf %13, %19 : vector<4x128xf32>
    %21 = vector.shape_cast %7 : vector<128xf32> to vector<1x128xf32>
    %22 = vector.broadcast %21 : vector<1x128xf32> to vector<4x128xf32>
    %23 = arith.addf %20, %22 : vector<4x128xf32>
    %24 = arith.truncf %23 : vector<4x128xf32> to vector<4x128xbf16>
    %c0_13 = arith.constant 0 : index
    %c0_14 = arith.constant 0 : index
    %c0_15 = arith.constant 0 : index
    %c0_16 = arith.constant 0 : index
    %25 = vector.load %arg5[%c0_13, %c0_14, %c0_15, %c0_16] : memref<1x2x4x128xbf16, #tpu.memory_space<vmem>>, vector<1x1x4x128xbf16>
    %26 = vector.shape_cast %25 : vector<1x1x4x128xbf16> to vector<4x128xbf16>
    %27 = vector.shape_cast %24 : vector<4x128xbf16> to vector<1x1x4x128xbf16>
    tpu.vector_store %arg5[%c0_13, %c0_14, %c0_15, %c0_16], %27 {strides = array<i32>} : memref<1x2x4x128xbf16, #tpu.memory_space<vmem>>, vector<1x1x4x128xbf16>,
    %c0_17 = arith.constant 0 : index
    %c0_18 = arith.constant 0 : index
    %c0_19 = arith.constant 0 : index
    %c0_20 = arith.constant 0 : index
    %28 = vector.load %arg2[%c0_17, %c0_18, %c0_19, %c0_20] : memref<1x2x4x128xbf16, #tpu.memory_space<vmem>>, vector<1x1x4x128xbf16>
    %29 = vector.shape_cast %28 : vector<1x1x4x128xbf16> to vector<4x128xbf16>
    %30 = arith.extf %29 : vector<4x128xbf16> to vector<4x128xf32>
    %31 = vector.shape_cast %1 : vector<128xf32> to vector<1x128xf32>
    %32 = vector.broadcast %31 : vector<1x128xf32> to vector<4x128xf32>
    %33 = arith.mulf %32, %30 : vector<4x128xf32>
    %c0_21 = arith.constant 0 : index
    %c1_22 = arith.constant 1 : index
    %c0_23 = arith.constant 0 : index
    %c0_24 = arith.constant 0 : index
    %34 = vector.load %arg2[%c0_21, %c1_22, %c0_23, %c0_24] : memref<1x2x4x128xbf16, #tpu.memory_space<vmem>>, vector<1x1x4x128xbf16>
    %35 = vector.shape_cast %34 : vector<1x1x4x128xbf16> to vector<4x128xbf16>
    %36 = arith.extf %35 : vector<4x128xbf16> to vector<4x128xf32>
    %37 = vector.shape_cast %3 : vector<128xf32> to vector<1x128xf32>
    %38 = vector.broadcast %37 : vector<1x128xf32> to vector<4x128xf32>
    %39 = arith.mulf %38, %36 : vector<4x128xf32>
    %40 = arith.addf %33, %39 : vector<4x128xf32>
    %41 = vector.shape_cast %7 : vector<128xf32> to vector<1x128xf32>
    %42 = vector.broadcast %41 : vector<1x128xf32> to vector<4x128xf32>
    %43 = arith.addf %40, %42 : vector<4x128xf32>
    %44 = arith.truncf %43 : vector<4x128xf32> to vector<4x128xbf16>
    %c0_25 = arith.constant 0 : index
    %c1_26 = arith.constant 1 : index
    %c0_27 = arith.constant 0 : index
    %c0_28 = arith.constant 0 : index
    %45 = vector.load %arg5[%c0_25, %c1_26, %c0_27, %c0_28] : memref<1x2x4x128xbf16, #tpu.memory_space<vmem>>, vector<1x1x4x128xbf16>
    %46 = vector.shape_cast %45 : vector<1x1x4x128xbf16> to vector<4x128xbf16>
    %47 = vector.shape_cast %44 : vector<4x128xbf16> to vector<1x1x4x128xbf16>
    tpu.vector_store %arg5[%c0_25, %c1_26, %c0_27, %c0_28], %47 {strides = array<i32>} : memref<1x2x4x128xbf16, #tpu.memory_space<vmem>>, vector<1x1x4x128xbf16>,
    return
  }
  func.func @transform_0(%arg0: i32, %arg1: i32) -> (i32, i32, i32, i32) {
    %c0_i32 = arith.constant 0 : i32
    %c0_i32_0 = arith.constant 0 : i32
    %c0_i32_1 = arith.constant 0 : i32
    return %arg0, %c0_i32, %arg1, %c0_i32_0 : i32, i32, i32, i32
  }
  func.func @transform_1(%arg0: i32, %arg1: i32) -> (i32, i32) {
    %c0_i32 = arith.constant 0 : i32
    %c0_i32_0 = arith.constant 0 : i32
    %c0_i32_1 = arith.constant 0 : i32
    return %c0_i32, %c0_i32_0 : i32, i32
  }
  func.func @transform_2(%arg0: i32, %arg1: i32) -> (i32, i32) {
    %c0_i32 = arith.constant 0 : i32
    %c0_i32_0 = arith.constant 0 : i32
    %c0_i32_1 = arith.constant 0 : i32
    return %c0_i32, %c0_i32_0 : i32, i32
  }
  func.func @transform_3(%arg0: i32, %arg1: i32) -> (i32, i32, i32, i32) {
    %c0_i32 = arith.constant 0 : i32
    %c0_i32_0 = arith.constant 0 : i32
    %c0_i32_1 = arith.constant 0 : i32
    return %arg0, %c0_i32, %arg1, %c0_i32_0 : i32, i32, i32, i32
  }
}

module attributes {stable_mosaic.version = 11 : i64} {
  func.func @_mm_kernel(%arg0: i32, %arg1: i32, %arg2: i32, %arg3: memref<16x128xbf16, #tpu.memory_space<vmem>>, %arg4: memref<128x128xbf16, #tpu.memory_space<vmem>>, %arg5: memref<1x128xf32, #tpu.memory_space<vmem>>, %arg6: memref<16x128xbf16, #tpu.memory_space<vmem>>, %arg7: memref<16x128xf32, #tpu.memory_space<vmem>>) attributes {dimension_semantics = [#tpu.dimension_semantics<parallel>, #tpu.dimension_semantics<parallel>, #tpu.dimension_semantics<arbitrary>], iteration_bounds = array<i64: 1, 1, 1>, scalar_prefetch = 0 : i64, scratch_operands = 1 : i64, tpu.core_type = #tpu.core_type<tc>, window_params = [{transform_indices = @transform_0, window_bounds = array<i64: 16, 128>}, {transform_indices = @transform_1, window_bounds = array<i64: 128, 128>}, {transform_indices = @transform_2, window_bounds = array<i64: 1, 128>}, {transform_indices = @transform_3, window_bounds = array<i64: 16, 128>}]} {
    %c0_i32 = arith.constant 0 : i32
    %0 = arith.cmpi eq, %arg2, %c0_i32 : i32
    %1 = arith.extui %0 : i1 to i32
    %c0_i32_0 = arith.constant 0 : i32
    %2 = arith.cmpi ne, %1, %c0_i32_0 : i32
    scf.if %2 {
      %cst_10 = arith.constant 0.000000e+00 : f32
      %12 = vector.broadcast %cst_10 : f32 to vector<16x128xf32>
      %c0_11 = arith.constant 0 : index
      %c0_12 = arith.constant 0 : index
      %13 = vector.load %arg7[%c0_11, %c0_12] : memref<16x128xf32, #tpu.memory_space<vmem>>, vector<16x128xf32>
      tpu.vector_store %arg7[%c0_11, %c0_12], %12 {strides = array<i32>} : memref<16x128xf32, #tpu.memory_space<vmem>>, vector<16x128xf32>,
    } else {
    }
    %c0 = arith.constant 0 : index
    %c0_1 = arith.constant 0 : index
    %3 = vector.load %arg7[%c0, %c0_1] : memref<16x128xf32, #tpu.memory_space<vmem>>, vector<16x128xf32>
    %c0_2 = arith.constant 0 : index
    %c0_3 = arith.constant 0 : index
    %4 = vector.load %arg3[%c0_2, %c0_3] : memref<16x128xbf16, #tpu.memory_space<vmem>>, vector<16x128xbf16>
    %c0_4 = arith.constant 0 : index
    %c0_5 = arith.constant 0 : index
    %5 = vector.load %arg4[%c0_4, %c0_5] : memref<128x128xbf16, #tpu.memory_space<vmem>>, vector<128x128xbf16>
    %cst = arith.constant dense<0.000000e+00> : vector<16x128xf32>
    %6 = tpu.matmul %4, %5, %cst {dimension_numbers = #tpu.dot_dimension_numbers<[1], [0], [0], [1], [0, 0, 1, 1], [], []>} : vector<16x128xbf16>, vector<128x128xbf16>, vector<16x128xf32> -> vector<16x128xf32>
    %7 = arith.addf %3, %6 : vector<16x128xf32>
    %c0_6 = arith.constant 0 : index
    %c0_7 = arith.constant 0 : index
    %8 = vector.load %arg7[%c0_6, %c0_7] : memref<16x128xf32, #tpu.memory_space<vmem>>, vector<16x128xf32>
    tpu.vector_store %arg7[%c0_6, %c0_7], %7 {strides = array<i32>} : memref<16x128xf32, #tpu.memory_space<vmem>>, vector<16x128xf32>,
    %c0_i32_8 = arith.constant 0 : i32
    %9 = arith.cmpi eq, %arg2, %c0_i32_8 : i32
    %10 = arith.extui %9 : i1 to i32
    %c0_i32_9 = arith.constant 0 : i32
    %11 = arith.cmpi ne, %10, %c0_i32_9 : i32
    scf.if %11 {
      %c0_10 = arith.constant 0 : index
      %c0_11 = arith.constant 0 : index
      %12 = vector.load %arg7[%c0_10, %c0_11] : memref<16x128xf32, #tpu.memory_space<vmem>>, vector<16x128xf32>
      %c0_12 = arith.constant 0 : index
      %c0_13 = arith.constant 0 : index
      %13 = vector.load %arg5[%c0_12, %c0_13] : memref<1x128xf32, #tpu.memory_space<vmem>>, vector<1x128xf32>
      %14 = vector.broadcast %13 : vector<1x128xf32> to vector<16x128xf32>
      %15 = arith.addf %12, %14 : vector<16x128xf32>
      %16 = arith.truncf %15 : vector<16x128xf32> to vector<16x128xbf16>
      %c0_14 = arith.constant 0 : index
      %c0_15 = arith.constant 0 : index
      %17 = vector.load %arg6[%c0_14, %c0_15] : memref<16x128xbf16, #tpu.memory_space<vmem>>, vector<16x128xbf16>
      tpu.vector_store %arg6[%c0_14, %c0_15], %16 {strides = array<i32>} : memref<16x128xbf16, #tpu.memory_space<vmem>>, vector<16x128xbf16>,
    } else {
    }
    return
  }
  func.func @transform_0(%arg0: i32, %arg1: i32, %arg2: i32) -> (i32, i32) {
    %c0_i32 = arith.constant 0 : i32
    return %arg0, %arg2 : i32, i32
  }
  func.func @transform_1(%arg0: i32, %arg1: i32, %arg2: i32) -> (i32, i32) {
    %c0_i32 = arith.constant 0 : i32
    return %arg2, %arg1 : i32, i32
  }
  func.func @transform_2(%arg0: i32, %arg1: i32, %arg2: i32) -> (i32, i32) {
    %c0_i32 = arith.constant 0 : i32
    %c0_i32_0 = arith.constant 0 : i32
    return %c0_i32, %arg1 : i32, i32
  }
  func.func @transform_3(%arg0: i32, %arg1: i32, %arg2: i32) -> (i32, i32) {
    %c0_i32 = arith.constant 0 : i32
    return %arg0, %arg1 : i32, i32
  }
}

module attributes {stable_mosaic.version = 11 : i64} {
  func.func @_mm_kernel(%arg0: i32, %arg1: i32, %arg2: i32, %arg3: memref<16x128xbf16, #tpu.memory_space<vmem>>, %arg4: memref<128x128xbf16, #tpu.memory_space<vmem>>, %arg5: memref<1x128xf32, #tpu.memory_space<vmem>>, %arg6: memref<16x128xbf16, #tpu.memory_space<vmem>>, %arg7: memref<16x128xbf16, #tpu.memory_space<vmem>>, %arg8: memref<16x128xf32, #tpu.memory_space<vmem>>) attributes {dimension_semantics = [#tpu.dimension_semantics<parallel>, #tpu.dimension_semantics<parallel>, #tpu.dimension_semantics<arbitrary>], iteration_bounds = array<i64: 1, 1, 1>, scalar_prefetch = 0 : i64, scratch_operands = 1 : i64, tpu.core_type = #tpu.core_type<tc>, window_params = [{transform_indices = @transform_0, window_bounds = array<i64: 16, 128>}, {transform_indices = @transform_1, window_bounds = array<i64: 128, 128>}, {transform_indices = @transform_2, window_bounds = array<i64: 1, 128>}, {transform_indices = @transform_3, window_bounds = array<i64: 16, 128>}, {transform_indices = @transform_4, window_bounds = array<i64: 16, 128>}]} {
    %c0_i32 = arith.constant 0 : i32
    %0 = arith.cmpi eq, %arg2, %c0_i32 : i32
    %1 = arith.extui %0 : i1 to i32
    %c0_i32_0 = arith.constant 0 : i32
    %2 = arith.cmpi ne, %1, %c0_i32_0 : i32
    scf.if %2 {
      %cst_10 = arith.constant 0.000000e+00 : f32
      %12 = vector.broadcast %cst_10 : f32 to vector<16x128xf32>
      %c0_11 = arith.constant 0 : index
      %c0_12 = arith.constant 0 : index
      %13 = vector.load %arg8[%c0_11, %c0_12] : memref<16x128xf32, #tpu.memory_space<vmem>>, vector<16x128xf32>
      tpu.vector_store %arg8[%c0_11, %c0_12], %12 {strides = array<i32>} : memref<16x128xf32, #tpu.memory_space<vmem>>, vector<16x128xf32>,
    } else {
    }
    %c0 = arith.constant 0 : index
    %c0_1 = arith.constant 0 : index
    %3 = vector.load %arg8[%c0, %c0_1] : memref<16x128xf32, #tpu.memory_space<vmem>>, vector<16x128xf32>
    %c0_2 = arith.constant 0 : index
    %c0_3 = arith.constant 0 : index
    %4 = vector.load %arg3[%c0_2, %c0_3] : memref<16x128xbf16, #tpu.memory_space<vmem>>, vector<16x128xbf16>
    %c0_4 = arith.constant 0 : index
    %c0_5 = arith.constant 0 : index
    %5 = vector.load %arg4[%c0_4, %c0_5] : memref<128x128xbf16, #tpu.memory_space<vmem>>, vector<128x128xbf16>
    %cst = arith.constant dense<0.000000e+00> : vector<16x128xf32>
    %6 = tpu.matmul %4, %5, %cst {dimension_numbers = #tpu.dot_dimension_numbers<[1], [0], [0], [1], [0, 0, 1, 1], [], []>} : vector<16x128xbf16>, vector<128x128xbf16>, vector<16x128xf32> -> vector<16x128xf32>
    %7 = arith.addf %3, %6 : vector<16x128xf32>
    %c0_6 = arith.constant 0 : index
    %c0_7 = arith.constant 0 : index
    %8 = vector.load %arg8[%c0_6, %c0_7] : memref<16x128xf32, #tpu.memory_space<vmem>>, vector<16x128xf32>
    tpu.vector_store %arg8[%c0_6, %c0_7], %7 {strides = array<i32>} : memref<16x128xf32, #tpu.memory_space<vmem>>, vector<16x128xf32>,
    %c0_i32_8 = arith.constant 0 : i32
    %9 = arith.cmpi eq, %arg2, %c0_i32_8 : i32
    %10 = arith.extui %9 : i1 to i32
    %c0_i32_9 = arith.constant 0 : i32
    %11 = arith.cmpi ne, %10, %c0_i32_9 : i32
    scf.if %11 {
      %c0_10 = arith.constant 0 : index
      %c0_11 = arith.constant 0 : index
      %12 = vector.load %arg8[%c0_10, %c0_11] : memref<16x128xf32, #tpu.memory_space<vmem>>, vector<16x128xf32>
      %c0_12 = arith.constant 0 : index
      %c0_13 = arith.constant 0 : index
      %13 = vector.load %arg5[%c0_12, %c0_13] : memref<1x128xf32, #tpu.memory_space<vmem>>, vector<1x128xf32>
      %14 = vector.broadcast %13 : vector<1x128xf32> to vector<16x128xf32>
      %15 = arith.addf %12, %14 : vector<16x128xf32>
      %c0_14 = arith.constant 0 : index
      %c0_15 = arith.constant 0 : index
      %16 = vector.load %arg6[%c0_14, %c0_15] : memref<16x128xbf16, #tpu.memory_space<vmem>>, vector<16x128xbf16>
      %17 = arith.extf %16 : vector<16x128xbf16> to vector<16x128xf32>
      %18 = arith.addf %15, %17 : vector<16x128xf32>
      %19 = arith.truncf %18 : vector<16x128xf32> to vector<16x128xbf16>
      %c0_16 = arith.constant 0 : index
      %c0_17 = arith.constant 0 : index
      %20 = vector.load %arg7[%c0_16, %c0_17] : memref<16x128xbf16, #tpu.memory_space<vmem>>, vector<16x128xbf16>
      tpu.vector_store %arg7[%c0_16, %c0_17], %19 {strides = array<i32>} : memref<16x128xbf16, #tpu.memory_space<vmem>>, vector<16x128xbf16>,
    } else {
    }
    return
  }
  func.func @transform_0(%arg0: i32, %arg1: i32, %arg2: i32) -> (i32, i32) {
    %c0_i32 = arith.constant 0 : i32
    return %arg0, %arg2 : i32, i32
  }
  func.func @transform_1(%arg0: i32, %arg1: i32, %arg2: i32) -> (i32, i32) {
    %c0_i32 = arith.constant 0 : i32
    return %arg2, %arg1 : i32, i32
  }
  func.func @transform_2(%arg0: i32, %arg1: i32, %arg2: i32) -> (i32, i32) {
    %c0_i32 = arith.constant 0 : i32
    %c0_i32_0 = arith.constant 0 : i32
    return %c0_i32, %arg1 : i32, i32
  }
  func.func @transform_3(%arg0: i32, %arg1: i32, %arg2: i32) -> (i32, i32) {
    %c0_i32 = arith.constant 0 : i32
    return %arg0, %arg1 : i32, i32
  }
  func.func @transform_4(%arg0: i32, %arg1: i32, %arg2: i32) -> (i32, i32) {
    %c0_i32 = arith.constant 0 : i32
    return %arg0, %arg1 : i32, i32
  }
}

module attributes {stable_mosaic.version = 11 : i64} {
  func.func @_mm_kernel(%arg0: i32, %arg1: i32, %arg2: i32, %arg3: memref<24x128xbf16, #tpu.memory_space<vmem>>, %arg4: memref<128x128xbf16, #tpu.memory_space<vmem>>, %arg5: memref<1x128xf32, #tpu.memory_space<vmem>>, %arg6: memref<24x128xbf16, #tpu.memory_space<vmem>>, %arg7: memref<24x128xbf16, #tpu.memory_space<vmem>>, %arg8: memref<24x128xf32, #tpu.memory_space<vmem>>) attributes {dimension_semantics = [#tpu.dimension_semantics<parallel>, #tpu.dimension_semantics<parallel>, #tpu.dimension_semantics<arbitrary>], iteration_bounds = array<i64: 1, 1, 1>, scalar_prefetch = 0 : i64, scratch_operands = 1 : i64, tpu.core_type = #tpu.core_type<tc>, window_params = [{transform_indices = @transform_0, window_bounds = array<i64: 24, 128>}, {transform_indices = @transform_1, window_bounds = array<i64: 128, 128>}, {transform_indices = @transform_2, window_bounds = array<i64: 1, 128>}, {transform_indices = @transform_3, window_bounds = array<i64: 24, 128>}, {transform_indices = @transform_4, window_bounds = array<i64: 24, 128>}]} {
    %c0_i32 = arith.constant 0 : i32
    %0 = arith.cmpi eq, %arg2, %c0_i32 : i32
    %1 = arith.extui %0 : i1 to i32
    %c0_i32_0 = arith.constant 0 : i32
    %2 = arith.cmpi ne, %1, %c0_i32_0 : i32
    scf.if %2 {
      %cst_10 = arith.constant 0.000000e+00 : f32
      %12 = vector.broadcast %cst_10 : f32 to vector<24x128xf32>
      %c0_11 = arith.constant 0 : index
      %c0_12 = arith.constant 0 : index
      %13 = vector.load %arg8[%c0_11, %c0_12] : memref<24x128xf32, #tpu.memory_space<vmem>>, vector<24x128xf32>
      tpu.vector_store %arg8[%c0_11, %c0_12], %12 {strides = array<i32>} : memref<24x128xf32, #tpu.memory_space<vmem>>, vector<24x128xf32>,
    } else {
    }
    %c0 = arith.constant 0 : index
    %c0_1 = arith.constant 0 : index
    %3 = vector.load %arg8[%c0, %c0_1] : memref<24x128xf32, #tpu.memory_space<vmem>>, vector<24x128xf32>
    %c0_2 = arith.constant 0 : index
    %c0_3 = arith.constant 0 : index
    %4 = vector.load %arg3[%c0_2, %c0_3] : memref<24x128xbf16, #tpu.memory_space<vmem>>, vector<24x128xbf16>
    %c0_4 = arith.constant 0 : index
    %c0_5 = arith.constant 0 : index
    %5 = vector.load %arg4[%c0_4, %c0_5] : memref<128x128xbf16, #tpu.memory_space<vmem>>, vector<128x128xbf16>
    %cst = arith.constant dense<0.000000e+00> : vector<24x128xf32>
    %6 = tpu.matmul %4, %5, %cst {dimension_numbers = #tpu.dot_dimension_numbers<[1], [0], [0], [1], [0, 0, 1, 1], [], []>} : vector<24x128xbf16>, vector<128x128xbf16>, vector<24x128xf32> -> vector<24x128xf32>
    %7 = arith.addf %3, %6 : vector<24x128xf32>
    %c0_6 = arith.constant 0 : index
    %c0_7 = arith.constant 0 : index
    %8 = vector.load %arg8[%c0_6, %c0_7] : memref<24x128xf32, #tpu.memory_space<vmem>>, vector<24x128xf32>
    tpu.vector_store %arg8[%c0_6, %c0_7], %7 {strides = array<i32>} : memref<24x128xf32, #tpu.memory_space<vmem>>, vector<24x128xf32>,
    %c0_i32_8 = arith.constant 0 : i32
    %9 = arith.cmpi eq, %arg2, %c0_i32_8 : i32
    %10 = arith.extui %9 : i1 to i32
    %c0_i32_9 = arith.constant 0 : i32
    %11 = arith.cmpi ne, %10, %c0_i32_9 : i32
    scf.if %11 {
      %c0_10 = arith.constant 0 : index
      %c0_11 = arith.constant 0 : index
      %12 = vector.load %arg8[%c0_10, %c0_11] : memref<24x128xf32, #tpu.memory_space<vmem>>, vector<24x128xf32>
      %c0_12 = arith.constant 0 : index
      %c0_13 = arith.constant 0 : index
      %13 = vector.load %arg5[%c0_12, %c0_13] : memref<1x128xf32, #tpu.memory_space<vmem>>, vector<1x128xf32>
      %14 = vector.broadcast %13 : vector<1x128xf32> to vector<24x128xf32>
      %15 = arith.addf %12, %14 : vector<24x128xf32>
      %c0_14 = arith.constant 0 : index
      %c0_15 = arith.constant 0 : index
      %16 = vector.load %arg6[%c0_14, %c0_15] : memref<24x128xbf16, #tpu.memory_space<vmem>>, vector<24x128xbf16>
      %17 = arith.extf %16 : vector<24x128xbf16> to vector<24x128xf32>
      %18 = arith.addf %15, %17 : vector<24x128xf32>
      %19 = arith.truncf %18 : vector<24x128xf32> to vector<24x128xbf16>
      %c0_16 = arith.constant 0 : index
      %c0_17 = arith.constant 0 : index
      %20 = vector.load %arg7[%c0_16, %c0_17] : memref<24x128xbf16, #tpu.memory_space<vmem>>, vector<24x128xbf16>
      tpu.vector_store %arg7[%c0_16, %c0_17], %19 {strides = array<i32>} : memref<24x128xbf16, #tpu.memory_space<vmem>>, vector<24x128xbf16>,
    } else {
    }
    return
  }
  func.func @transform_0(%arg0: i32, %arg1: i32, %arg2: i32) -> (i32, i32) {
    %c0_i32 = arith.constant 0 : i32
    return %arg0, %arg2 : i32, i32
  }
  func.func @transform_1(%arg0: i32, %arg1: i32, %arg2: i32) -> (i32, i32) {
    %c0_i32 = arith.constant 0 : i32
    return %arg2, %arg1 : i32, i32
  }
  func.func @transform_2(%arg0: i32, %arg1: i32, %arg2: i32) -> (i32, i32) {
    %c0_i32 = arith.constant 0 : i32
    %c0_i32_0 = arith.constant 0 : i32
    return %c0_i32, %arg1 : i32, i32
  }
  func.func @transform_3(%arg0: i32, %arg1: i32, %arg2: i32) -> (i32, i32) {
    %c0_i32 = arith.constant 0 : i32
    return %arg0, %arg1 : i32, i32
  }
  func.func @transform_4(%arg0: i32, %arg1: i32, %arg2: i32) -> (i32, i32) {
    %c0_i32 = arith.constant 0 : i32
    return %arg0, %arg1 : i32, i32
  }
}

</mosaic_0001>

<bundles_post_ra>
// kernel: evl_forward.31
= control target key start
LH: loop header
LB: loop body
LE: loop exit
PB: predicated region body
PF: predicated region fallthrough
CT: control target
= control target key end

     0   :  { %v131_v5 = vmov 128.0   ;;  %s170_s0 = inlined_call_operand.vmem [shape: bf16[24,128], index: 0, kind: input, shape index: {}]   ;;  %s171_s1 = inlined_call_operand.vmem [shape: f32[1,128], index: 1, kind: input, shape index: {}]   ;;  %s172_s2 = inlined_call_operand.vmem [shape: f32[1,128], index: 2, kind: input, shape index: {}]   ;;  %s173_s3 = inlined_call_operand.vmem [shape: bf16[24,128], index: 3, kind: output, shape index: {}]  }
   0x1   :  { %v112_v0 = vld [vmem:[%s170_s0] sm:$0xff]   ;;  %v16_v1 = vld [vmem:[%s170_s0 + $0x8] sm:$0xf]  ;;  %123 = vrcp.f32 %v131_v5 }
   0x2   :  { %v113_v2 = vunpack.c.l.bf16 %v112_v0  ;;  %v19_v3 = vunpack.c.l.bf16 %v16_v1  ;;  %v114_v4 = vunpack.c.h.bf16 %v112_v0  ;;  %v121_v46 = vld [vmem:[%s171_s1] ss:$0 sm:$0xff] }
   0x3   :  { %v122_v52 = vld [vmem:[%s172_s2] ss:$0 sm:$0xff] }
   0x4   :  { %20 = vadd.xlane.f32.xlu0 %v113_v2  ;;  %24 = vadd.xlane.f32.xlu1 %v19_v3 }
   0x7   :  { %v124_v6 = vpop.eup %123 }
   0x8   :  { %v27_v7 = vmul.f32 128.0, %v124_v6  ;;  %vm31_vm0 = vweird.f32 %v124_v6 }
   0xa   :  { %v28_v8 = vsub.f32 1.0, %v27_v7 }
   0xc   :  { %22 = vadd.xlane.f32.xlu0 %v114_v4  ;;  %v29_v9 = vmul.f32 %v124_v6, %v28_v8 }
   0xe   :  { %v30_v10 = vadd.f32 %v124_v6, %v29_v9 }
  0x10   :  { %v32_v11 = vsel %vm31_vm0, %v124_v6, %v30_v10 }
  0x77   :  { %v21_v12 = vpop.xlane.xlu0 %20  ;;  %v25_v17 = vpop.xlane.xlu1 %24 }
  0x78   :  { %v33_v13 = vmul.f32 %v32_v11, %v21_v12  ;;  %v35_v20 = vmul.f32 %v32_v11, %v25_v17 }
  0x7a   :  { %v36_v14 = vsub.f32 %v113_v2, %v33_v13  ;;  %v38_v22 = vsub.f32 %v19_v3, %v35_v20 }
  0x7c   :  { %v39_v15 = vmul.f32 %v36_v14, %v36_v14  ;;  %v41_v23 = vmul.f32 %v38_v22, %v38_v22 }
  0x7e   :  { %42 = vadd.xlane.f32.xlu1 %v39_v15 }
  0x7f   :  { %v23_v16 = vpop.xlane.xlu0 %22 }
  0x80   :  { %v34_v18 = vmul.f32 %v32_v11, %v23_v16 }
  0x82   :  { %v37_v19 = vsub.f32 %v114_v4, %v34_v18 }
  0x84   :  { %v40_v21 = vmul.f32 %v37_v19, %v37_v19 }
  0x86   :  { %44 = vadd.xlane.f32.xlu2 %v40_v21 }
  0x8e   :  { %46 = vadd.xlane.f32.xlu2 %v41_v23 }
  0xf1   :  { %v43_v24 = vpop.xlane.xlu1 %42 }
  0xf2   :  { %v48_v25 = vmul.f32 %v43_v24, %v32_v11 }
  0xf4   :  { %v51_v26 = vadd.f32 1e-05, %v48_v25 }
  0xf6   :  { %125 = vrsqrt.f32 %v51_v26  ;;  %vm60_vm2 = vweird.f32 %v51_v26 }
  0xf9   :  { %v45_v27 = vpop.xlane.xlu2 %44 }
  0xfa   :  { %v49_v28 = vmul.f32 %v45_v27, %v32_v11 }
  0xfc   :  { %v126_v29 = vpop.eup %125  ;;  %v52_v30 = vadd.f32 1e-05, %v49_v28 }
  0xfd   :  { %v55_v31 = vmul.f32 %v126_v29, %v51_v26  ;;  %vm61_vm1 = vweird.f32 %v126_v29 }
  0xfe   :  { %127 = vrsqrt.f32 %v52_v30  ;;  %vm62_vm3 = vmor %vm60_vm2, %vm61_vm1  ;;  %vm70_vm5 = vweird.f32 %v52_v30 }
  0xff   :  { %v56_v32 = vmul.f32 %v126_v29, %v55_v31 }
 0x101   :  { %v57_v33 = vmul.f32 0.5, %v56_v32  ;;  %v47_v34 = vpop.xlane.xlu2 %46 }
 0x102   :  { %v50_v35 = vmul.f32 %v47_v34, %v32_v11 }
 0x103   :  { %v58_v36 = vsub.f32 1.5, %v57_v33 }
 0x104   :  { %v128_v37 = vpop.eup %127  ;;  %v53_v38 = vadd.f32 1e-05, %v50_v35 }
 0x105   :  { %v59_v39 = vmul.f32 %v126_v29, %v58_v36  ;;  %v65_v40 = vmul.f32 %v128_v37, %v52_v30  ;;  %vm71_vm4 = vweird.f32 %v128_v37 }
 0x106   :  { %129 = vrsqrt.f32 %v53_v38  ;;  %vm72_vm6 = vmor %vm70_vm5, %vm71_vm4  ;;  %vm80_vm8 = vweird.f32 %v53_v38 }
 0x107   :  { %v66_v41 = vmul.f32 %v128_v37, %v65_v40  ;;  %v63_v42 = vsel %vm62_vm3, %v126_v29, %v59_v39 }
 0x108   :  { %v84_v47 = vmul.f32 %v63_v42, %v36_v14 }
 0x109   :  { %v67_v43 = vmul.f32 0.5, %v66_v41 }
 0x10a   :  { %v91_v53 = vmul.f32 %v121_v46, %v84_v47 }
 0x10b   :  { %v68_v44 = vsub.f32 1.5, %v67_v43 }
 0x10c   :  { %v130_v45 = vpop.eup %129  ;;  %v98_v58 = vadd.f32 %v122_v52, %v91_v53 }
 0x10d   :  { %v69_v48 = vmul.f32 %v128_v37, %v68_v44  ;;  %v75_v49 = vmul.f32 %v130_v45, %v53_v38  ;;  %vm81_vm7 = vweird.f32 %v130_v45 }
 0x10e   :  { %vm82_vm9 = vmor %vm80_vm8, %vm81_vm7 }
 0x10f   :  { %v73_v50 = vsel %vm72_vm6, %v128_v37, %v69_v48  ;;  %v76_v51 = vmul.f32 %v130_v45, %v75_v49 }
 0x110   :  { %v85_v54 = vmul.f32 %v73_v50, %v37_v19 }
 0x111   :  { %v77_v55 = vmul.f32 0.5, %v76_v51 }
 0x112   :  { %v92_v56 = vmul.f32 %v121_v46, %v85_v54 }
 0x113   :  { %v78_v57 = vsub.f32 1.5, %v77_v55 }
 0x114   :  { %v99_v59 = vadd.f32 %v122_v52, %v92_v56 }
 0x115   :  { %v79_v60 = vmul.f32 %v130_v45, %v78_v57 }
 0x116   :  { %v118_v61 = vpack.c.bf16 %v99_v59, %v98_v58 }
 0x117   :  { %v83_v62 = vsel %vm82_vm9, %v130_v45, %v79_v60 }
 0x118   :  { %119 = vst [vmem:[%s173_s3] sm:$0xff] %v118_v61   ;;  %v86_v63 = vmul.f32 %v83_v62, %v38_v22 }
 0x11a   :  { %v93_v0 = vmul.f32 %v121_v46, %v86_v63 }
 0x11c   :  { %v100_v1 = vadd.f32 %v122_v52, %v93_v0 }
 0x11e   :  { %v103_v2 = vpack.c.bf16 %v100_v1, %v100_v1 }
 0x120   :  { %106 = vst [vmem:[%s173_s3 + $0x8] sm:$0xf] %v103_v2 }

// kernel: evl_forward.30
= control target key start
LH: loop header
LB: loop body
LE: loop exit
PB: predicated region body
PF: predicated region fallthrough
CT: control target
= control target key end

     0   :  { %8 = vsyncpa [#allocation4], 0  ;;  %s308_s15 = smov [#allocation3]   ;;  %s309_s17 = smov 64   ;;  %s352_s0 = inlined_call_operand.vmem [shape: bf16[16,192], index: 0, kind: input, shape index: {}]   ;;  %s353_s1 = inlined_call_operand.hbm [shape: bf16[192,128], index: 1, kind: input, shape index: {}]   ;;  %s354_s2 = inlined_call_operand.vmem [shape: f32[1,128], index: 2, kind: input, shape index: {}]   ;;  %s355_s3 = inlined_call_operand.vmem [shape: bf16[16,128], index: 3, kind: output, shape index: {}]  }
   0x1   :  { %s15_s14 = sshll.u32 %s353_s1, 4  ;;  %s17_s16 = sshll.u32 %s308_s15, 4  ;;  %s16_s14 = int_to_ptr.hbm [resolvable:$true] %s15_s14  ;;  %s18_s16 = int_to_ptr.vmem [resolvable:$true] %s17_s16 }
   0x2   :  { %s310_s18 = smov 4  }
   0x3   :  { %23 = dma.hbm_to_vmem [thread:$0]  %s16_s14, 1536, %s18_s16, [#allocation4], %s309_s17, %s309_s17, %s310_s18  }
   0x4   :  { %306 = dma.done.wait [#allocation4], 1536  }
   0x5   :  { %307 = vsyncadd [#allocation4], 4294965760  ;;  %v268_v0 = vld [vmem:[#allocation3 + $0x38] sm:$0xff]  ;;  %v267_v2 = vld [vmem:[#allocation3 + $0x30] sm:$0xff]  ;;  %vm146_vm0 = vcmask 523264  }
   0x6   :  { %v272_v1 = vld [vmem:[#allocation3 + $0x58] sm:$0xff]  ;;  %150 = vmatpush.bf16.msra.mxu0 %v268_v0  ;;  %v271_v3 = vld [vmem:[#allocation3 + $0x50] sm:$0xff]  ;;  %v266_v4 = vld [vmem:[#allocation3 + $0x28] sm:$0xff] }
   0x7   :  { %168 = vmatpush.bf16.msra.mxu1 %v272_v1  ;;  %v270_v5 = vld [vmem:[#allocation3 + $0x48] sm:$0xff]  ;;  %v265_v6 = vld [vmem:[#allocation3 + $0x20] sm:$0xff]  ;;  %v264_v10 = vld [vmem:[#allocation3 + $0x18] sm:$0xff] }
   0x8   :  { %v269_v7 = vld [vmem:[#allocation3 + $0x40] sm:$0xff]  ;;  %v206_v9 = vld [vmem:[%s352_s0 + $0x8] sm:$0xf0]  ;;  %v263_v12 = vld [vmem:[#allocation3 + $0x10] sm:$0xff] }
   0x9   :  { %v259_v8 = vld [vmem:[%s352_s0 + $0x4] sm:$0xf]  ;;  %v262_v13 = vld [vmem:[#allocation3 + $0x8] sm:$0xff]  ;;  %v204_v15 = vld [vmem:[%s352_s0] sm:$0xf] }
   0xa   :  { %151 = vmatpush.bf16.msra.mxu0 %v267_v2  ;;  %v209_v11 = vor.u32 %v259_v8, %v206_v9  ;;  %v261_v14 = vld [vmem:[#allocation3] sm:$0xff]  ;;  %v260_v16 = vld [vmem:[%s352_s0 + $0x4] sm:$0xf0] }
   0xb   :  { %169 = vmatpush.bf16.msra.mxu1 %v271_v3  ;;  %v205_v17 = vor.u32 %v260_v16, %v204_v15  ;;  %v281_v21 = vld [vmem:[%s354_s2] ss:$0 sm:$0xff] }
   0xe   :  { %152 = vmatpush.bf16.msra.mxu0 %v266_v4 }
   0xf   :  { %170 = vmatpush.bf16.msra.mxu1 %v270_v5 }
  0x12   :  { %153 = vmatpush.bf16.msra.mxu0 %v265_v6 }
  0x13   :  { %171 = vmatpush.bf16.msra.mxu1 %v269_v7 }
  0x16   :  { %154 = vmatpush.bf16.msra.mxu0 %v264_v10  ;;  %258 = vmatmul.msk.bf16.vlgmr.msra.gmra.mxu1 %vm146_vm0, %v209_v11 }
  0x1a   :  { %155 = vmatpush.bf16.msra.mxu0 %v263_v12 }
  0x1e   :  { %156 = vmatpush.bf16.msra.mxu0 %v262_v13 }
  0x22   :  { %157 = vmatpush.bf16.msra.mxu0 %v261_v14 }
  0x25   :  { %158 = vmatmul.bf16.vlgmr.msra.gmra.mxu0 %v205_v17 }
  0x93   :  { %v173_v18 = vpop.f32.mrf.mxu1 }
  0x9b   :  { %v175_v22 = vpop.f32.mrf.mxu1 }
  0xa2   :  { %v159_v19 = vpop.f32.mrf.mxu0 }
  0xa3   :  { %v174_v20 = vadd.f32 %v173_v18, %v159_v19 }
  0xa5   :  { %v191_v25 = vadd.f32 %v281_v21, %v174_v20 }
  0xaa   :  { %v161_v23 = vpop.f32.mrf.mxu0 }
  0xab   :  { %v176_v24 = vadd.f32 %v175_v22, %v161_v23 }
  0xad   :  { %v192_v26 = vadd.f32 %v281_v21, %v176_v24 }
  0xaf   :  { %v276_v27 = vpack.c.bf16 %v192_v26, %v191_v25 }
  0xb1   :  { %277 = vst [vmem:[%s355_s3] sm:$0xff] %v276_v27  }
  0xb2   :  { %201 = vsyncpa [#allocation4], 1 }

// kernel: evl_forward.32
= control target key start
LH: loop header
LB: loop body
LE: loop exit
PB: predicated region body
PF: predicated region fallthrough
CT: control target
= control target key end

     0   :  { %s931_s18 = smov 0   ;;  %s933_s19 = smov 0   ;;  %s1064_s0 = inlined_call_operand.vmem [shape: bf16[24,128], index: 0, kind: input, shape index: {}]   ;;  %s1065_s1 = inlined_call_operand.vmem [shape: f32[1,128], index: 1, kind: input, shape index: {}]   ;;  %s1066_s2 = inlined_call_operand.vmem [shape: f32[1,128], index: 2, kind: input, shape index: {}]   ;;  %s1067_s3 = inlined_call_operand.vmem [shape: bf16[128,384], index: 3, kind: input, shape index: {}]   ;;  %s1068_s4 = inlined_call_operand.vmem [shape: f32[1,384], index: 4, kind: input, shape index: {}]   ;;  %s1069_s5 = inlined_call_operand.vmem [shape: bf16[24,384], index: 5, kind: output, shape index: {}]  }
   0x1   :  { %s935_s20 = smov 0   ;;  %s937_s21 = smov 0  }
   0x2   :  { %s939_s22 = smov 0  }
   0x3 LB: > { %s24_s23 = sadd.s32 1, %s894_s21  ;;  %s727_s24 = sadd.s32 4294967295, %s898_s22   ;;  %s898_s22 = sphi %s939_s22, %s15_s22   ;;  %s894_s21 = sphi %s937_s21, %s1074_s21   ;;  %s890_s20 = sphi %s935_s20, %s1073_s20   ;;  %s886_s19 = sphi %s933_s19, %s1072_s19   ;;  %s882_s18 = sphi %s931_s18, %s1071_s18  }
   0x4   : > { %p25_p0 = scmp.ge.s32.totalorder %s24_s23, 3  ;;  %p109_p1 = scmp.ne.s32.totalorder %s886_s19, %s882_s18 }
   0x5   : > { %p110_p2 = scmp.eq.s32.totalorder %s898_s22, 0  ;;  %p167_p4 = scmp.eq.s32.totalorder %s727_s24, 2 }
   0x6   : > { %s1076_s23 = smov (%p25_p0, %s24_s23), 0  ;;  %s102_s26 = sadd.s32 1, %s886_s19 }
   0x7   : > { %p111_p3 = por %p110_p2, %p109_p1  ;;  %s99_s25 = ssub.s32 %s894_s21, %s1076_s23 }
   0x8   : > { %p100_p5 = scmp.eq.s32.totalorder %s99_s25, 0  ;;  %p966_p6 = por %p167_p4, %p109_p1 }
   0x9   : > { %p731_p7 = scmp.ge.s32.totalorder %s898_s22, 3 }
   0xa   : > { %s971_s28 = scalar_select %p100_p5, %s886_s19, %s102_s26  }
   0xb   : > { %204 = sbr.rel (%p731_p7) target bundleno = 36 (0x24), region = 28 }
  0x10   : > { %207 = sbr.rel (!%p111_p3) target bundleno = 36 (0x24), region = 32  ;;  %s209_s29 = sand.u32 (%p111_p3), 1, %s886_s19  }
  0x11   : > { %s733_s30 = sshll.u32 (%p111_p3), %s894_s21, 2  ;;  %s732_s6 = sshll.u32 (%p111_p3), %s209_s29, 6 }
  0x12   : > { %s979_s9 = scalar_lea.vmem (%p111_p3), %s1067_s3, %s733_s30  ;;  %s211_s10 = scalar_lea.vmem (%p111_p3), [#allocation3], %s732_s6 }
  0x13   : > { %v230_v0 = vld [vmem:[%s979_s9] sm:$0xf] (%p111_p3)  ;;  %v232_v1 = vld [vmem:[%s979_s9 + $0xc] sm:$0xf] (%p111_p3)  ;;  %v234_v2 = vld [vmem:[%s979_s9 + $0x18] sm:$0xf] (%p111_p3) }
  0x14   : > { %231 = vst [vmem:[%s211_s10] sm:$0xf] (%p111_p3), %v230_v0  ;;  %v236_v3 = vld [vmem:[%s979_s9 + $0x24] sm:$0xf] (%p111_p3)  ;;  %v238_v4 = vld [vmem:[%s979_s9 + $0x30] sm:$0xf] (%p111_p3) }
  0x15   : > { %233 = vst [vmem:[%s211_s10 + $0x4] sm:$0xf] %v232_v1  ;;  %v240_v5 = vld [vmem:[%s979_s9 + $0x3c] sm:$0xf]  ;;  %v242_v6 = vld [vmem:[%s979_s9 + $0x48] sm:$0xf] }
  0x16   : > { %235 = vst [vmem:[%s211_s10 + $0x8] sm:$0xf] %v234_v2  ;;  %v244_v7 = vld [vmem:[%s979_s9 + $0x54] sm:$0xf]  ;;  %v246_v8 = vld [vmem:[%s979_s9 + $0x60] sm:$0xf] }
  0x17   : > { %237 = vst [vmem:[%s211_s10 + $0xc] sm:$0xf] %v236_v3  ;;  %v248_v9 = vld [vmem:[%s979_s9 + $0x6c] sm:$0xf]  ;;  %v250_v10 = vld [vmem:[%s979_s9 + $0x78] sm:$0xf] }
  0x18   : > { %239 = vst [vmem:[%s211_s10 + $0x10] sm:$0xf] %v238_v4  ;;  %v252_v11 = vld [vmem:[%s979_s9 + $0x84] sm:$0xf]  ;;  %v254_v12 = vld [vmem:[%s979_s9 + $0x90] sm:$0xf] }
  0x19   : > { %241 = vst [vmem:[%s211_s10 + $0x14] sm:$0xf] %v240_v5  ;;  %v256_v13 = vld [vmem:[%s979_s9 + $0x9c] sm:$0xf]  ;;  %v258_v14 = vld [vmem:[%s979_s9 + $0xa8] sm:$0xf] }
  0x1a   : > { %243 = vst [vmem:[%s211_s10 + $0x18] sm:$0xf] %v242_v6  ;;  %v260_v15 = vld [vmem:[%s979_s9 + $0xb4] sm:$0xf] }
  0x1b   : > { %245 = vst [vmem:[%s211_s10 + $0x1c] sm:$0xf] %v244_v7 }
  0x1c   : > { %247 = vst [vmem:[%s211_s10 + $0x20] sm:$0xf] %v246_v8 }
  0x1d   : > { %249 = vst [vmem:[%s211_s10 + $0x24] sm:$0xf] %v248_v9 }
  0x1e   : > { %251 = vst [vmem:[%s211_s10 + $0x28] sm:$0xf] %v250_v10 }
  0x1f   : > { %253 = vst [vmem:[%s211_s10 + $0x2c] sm:$0xf] %v252_v11 }
  0x20   : > { %255 = vst [vmem:[%s211_s10 + $0x30] sm:$0xf] %v254_v12 }
  0x21   : > { %257 = vst [vmem:[%s211_s10 + $0x34] sm:$0xf] %v256_v13 }
  0x22   : > { %259 = vst [vmem:[%s211_s10 + $0x38] sm:$0xf] %v258_v14 }
  0x23   : > { %261 = vst [vmem:[%s211_s10 + $0x3c] sm:$0xf] %v260_v15 }
  0x24 PF: > { %p734_p8 = scmp.ge.s32.totalorder %s898_s22, 1  ;;  %p322_p9 = scmp.lt.s32.totalorder %s898_s22, 4 }
  0x26   : > { %p323_p10 = pnand %p734_p8, %p322_p9 }
  0x27   : > { %s329_s11 = sand.u32 (!%p323_p10), 1, %s882_s18   ;;  %p369_p11 = scmp.lt.s32.totalorder (!%p323_p10), %s890_s20, 2 }
  0x28   : > { %326 = sbr.rel (%p323_p10) target bundleno = 519 (0x207), region = 77  ;;  %s735_s12 = sshll.u32 (!%p323_p10), %s329_s11, 6 }
  0x29   : > { %s807_s13 = smul.u32 (!%p323_p10), 12, %s329_s11  ;;  %s1008_s24 = scalar_lea.vmem (!%p323_p10), [#allocation3], %s735_s12 }
  0x2a   : > { %p736_p12 = scmp.ne.s32.totalorder (!%p323_p10), %s890_s20, 0 }
  0x2b   : > { %s1010_s25 = scalar_lea.vmem (!%p323_p10), [#allocation4], %s807_s13 }
  0x2d   : > { %s1002_s14 = scalar_select %p369_p11, %s890_s20, 2 }
  0x2e   : > { %376 = sbr.rel (%p736_p12) target bundleno = 339 (0x153), region = 85 }
  0x2f   : > { %s371_s17 = scalar_lea.vmem %s1068_s4, %s1002_s14 }
  0x33   : > { %v786_v16 = vld [vmem:[%s1064_s0] sm:$0xff]   ;;  %v379_v17 = vld [vmem:[%s1064_s0 + $0x8] sm:$0xf]  ;;  %v900_v21 = vmov 128.0  }
  0x34   : > { %v787_v18 = vunpack.c.l.bf16 %v786_v16  ;;  %v382_v19 = vunpack.c.l.bf16 %v379_v17  ;;  %v788_v20 = vunpack.c.h.bf16 %v786_v16  ;;  %851 = vrcp.f32 %v900_v21  ;;  %v849_v62 = vld [vmem:[%s1065_s1] ss:$0 sm:$0xff] }
  0x35   : > { %v850_v4 = vld [vmem:[%s1066_s2] ss:$0 sm:$0xff] }
  0x36   : > { %383 = vadd.xlane.f32.xlu0 %v787_v18  ;;  %387 = vadd.xlane.f32.xlu1 %v382_v19 }
  0x3a   : > { %v852_v22 = vpop.eup %851 }
  0x3b   : > { %v390_v23 = vmul.f32 128.0, %v852_v22  ;;  %vm394_vm0 = vweird.f32 %v852_v22 }
  0x3d   : > { %v391_v24 = vsub.f32 1.0, %v390_v23 }
  0x3e   : > { %385 = vadd.xlane.f32.xlu0 %v788_v20 }
  0x3f   : > { %v392_v25 = vmul.f32 %v852_v22, %v391_v24 }
  0x41   : > { %v393_v26 = vadd.f32 %v852_v22, %v392_v25 }
  0x43   : > { %v395_v27 = vsel %vm394_vm0, %v852_v22, %v393_v26 }
  0xa9   : > { %v384_v28 = vpop.xlane.xlu0 %383  ;;  %v388_v33 = vpop.xlane.xlu1 %387 }
  0xaa   : > { %v396_v29 = vmul.f32 %v395_v27, %v384_v28  ;;  %v398_v36 = vmul.f32 %v395_v27, %v388_v33 }
  0xac   : > { %v399_v30 = vsub.f32 %v787_v18, %v396_v29  ;;  %v401_v38 = vsub.f32 %v382_v19, %v398_v36 }
  0xae   : > { %v402_v31 = vmul.f32 %v399_v30, %v399_v30  ;;  %v404_v39 = vmul.f32 %v401_v38, %v401_v38 }
  0xb0   : > { %405 = vadd.xlane.f32.xlu1 %v402_v31 }
  0xb1   : > { %v386_v32 = vpop.xlane.xlu0 %385 }
  0xb2   : > { %v397_v34 = vmul.f32 %v395_v27, %v386_v32 }
  0xb4   : > { %v400_v35 = vsub.f32 %v788_v20, %v397_v34 }
  0xb6   : > { %v403_v37 = vmul.f32 %v400_v35, %v400_v35 }
  0xb8   : > { %407 = vadd.xlane.f32.xlu2 %v403_v37 }
  0xc0   : > { %409 = vadd.xlane.f32.xlu2 %v404_v39 }
 0x123   : > { %v406_v40 = vpop.xlane.xlu1 %405 }
 0x124   : > { %v411_v41 = vmul.f32 %v406_v40, %v395_v27 }
 0x126   : > { %v414_v42 = vadd.f32 1e-05, %v411_v41 }
 0x128   : > { %853 = vrsqrt.f32 %v414_v42  ;;  %vm423_vm2 = vweird.f32 %v414_v42 }
 0x12b   : > { %v408_v43 = vpop.xlane.xlu2 %407 }
 0x12c   : > { %v412_v44 = vmul.f32 %v408_v43, %v395_v27 }
 0x12e   : > { %v854_v45 = vpop.eup %853  ;;  %v415_v46 = vadd.f32 1e-05, %v412_v44 }
 0x12f   : > { %v418_v47 = vmul.f32 %v854_v45, %v414_v42  ;;  %vm424_vm1 = vweird.f32 %v854_v45 }
 0x130   : > { %855 = vrsqrt.f32 %v415_v46  ;;  %vm425_vm3 = vmor %vm423_vm2, %vm424_vm1  ;;  %vm433_vm5 = vweird.f32 %v415_v46 }
 0x131   : > { %v419_v48 = vmul.f32 %v854_v45, %v418_v47 }
 0x133   : > { %v420_v49 = vmul.f32 0.5, %v419_v48  ;;  %v410_v50 = vpop.xlane.xlu2 %409 }
 0x134   : > { %v413_v51 = vmul.f32 %v410_v50, %v395_v27 }
 0x135   : > { %v421_v52 = vsub.f32 1.5, %v420_v49 }
 0x136   : > { %v856_v53 = vpop.eup %855  ;;  %v416_v54 = vadd.f32 1e-05, %v413_v51 }
 0x137   : > { %v422_v55 = vmul.f32 %v854_v45, %v421_v52  ;;  %v428_v56 = vmul.f32 %v856_v53, %v415_v46  ;;  %vm434_vm4 = vweird.f32 %v856_v53 }
 0x138   : > { %857 = vrsqrt.f32 %v416_v54  ;;  %vm435_vm6 = vmor %vm433_vm5, %vm434_vm4  ;;  %vm443_vm8 = vweird.f32 %v416_v54 }
 0x139   : > { %v429_v57 = vmul.f32 %v856_v53, %v428_v56  ;;  %v426_v58 = vsel %vm425_vm3, %v854_v45, %v422_v55 }
 0x13a   : > { %v447_v63 = vmul.f32 %v426_v58, %v399_v30 }
 0x13b   : > { %v430_v59 = vmul.f32 0.5, %v429_v57 }
 0x13c   : > { %v454_v5 = vmul.f32 %v849_v62, %v447_v63 }
 0x13d   : > { %v431_v60 = vsub.f32 1.5, %v430_v59 }
 0x13e   : > { %v858_v61 = vpop.eup %857  ;;  %v461_v10 = vadd.f32 %v850_v4, %v454_v5 }
 0x13f   : > { %v432_v0 = vmul.f32 %v856_v53, %v431_v60  ;;  %v438_v1 = vmul.f32 %v858_v61, %v416_v54  ;;  %vm444_vm7 = vweird.f32 %v858_v61 }
 0x140   : > { %vm445_vm9 = vmor %vm443_vm8, %vm444_vm7 }
 0x141   : > { %v436_v2 = vsel %vm435_vm6, %v856_v53, %v432_v0  ;;  %v439_v3 = vmul.f32 %v858_v61, %v438_v1 }
 0x142   : > { %v448_v6 = vmul.f32 %v436_v2, %v400_v35 }
 0x143   : > { %v440_v7 = vmul.f32 0.5, %v439_v3 }
 0x144   : > { %v455_v8 = vmul.f32 %v849_v62, %v448_v6 }
 0x145   : > { %v441_v9 = vsub.f32 1.5, %v440_v7 }
 0x146   : > { %v462_v11 = vadd.f32 %v850_v4, %v455_v8 }
 0x147   : > { %v442_v12 = vmul.f32 %v858_v61, %v441_v9 }
 0x148   : > { %v792_v13 = vpack.c.bf16 %v462_v11, %v461_v10 }
 0x149   : > { %v446_v14 = vsel %vm445_vm9, %v858_v61, %v442_v12 }
 0x14a   : > { %793 = vst [vmem:[#allocation2] sm:$0xff] %v792_v13   ;;  %v449_v15 = vmul.f32 %v446_v14, %v401_v38 }
 0x14c   : > { %v456_v16 = vmul.f32 %v849_v62, %v449_v15 }
 0x14e   : > { %v463_v17 = vadd.f32 %v850_v4, %v456_v16 }
 0x150   : > { %v466_v18 = vpack.c.bf16 %v463_v17, %v463_v17 }
 0x152   : > { %469 = vst [vmem:[#allocation2 + $0x8] sm:$0xf] %v466_v18 }
 0x153 PF: > { %v784_v19 = vld [vmem:[%s1008_s24 + $0x38] sm:$0xff]  ;;  %v783_v20 = vld [vmem:[%s1008_s24 + $0x30] sm:$0xff]  ;;  %v782_v21 = vld [vmem:[%s1008_s24 + $0x28] sm:$0xff]  ;;  %s773_s12 = sshll.u32 (%p966_p6), %s890_s20, 2 }
 0x154   : > { %551 = vmatpush.bf16.msra.mxu0 %v784_v19  ;;  %799 = vmatpush.bf16.msra.mxu1 %v784_v19  ;;  %v781_v22 = vld [vmem:[%s1008_s24 + $0x20] sm:$0xff]  ;;  %v780_v23 = vld [vmem:[%s1008_s24 + $0x18] sm:$0xff]  ;;  %v779_v24 = vld [vmem:[%s1008_s24 + $0x10] sm:$0xff]  ;;  %s586_s15 = scalar_lea.vmem (%p966_p6), %s1069_s5, %s773_s12 }
 0x155   : > { %v778_v25 = vld [vmem:[%s1008_s24 + $0x8] sm:$0xff]  ;;  %v777_v28 = vld [vmem:[%s1008_s24] sm:$0xff]  ;;  %v776_v29 = vld [vmem:[#allocation2] sm:$0xff] }
 0x156   : > { %v859_v31 = vld [vmem:[%s371_s17] ss:$0 sm:$0xff] }
 0x158   : > { %552 = vmatpush.bf16.msra.mxu0 %v783_v20  ;;  %800 = vmatpush.bf16.msra.mxu1 %v783_v20 }
 0x159   : > { %v472_v26 = vld [vmem:[#allocation2 + $0x8] sm:$0xf] }
 0x15a   : > { %v498_v27 = vunpack.c.l.b16 %v472_v26 }
 0x15c   : > { %553 = vmatpush.bf16.msra.mxu0 %v782_v21  ;;  %801 = vmatpush.bf16.msra.mxu1 %v782_v21  ;;  %v500_v30 = vpack.c.b16 %v498_v27, %v498_v27 }
 0x160   : > { %554 = vmatpush.bf16.msra.mxu0 %v781_v22  ;;  %802 = vmatpush.bf16.msra.mxu1 %v781_v22 }
 0x164   : > { %555 = vmatpush.bf16.msra.mxu0 %v780_v23  ;;  %803 = vmatpush.bf16.msra.mxu1 %v780_v23 }
 0x168   : > { %556 = vmatpush.bf16.msra.mxu0 %v779_v24  ;;  %804 = vmatpush.bf16.msra.mxu1 %v779_v24 }
 0x16c   : > { %557 = vmatpush.bf16.msra.mxu0 %v778_v25  ;;  %805 = vmatpush.bf16.msra.mxu1 %v778_v25 }
 0x170   : > { %558 = vmatpush.bf16.msra.mxu0 %v777_v28  ;;  %806 = vmatpush.bf16.msra.mxu1 %v777_v28 }
 0x173   : > { %559 = vmatmul.bf16.vlgmr.msra.gmra.mxu0 %v776_v29  ;;  %564 = vmatmul.bf16.vlgmr.msra.gmra.mxu1 %v500_v30 }
 0x1f0   : > { %v560_v32 = vpop.f32.mrf.mxu0  ;;  %v565_v33 = vpop.f32.mrf.mxu1 }
 0x1f1   : > { %v566_v34 = vadd.f32 %v859_v31, %v565_v33  ;;  %v561_v38 = vadd.f32 %v859_v31, %v560_v32 }
 0x1f3   : > { %v571_v35 = vpack.c.bf16 %v566_v34, %v566_v34 }
 0x1f5   : > { %574 = vst [vmem:[%s1010_s25 + $0x8] sm:$0xf] %v571_v35 }
 0x1f8   : > { %v562_v36 = vpop.f32.mrf.mxu0  ;;  %v567_v37 = vpop.f32.mrf.mxu1 }
 0x1f9   : > { %v563_v39 = vadd.f32 %v859_v31, %v562_v36  ;;  %581 = sbr.rel (!%p966_p6) target bundleno = 519 (0x207), region = 89 }
 0x1fb   : > { %v797_v40 = vpack.c.bf16 %v563_v39, %v561_v38 }
 0x1fc   : > { %v607_v43 = vld [vmem:[%s1010_s25 + $0x8] sm:$0xf] (%p966_p6) }
 0x1fd   : > { %798 = vst [vmem:[%s1010_s25] sm:$0xff] %v797_v40  }
 0x1fe   : > { %608 = vst [vmem:[%s586_s15 + $0x18] sm:$0xf] %v607_v43 }
 0x204   : > { %v603_v41 = vld [vmem:[%s1010_s25] sm:$0xf]  ;;  %v605_v42 = vld [vmem:[%s1010_s25 + $0x4] sm:$0xf] }
 0x205   : > { %604 = vst [vmem:[%s586_s15] sm:$0xf] %v603_v41 }
 0x206   : > { %606 = vst [vmem:[%s586_s15 + $0xc] sm:$0xf] %v605_v42 }
 0x207 PF: > { %s15_s22 = sadd.s32 1, %s898_s22   ;;  %s1071_s18 = smov %s886_s19 }
 0x208   : > { %p12_p13 = scmp.ge.s32.totalorder %s15_s22, 5   ;;  %s1072_s19 = smov %s971_s28 }
 0x209   : > { %s1073_s20 = smov %s894_s21  ;;  %s1074_s21 = smov %s1076_s23 }
 0x20a   :  { %14 = sbr.rel (!%p12_p13) target bundleno = 3 (0x3), region = 167 }

// kernel: evl_forward.33
= control target key start
LH: loop header
LB: loop body
LE: loop exit
PB: predicated region body
PF: predicated region fallthrough
CT: control target
= control target key end

     0   :  { %s860_s6 = smov 0   ;;  %s1017_s0 = inlined_call_operand.vmem [shape: bf16[4,5,384], index: 0, kind: input, shape index: {}]   ;;  %s1018_s1 = inlined_call_operand.vmem [shape: bf16[4,5,128], index: 1, kind: output, shape index: {}]  }
   0x1 LB: > { %s766_s7 = sadd.s32 4294967295, %s844_s6   ;;  %p770_p0 = scmp.ge.s32.totalorder %s844_s6, 1  ;;  %s844_s6 = sphi %s860_s6, %s11_s6  }
   0x2   : > { %p89_p1 = scmp.lt.s32.totalorder %s844_s6, 3 }
   0x4   : > { %p90_p2 = pnand %p770_p0, %p89_p1 }
   0x5   : > { %s771_s8 = sshll.u32 (!%p90_p2), %s766_s7, 1  ;;  %s846_s13 = smov (!%p90_p2), 96  }
   0x6   : > { %93 = sbr.rel (%p90_p2) target bundleno = 1141 (0x475), region = 24  ;;  %p111_p3 = scmp.lt.s32.totalorder (!%p90_p2), %s771_s8, 3 }
   0x7   : > { %s847_s14 = smov (!%p90_p2), 32   ;;  %s848_s15 = smov (!%p90_p2), 64  }
   0xb   : > { %s1022_s8 = smov (!%p111_p3, %s771_s8), 3  ;;  %vm130_vm0 = vcmask 261120   ;;  %vm169_vm1 = vcmask 36864   ;;  %vm198_vm2 = vcmask 1041408   ;;  %vm199_vm3 = vcmask 1042432  }
   0xc   : > { %s793_s9 = smul.u32 12, %s1022_s8  ;;  %v849_v55 = vmov 65535   ;;  %vm194_vm4 = vcmask 39936   ;;  %s774_s16 = sshll.u32 %s1022_s8, 2  ;;  %vm702_vm5 = vsmask.f32 2304 }
   0xd   : > { %v200_v56 = vsel %vm198_vm2, 4294967295, %v849_v55  ;;  %s121_s19 = scalar_lea.vmem %s1018_s1, %s774_s16  ;;  %vm689_vm6 = vcmask 523264   ;;  %vm694_vm7 = vcmask 785408   ;;  %vm1003_vm8 = vmand %vm199_vm3, %vm702_vm5 }
   0xe   : > { %s874_s12 = scalar_lea.vmem %s1017_s0, %s793_s9  ;;  %v919_v59 = vsel %vm199_vm3, %v200_v56, 0 }
   0xf   : > { %v126_v0 = vld [vmem:[%s874_s12 + $0x4] sm:$0x7]  ;;  %v127_v1 = vld [vmem:[%s874_s12 + $0x10] sm:$0x7]  ;;  %v124_v4 = vld [vmem:[%s874_s12] sm:$0x7] }
  0x10   : > { %v135_v2 = vsel %vm130_vm0, %v126_v0, 0  ;;  %v154_v3 = vsel %vm130_vm0, %v127_v1, 0  ;;  %v125_v5 = vld [vmem:[%s874_s12 + $0xc] sm:$0x7]  ;;  %v242_v12 = vld [vmem:[%s874_s12 + $0x10] sm:$0x7] }
  0x11   : > { %144 = vmatpush.bf16.xpose.msra.mxu0 %v135_v2  ;;  %163 = vmatpush.bf16.xpose.msra.mxu1 %v154_v3  ;;  %v280_v13 = vunpack.c.l.b16 %v242_v12  ;;  %v241_v23 = vld [vmem:[%s874_s12 + $0x4] sm:$0x7]  ;;  %v239_v25 = vld [vmem:[%s874_s12] sm:$0x7]  ;;  %v240_v34 = vld [vmem:[%s874_s12 + $0xc] sm:$0x7] }
  0x12   : > { %v251_v24 = vunpack.c.l.b16 %v241_v23  ;;  %v517_v26 = vld [vmem:[%s874_s12 + $0x4] sm:$0x7]  ;;  %v246_v29 = vunpack.c.l.b16 %v239_v25  ;;  %v275_v35 = vunpack.c.l.b16 %v240_v34  ;;  %v518_v36 = vld [vmem:[%s874_s12 + $0x10] sm:$0x7]  ;;  %v377_v40 = vld [vmem:[%s874_s12] sm:$0x7] }
  0x13   : > { %v281_v14 = vpack.c.b16 %v280_v13, %v280_v13  ;;  %v527_v28 = vunpack.c.l.b16 %v517_v26  ;;  %v556_v37 = vunpack.c.l.b16 %v518_v36  ;;  %v384_v41 = vunpack.c.l.b16 %v377_v40  ;;  %v379_v42 = vld [vmem:[%s874_s12 + $0x4] sm:$0x7]  ;;  %v380_v45 = vld [vmem:[%s874_s12 + $0x10] sm:$0x7]  ;;  %v515_v48 = vld [vmem:[%s874_s12] sm:$0x7] }
  0x14   : > { %v252_v27 = vpack.c.b16 %v251_v24, %v251_v24  ;;  %v247_v33 = vpack.c.b16 %v246_v29, %v246_v29  ;;  %v276_v39 = vpack.c.b16 %v275_v35, %v275_v35  ;;  %v389_v44 = vunpack.c.l.b16 %v379_v42  ;;  %v378_v51 = vld [vmem:[%s874_s12 + $0xc] sm:$0x7]  ;;  %v128_v58 = vld [vmem:[%s874_s12 + $0x8] sm:$0x7]  ;;  %v129_v0 = vld [vmem:[%s874_s12 + $0x14] sm:$0x7] }
  0x15   : > { %v528_v30 = vpack.c.b16 %v527_v28, %v527_v28  ;;  %v557_v38 = vpack.c.b16 %v556_v37, %v556_v37  ;;  %v385_v43 = vpack.c.b16 %v384_v41, %v384_v41  ;;  %v418_v46 = vunpack.c.l.b16 %v380_v45  ;;  %v516_v57 = vld [vmem:[%s874_s12 + $0xc] sm:$0x7]  ;;  %v381_v42 = vld [vmem:[%s874_s12 + $0x8] sm:$0x7] }
  0x16   : > { %253 = vrot.lane.b32.xlu2 %v252_v27, %s846_s13  ;;  %v390_v47 = vpack.c.b16 %v389_v44, %v389_v44  ;;  %v522_v50 = vunpack.c.l.b16 %v515_v48  ;;  %v413_v52 = vunpack.c.l.b16 %v378_v51  ;;  %v551_v60 = vunpack.c.l.b16 %v516_v57 }
  0x17   : > { %v419_v49 = vpack.c.b16 %v418_v46, %v418_v46  ;;  %v203_v61 = vand.u32 %v919_v59, %v128_v58  ;;  %v222_v2 = vand.u32 %v919_v59, %v129_v0  ;;  %v466_v46 = vunpack.c.l.b16 %v381_v42 }
  0x18   : > { %775 = vmatmul.msk.bf16.vlgmr.msra.gmra.mxu0 %vm130_vm0, %v124_v4  ;;  %776 = vmatmul.msk.bf16.vlgmr.msra.gmra.mxu1 %vm130_vm0, %v125_v5  ;;  %v523_v53 = vpack.c.b16 %v522_v50, %v522_v50  ;;  %v414_v54 = vpack.c.b16 %v413_v52, %v413_v52  ;;  %v552_v62 = vpack.c.b16 %v551_v60, %v551_v60  ;;  %v243_v50 = vld [vmem:[%s874_s12 + $0x8] sm:$0x7] }
  0x19   : > { %212 = vmatpush.bf16.msra.mxu2 %v203_v61  ;;  %231 = vmatpush.bf16.msra.mxu3 %v222_v2  ;;  %v328_v51 = vunpack.c.l.b16 %v243_v50 }
  0x1e   : > { %248 = vrot.lane.b32.xlu2 %v247_v33, %s846_s13 }
  0x26   : > { %277 = vrot.lane.b32.xlu2 %v276_v39, %s846_s13 }
  0x2e   : > { %386 = vrot.lane.b32.xlu2 %v385_v43, %s848_s15 }
  0x36   : > { %420 = vrot.lane.b32.xlu2 %v419_v49, %s848_s15 }
  0x3e   : > { %415 = vrot.lane.b32.xlu2 %v414_v54, %s848_s15  ;;  %v244_v54 = vld [vmem:[%s874_s12 + $0x14] sm:$0x7] }
  0x3f   : > { %v352_v55 = vunpack.c.l.b16 %v244_v54 }
  0x41   : > { %v353_v56 = vpack.c.b16 %v352_v55, %v352_v55 }
  0x46   : > { %553 = vrot.lane.b32.xlu2 %v552_v62, %s847_s14 }
  0x70   : > { %v254_v63 = vpop.permute.xlu2 %253 }
  0x71   : > { %v259_v1 = vsel %vm130_vm0, %v254_v63, 0 }
  0x72   : > { %268 = vmatpush.bf16.xpose.msrb.mxu2 %v259_v1 }
  0x78   : > { %v249_v3 = vpop.permute.xlu2 %248 }
  0x95   : > { %v146_v6 = vpop.f32.mrf.mxu0  ;;  %v165_v7 = vpop.f32.mrf.mxu1 }
  0x96   : > { %v170_v8 = vsel %vm169_vm1, %v146_v6, -inf  ;;  %v173_v9 = vsel %vm169_vm1, %v165_v7, -inf }
  0x97   : > { %171 = vmax.xlane.f32.xlu0 %v170_v8 }
  0x9d   : > { %v148_v10 = vpop.f32.mrf.mxu0  ;;  %v167_v11 = vpop.f32.mrf.mxu1 }
  0x9f   : > { %174 = vmax.xlane.f32.xlu0 %v173_v9 }
  0xb3   : > { %282 = vrot.lane.b32.xlu0 %v281_v14, %s846_s13 }
  0xbb   : > { %529 = vrot.lane.b32.xlu0 %v528_v30, %s847_s14 }
  0xc3   : > { %558 = vrot.lane.b32.xlu0 %v557_v38, %s847_s14 }
 0x10a   : > { %v172_v15 = vpop.xlane.xlu0 %171 }
 0x10b   : > { %v176_v16 = vsub.f32 %v146_v6, %v172_v15  ;;  %v278_v6 = vpop.permute.xlu2 %277 }
 0x10d   : > { %v178_v17 = vmul.f32 1.442695, %v176_v16 }
 0x10f   : > { %806 = vpow2.f32 %v178_v17 }
 0x112   : > { %v175_v18 = vpop.xlane.xlu0 %174 }
 0x113   : > { %v177_v19 = vsub.f32 %v165_v7, %v175_v18  ;;  %v387_v8 = vpop.permute.xlu2 %386 }
 0x115   : > { %v888_v20 = vpop.eup %806  ;;  %v180_v21 = vmul.f32 1.442695, %v177_v19 }
 0x116   : > { %v182_v22 = vsel %vm169_vm1, %v888_v20, 0.0 }
 0x117   : > { %808 = vpow2.f32 %v180_v21  ;;  %183 = vadd.xlane.f32.xlu1 %v182_v22 }
 0x11b   : > { %v421_v14 = vpop.permute.xlu2 %420 }
 0x11c   : > { %v426_v17 = vsel %vm130_vm0, %v421_v14, 0 }
 0x11d   : > { %v896_v31 = vpop.eup %808 }
 0x11e   : > { %v185_v32 = vsel %vm169_vm1, %v896_v31, 0.0 }
 0x11f   : > { %186 = vadd.xlane.f32.xlu1 %v185_v32 }
 0x123   : > { %v416_v24 = vpop.permute.xlu2 %415 }
 0x125   : > { %v283_v4 = vpop.permute.xlu0 %282 }
 0x126   : > { %v288_v5 = vsel %vm130_vm0, %v283_v4, 0 }
 0x127   : > { %297 = vmatpush.bf16.xpose.msrb.mxu3 %v288_v5 }
 0x12b   : > { %v554_v26 = vpop.permute.xlu2 %553 }
 0x12d   : > { %v530_v18 = vpop.permute.xlu0 %529 }
 0x12e   : > { %v535_v21 = vsel %vm130_vm0, %v530_v18, 0  ;;  %v519_v18 = vld [vmem:[%s874_s12 + $0x8] sm:$0x7] }
 0x135   : > { %v559_v19 = vpop.permute.xlu0 %558 }
 0x136   : > { %v564_v23 = vsel %vm130_vm0, %v559_v19, 0 }
 0x138   : > { %391 = vrot.lane.b32.xlu1 %v390_v47, %s848_s15  ;;  %v467_v47 = vpack.c.b16 %v466_v46, %v466_v46 }
 0x140   : > { %524 = vrot.lane.b32.xlu1 %v523_v53, %s847_s14  ;;  %v329_v53 = vpack.c.b16 %v328_v51, %v328_v51 }
 0x18a   : > { %v184_v7 = vpop.xlane.xlu1 %183 }
 0x18b   : > { %810 = vrcp.f32 %v184_v7 }
 0x191   : > { %v811_v9 = vpop.eup %810 }
 0x192   : > { %v187_v10 = vpop.xlane.xlu1 %186  ;;  %v190_v11 = vmul.f32 %v811_v9, %v888_v20 }
 0x193   : > { %812 = vrcp.f32 %v187_v10 }
 0x194   : > { %v192_v12 = vpack.c.bf16 %v190_v11, %v190_v11 }
 0x196   : > { %777 = vmatmul.msk.bf16.vlgmr.msra.gmra.mxu2 %vm194_vm4, %v192_v12  ;;  %v382_v12 = vld [vmem:[%s874_s12 + $0x14] sm:$0x7] }
 0x197   : > { %v490_v14 = vunpack.c.l.b16 %v382_v12 }
 0x199   : > { %v813_v13 = vpop.eup %812 }
 0x19a   : > { %v191_v15 = vmul.f32 %v813_v13, %v896_v31 }
 0x19c   : > { %v193_v16 = vpack.c.bf16 %v191_v15, %v191_v15  ;;  %v491_v15 = vpack.c.b16 %v490_v14, %v490_v14 }
 0x19e   : > { %778 = vmatmul.msk.bf16.vlgmr.msra.gmra.mxu3 %vm194_vm4, %v193_v16 }
 0x19f   : > { %435 = vmatpush.bf16.xpose.msra.mxu3 %v426_v17 }
 0x1a6   : > { %779 = vmatmul.msk.bf16.vlgmr.msrb.gmra.mxu2 %vm130_vm0, %v249_v3 }
 0x1aa   : > { %v392_v20 = vpop.permute.xlu1 %391 }
 0x1ab   : > { %v397_v22 = vsel %vm130_vm0, %v392_v20, 0  ;;  %v604_v20 = vunpack.c.l.b16 %v519_v18 }
 0x1ac   : > { %406 = vmatpush.bf16.xpose.msra.mxu2 %v397_v22 }
 0x1ae   : > { %780 = vmatmul.msk.bf16.vlgmr.msrb.gmra.mxu3 %vm130_vm0, %v278_v6 }
 0x1af   : > { %573 = vmatpush.bf16.xpose.msrb.mxu3 %v564_v23 }
 0x1b2   : > { %v525_v25 = vpop.permute.xlu1 %524 }
 0x1b4   : > { %544 = vmatpush.bf16.xpose.msrb.mxu2 %v535_v21  ;;  %v605_v21 = vpack.c.b16 %v604_v20, %v604_v20 }
 0x1b6   : > { %783 = vmatmul.msk.bf16.vlgmr.msra.gmra.mxu2 %vm130_vm0, %v387_v8 }
 0x1be   : > { %784 = vmatmul.msk.bf16.vlgmr.msra.gmra.mxu3 %vm130_vm0, %v416_v24 }
 0x1c6   : > { %787 = vmatmul.msk.bf16.vlgmr.msrb.gmra.mxu2 %vm130_vm0, %v525_v25 }
 0x1ce   : > { %788 = vmatmul.msk.bf16.vlgmr.msrb.gmra.mxu3 %vm130_vm0, %v554_v26  ;;  %v520_v26 = vld [vmem:[%s874_s12 + $0x14] sm:$0x7] }
 0x219   : > { %v941_v27 = vpop.f32.mrf.mxu2 }
 0x221   : > { %v216_v28 = vpop.f32.mrf.mxu2  ;;  %v943_v29 = vpop.f32.mrf.mxu3 }
 0x222   : > { %v628_v28 = vunpack.c.l.b16 %v520_v26 }
 0x229   : > { %v235_v30 = vpop.f32.mrf.mxu3  ;;  %v270_v31 = vpop.f32.mrf.mxu2 }
 0x22a   : > { %v303_v32 = vsel %vm169_vm1, %v270_v31, -inf  ;;  %v629_v30 = vpack.c.b16 %v628_v28, %v628_v28 }
 0x22b   : > { %304 = vmax.xlane.f32.xlu1 %v303_v32 }
 0x231   : > { %v272_v33 = vpop.f32.mrf.mxu2  ;;  %v299_v34 = vpop.f32.mrf.mxu3 }
 0x232   : > { %v306_v35 = vsel %vm169_vm1, %v299_v34, -inf }
 0x233   : > { %307 = vmax.xlane.f32.xlu0 %v306_v35 }
 0x239   : > { %v301_v36 = vpop.f32.mrf.mxu3  ;;  %v408_v37 = vpop.f32.mrf.mxu2 }
 0x23a   : > { %v441_v38 = vsel %vm169_vm1, %v408_v37, -inf }
 0x23b   : > { %442 = vmax.xlane.f32.xlu2 %v441_v38 }
 0x241   : > { %v410_v39 = vpop.f32.mrf.mxu2  ;;  %v437_v40 = vpop.f32.mrf.mxu3 }
 0x242   : > { %v444_v41 = vsel %vm169_vm1, %v437_v40, -inf }
 0x243   : > { %445 = vmax.xlane.f32.xlu1 %v444_v41 }
 0x249   : > { %v950_v43 = vpop.f32.mrf.mxu2  ;;  %v439_v44 = vpop.f32.mrf.mxu3 }
 0x24a   : > { %v579_v45 = vsel %vm169_vm1, %v950_v43, -inf }
 0x24b   : > { %580 = vmax.xlane.f32.xlu0 %v579_v45 }
 0x251   : > { %v548_v48 = vpop.f32.mrf.mxu2  ;;  %v954_v49 = vpop.f32.mrf.mxu3 }
 0x252   : > { %v582_v57 = vsel %vm169_vm1, %v954_v49, -inf }
 0x253   : > { %468 = vrot.lane.b32.xlu2 %v467_v47, %s848_s15 }
 0x259   : > { %v577_v52 = vpop.f32.mrf.mxu3 }
 0x25c   : > { %354 = vrot.lane.b32.xlu1 %v353_v56, %s846_s13 }
 0x25f   : > { %330 = vrot.lane.b32.xlu0 %v329_v53, %s846_s13 }
 0x27c   : > { %583 = vmax.xlane.f32.xlu2 %v582_v57 }
 0x29e   : > { %v305_v58 = vpop.xlane.xlu1 %304 }
 0x29f   : > { %v309_v60 = vsub.f32 %v270_v31, %v305_v58 }
 0x2a1   : > { %v311_v61 = vmul.f32 1.442695, %v309_v60 }
 0x2a3   : > { %814 = vpow2.f32 %v311_v61 }
 0x2a6   : > { %v308_v62 = vpop.xlane.xlu0 %307 }
 0x2a7   : > { %v310_v63 = vsub.f32 %v299_v34, %v308_v62 }
 0x2a9   : > { %v815_v0 = vpop.eup %814  ;;  %v313_v1 = vmul.f32 1.442695, %v310_v63 }
 0x2aa   : > { %v315_v2 = vsel %vm169_vm1, %v815_v0, 0.0 }
 0x2ab   : > { %816 = vpow2.f32 %v313_v1  ;;  %316 = vadd.xlane.f32.xlu1 %v315_v2 }
 0x2ae   : > { %v443_v3 = vpop.xlane.xlu2 %442 }
 0x2af   : > { %v447_v4 = vsub.f32 %v408_v37, %v443_v3 }
 0x2b1   : > { %v817_v5 = vpop.eup %816  ;;  %v449_v6 = vmul.f32 1.442695, %v447_v4 }
 0x2b2   : > { %v318_v7 = vsel %vm169_vm1, %v817_v5, 0.0 }
 0x2b3   : > { %818 = vpow2.f32 %v449_v6  ;;  %319 = vadd.xlane.f32.xlu2 %v318_v7 }
 0x2b6   : > { %v446_v8 = vpop.xlane.xlu1 %445  ;;  %v469_v22 = vpop.permute.xlu2 %468 }
 0x2b7   : > { %v448_v9 = vsub.f32 %v437_v40, %v446_v8  ;;  %v474_v25 = vand.u32 %v469_v22, %v919_v59 }
 0x2b9   : > { %v819_v10 = vpop.eup %818  ;;  %v451_v11 = vmul.f32 1.442695, %v448_v9 }
 0x2ba   : > { %v453_v13 = vsel %vm169_vm1, %v819_v10, 0.0 }
 0x2bb   : > { %820 = vpow2.f32 %v451_v11  ;;  %454 = vadd.xlane.f32.xlu2 %v453_v13 }
 0x2be   : > { %v581_v19 = vpop.xlane.xlu0 %580 }
 0x2bf   : > { %v585_v33 = vsub.f32 %v950_v43, %v581_v19 }
 0x2c1   : > { %v821_v16 = vpop.eup %820  ;;  %v587_v34 = vmul.f32 1.442695, %v585_v33 }
 0x2c2   : > { %v456_v17 = vsel %vm169_vm1, %v821_v16, 0.0 }
 0x2c3   : > { %457 = vadd.xlane.f32.xlu0 %v456_v17  ;;  %822 = vpow2.f32 %v587_v34 }
 0x2c4   : > { %492 = vrot.lane.b32.xlu1 %v491_v15, %s848_s15 }
 0x2c9   : > { %v823_v35 = vpop.eup %822 }
 0x2ca   : > { %v591_v36 = vsel %vm169_vm1, %v823_v35, 0.0 }
 0x2ce   : > { %v355_v31 = vpop.permute.xlu1 %354 }
 0x2cf   : > { %v360_v32 = vand.u32 %v355_v31, %v919_v59 }
 0x2d1   : > { %v331_v23 = vpop.permute.xlu0 %330  ;;  %369 = vmatpush.bf16.msrb.mxu1 %v360_v32 }
 0x2d2   : > { %v336_v24 = vand.u32 %v331_v23, %v919_v59 }
 0x2d3   : > { %606 = vrot.lane.b32.xlu2 %v605_v21, %s847_s14 }
 0x2d4   : > { %345 = vmatpush.bf16.msrb.mxu0 %v336_v24 }
 0x2d7   : > { %630 = vrot.lane.b32.xlu0 %v629_v30, %s847_s14 }
 0x2d8   : > { %483 = vmatpush.bf16.msra.mxu0 %v474_v25 }
 0x2ee   : > { %592 = vadd.xlane.f32.xlu1 %v591_v36 }
 0x2ef   : > { %v584_v37 = vpop.xlane.xlu2 %583 }
 0x2f0   : > { %v586_v38 = vsub.f32 %v954_v49, %v584_v37 }
 0x2f2   : > { %v589_v39 = vmul.f32 1.442695, %v586_v38 }
 0x2f4   : > { %824 = vpow2.f32 %v589_v39 }
 0x2fa   : > { %v825_v40 = vpop.eup %824 }
 0x2fb   : > { %v594_v41 = vsel %vm169_vm1, %v825_v40, 0.0 }
 0x2fc   : > { %595 = vadd.xlane.f32.xlu2 %v594_v41 }
 0x31e   : > { %v317_v42 = vpop.xlane.xlu1 %316 }
 0x31f   : > { %826 = vrcp.f32 %v317_v42  ;;  %v237_v42 = vpack.c.bf16 %v941_v27, %v941_v27  ;;  %v238_v27 = vpack.c.bf16 %v943_v29, %v943_v29 }
 0x325   : > { %v827_v44 = vpop.eup %826 }
 0x326   : > { %v323_v45 = vmul.f32 %v827_v44, %v815_v0  ;;  %v320_v43 = vpop.xlane.xlu2 %319 }
 0x327   : > { %828 = vrcp.f32 %v320_v43  ;;  %v704_v43 = vld [vmem:[%s121_s19] sm:$0x7] }
 0x328   : > { %v325_v46 = vpack.c.bf16 %v323_v45, %v323_v45 }
 0x32a   : > { %781 = vmatmul.msk.bf16.vlgmr.msrb.gmra.mxu0 %vm194_vm4, %v325_v46 }
 0x32d   : > { %v829_v47 = vpop.eup %828 }
 0x32e   : > { %v324_v48 = vmul.f32 %v829_v47, %v817_v5  ;;  %v455_v50 = vpop.xlane.xlu2 %454 }
 0x32f   : > { %830 = vrcp.f32 %v455_v50 }
 0x330   : > { %v326_v49 = vpack.c.bf16 %v324_v48, %v324_v48 }
 0x332   : > { %782 = vmatmul.msk.bf16.vlgmr.msrb.gmra.mxu1 %vm194_vm4, %v326_v49 }
 0x335   : > { %v831_v51 = vpop.eup %830 }
 0x336   : > { %v461_v52 = vmul.f32 %v831_v51, %v819_v10  ;;  %v607_v53 = vpop.permute.xlu2 %606  ;;  %v458_v54 = vpop.xlane.xlu0 %457 }
 0x337   : > { %v612_v55 = vand.u32 %v607_v53, %v919_v59  ;;  %832 = vrcp.f32 %v458_v54  ;;  %v493_v56 = vpop.permute.xlu1 %492 }
 0x338   : > { %v463_v57 = vpack.c.bf16 %v461_v52, %v461_v52  ;;  %v498_v58 = vand.u32 %v493_v56, %v919_v59  ;;  %v707_v56 = vld [vmem:[%s121_s19 + $0x4] sm:$0x7] }
 0x339   : > { %621 = vmatpush.bf16.msrb.mxu0 %v612_v55 }
 0x33a   : > { %785 = vmatmul.msk.bf16.vlgmr.msra.gmra.mxu0 %vm194_vm4, %v463_v57  ;;  %507 = vmatpush.bf16.msra.mxu1 %v498_v58 }
 0x33d   : > { %v833_v60 = vpop.eup %832 }
 0x33e   : > { %v462_v61 = vmul.f32 %v833_v60, %v821_v16 }
 0x340   : > { %v464_v62 = vpack.c.bf16 %v462_v61, %v462_v61 }
 0x342   : > { %786 = vmatmul.msk.bf16.vlgmr.msra.gmra.mxu1 %vm194_vm4, %v464_v62 }
 0x349   : > { %v631_v63 = vpop.permute.xlu0 %630 }
 0x34a   : > { %v636_v0 = vand.u32 %v631_v63, %v919_v59 }
 0x34c   : > { %645 = vmatpush.bf16.msrb.mxu1 %v636_v0 }
 0x361   : > { %v593_v1 = vpop.xlane.xlu1 %592 }
 0x362   : > { %834 = vrcp.f32 %v593_v1 }
 0x368   : > { %v835_v2 = vpop.eup %834 }
 0x369   : > { %v599_v3 = vmul.f32 %v835_v2, %v823_v35 }
 0x36b   : > { %v601_v4 = vpack.c.bf16 %v599_v3, %v599_v3 }
 0x36d   : > { %789 = vmatmul.msk.bf16.vlgmr.msrb.gmra.mxu0 %vm194_vm4, %v601_v4 }
 0x36f   : > { %v596_v5 = vpop.xlane.xlu2 %595 }
 0x370   : > { %836 = vrcp.f32 %v596_v5 }
 0x376   : > { %v837_v6 = vpop.eup %836 }
 0x377   : > { %v600_v7 = vmul.f32 %v837_v6, %v825_v40 }
 0x379   : > { %v602_v8 = vpack.c.bf16 %v600_v7, %v600_v7 }
 0x37b   : > { %790 = vmatmul.msk.bf16.vlgmr.msrb.gmra.mxu1 %vm194_vm4, %v602_v8 }
 0x3a7   : > { %v347_v9 = vpop.f32.mrf.mxu0 }
 0x3a8   : > { %v375_v10 = vpack.c.bf16 %v347_v9, %v347_v9 }
 0x3aa   : > { %v655_v11 = vunpack.c.l.b16 %v375_v10 }
 0x3ac   : > { %v657_v12 = vpack.c.b16 %v655_v11, %v655_v11 }
 0x3ae   : > { %659 = vrot.lane.b32.xlu1 %v657_v12, %s847_s14 }
 0x3af   : > { %v349_v59 = vpop.f32.mrf.mxu0  ;;  %v371_v13 = vpop.f32.mrf.mxu1 }
 0x3b0   : > { %v376_v14 = vpack.c.bf16 %v371_v13, %v371_v13 }
 0x3b2   : > { %v656_v15 = vunpack.c.l.b16 %v376_v14 }
 0x3b4   : > { %v658_v16 = vpack.c.b16 %v656_v15, %v656_v15 }
 0x3b6   : > { %661 = vrot.lane.b32.xlu2 %v658_v16, %s847_s14 }
 0x3b7   : > { %v373_v17 = vpop.f32.mrf.mxu1  ;;  %v485_v18 = vpop.f32.mrf.mxu0 }
 0x3b8   : > { %v513_v19 = vpack.c.bf16 %v485_v18, %v485_v18 }
 0x3ba   : > { %v665_v20 = vunpack.c.l.b16 %v513_v19 }
 0x3bc   : > { %v667_v21 = vpack.c.b16 %v665_v20, %v665_v20 }
 0x3be   : > { %669 = vrot.lane.b32.xlu0 %v667_v21, %s848_s15 }
 0x3bf   : > { %v487_v22 = vpop.f32.mrf.mxu0  ;;  %v509_v23 = vpop.f32.mrf.mxu1 }
 0x3c0   : > { %v514_v30 = vpack.c.bf16 %v509_v23, %v509_v23 }
 0x3c2   : > { %v666_v33 = vunpack.c.l.b16 %v514_v30 }
 0x3c4   : > { %v668_v34 = vpack.c.b16 %v666_v33, %v666_v33 }
 0x3c7   : > { %v511_v24 = vpop.f32.mrf.mxu1 }
 0x3ea   : > { %v623_v25 = vpop.f32.mrf.mxu0 }
 0x3eb   : > { %v651_v26 = vpack.c.bf16 %v623_v25, %v623_v25 }
 0x3ed   : > { %v675_v28 = vunpack.c.l.b16 %v651_v26 }
 0x3ef   : > { %v677_v31 = vpack.c.b16 %v675_v28, %v675_v28 }
 0x3f1   : > { %679 = vrot.lane.b32.xlu0 %v677_v31, %s846_s13 }
 0x3f2   : > { %v625_v32 = vpop.f32.mrf.mxu0 }
 0x3f8   : > { %v647_v35 = vpop.f32.mrf.mxu1 }
 0x3f9   : > { %v652_v36 = vpack.c.bf16 %v647_v35, %v647_v35  ;;  %671 = vrot.lane.b32.xlu0 %v668_v34, %s848_s15 }
 0x3fb   : > { %v676_v37 = vunpack.c.l.b16 %v652_v36 }
 0x3fd   : > { %v678_v38 = vpack.c.b16 %v676_v37, %v676_v37 }
 0x3ff   : > { %681 = vrot.lane.b32.xlu1 %v678_v38, %s846_s13 }
 0x400   : > { %v649_v39 = vpop.f32.mrf.mxu1 }
 0x410   : > { %v662_v49 = vpop.permute.xlu2 %661 }
 0x411   : > { %v688_v52 = vsel %vm130_vm0, %v238_v27, %v662_v49 }
 0x420   : > { %v660_v41 = vpop.permute.xlu1 %659 }
 0x421   : > { %v685_v44 = vsel %vm130_vm0, %v237_v42, %v660_v41 }
 0x430   : > { %v670_v40 = vpop.permute.xlu0 %669 }
 0x431   : > { %v691_v46 = vsel %vm689_vm6, %v685_v44, %v670_v40 }
 0x463   : > { %v680_v47 = vpop.permute.xlu0 %679 }
 0x464   : > { %v696_v48 = vsel %vm694_vm7, %v691_v46, %v680_v47 }
 0x465   : > { %v705_v50 = vsel %vm1003_vm8, %v696_v48, %v704_v43 }
 0x466   : > { %706 = vst [vmem:[%s121_s19] sm:$0x7] %v705_v50 }
 0x46b   : > { %v672_v51 = vpop.permute.xlu0 %671 }
 0x46c   : > { %v693_v53 = vsel %vm689_vm6, %v688_v52, %v672_v51 }
 0x471   : > { %v682_v54 = vpop.permute.xlu1 %681 }
 0x472   : > { %v699_v55 = vsel %vm694_vm7, %v693_v53, %v682_v54 }
 0x473   : > { %v708_v57 = vsel %vm1003_vm8, %v699_v55, %v707_v56 }
 0x474   : > { %709 = vst [vmem:[%s121_s19 + $0x4] sm:$0x7] %v708_v57 }
 0x475 PF: > { %s11_s6 = sadd.s32 1, %s844_s6  }
 0x476   : > { %p8_p4 = scmp.ge.s32.totalorder %s11_s6, 4  }
 0x478   :  { %10 = sbr.rel (!%p8_p4) target bundleno = 1 (0x1), region = 54 }

// kernel: evl_forward.34
= control target key start
LH: loop header
LB: loop body
LE: loop exit
PB: predicated region body
PF: predicated region fallthrough
CT: control target
= control target key end

     0   :  { %s293_s1 = inlined_call_operand.vmem [shape: bf16[128,128], index: 1, kind: input, shape index: {}]   ;;  %s294_s2 = inlined_call_operand.vmem [shape: f32[1,128], index: 2, kind: input, shape index: {}]   ;;  %s295_s0 = inlined_call_operand.vmem [shape: bf16[24,128], index: 0, kind: input, shape index: {}]   ;;  %s296_s3 = inlined_call_operand.vmem [shape: bf16[24,128], index: 3, kind: input, shape index: {}]   ;;  %s297_s4 = inlined_call_operand.vmem [shape: bf16[24,128], index: 4, kind: output, shape index: {}]  }
   0x1   :  { %v204_v0 = vld [vmem:[%s293_s1 + $0x38] sm:$0xff]  ;;  %v203_v1 = vld [vmem:[%s293_s1 + $0x30] sm:$0xff]  ;;  %v202_v2 = vld [vmem:[%s293_s1 + $0x28] sm:$0xff] }
   0x2   :  { %104 = vmatpush.bf16.msra.mxu0 %v204_v0  ;;  %214 = vmatpush.bf16.msra.mxu1 %v204_v0  ;;  %v201_v3 = vld [vmem:[%s293_s1 + $0x20] sm:$0xff]  ;;  %v200_v4 = vld [vmem:[%s293_s1 + $0x18] sm:$0xff]  ;;  %v199_v5 = vld [vmem:[%s293_s1 + $0x10] sm:$0xff] }
   0x3   :  { %v198_v6 = vld [vmem:[%s293_s1 + $0x8] sm:$0xff]  ;;  %v197_v9 = vld [vmem:[%s293_s1] sm:$0xff] }
   0x4   :  { %v29_v7 = vld [vmem:[%s295_s0 + $0x8] sm:$0xf]  ;;  %v196_v10 = vld [vmem:[%s295_s0] sm:$0xff] }
   0x5   :  { %v51_v8 = vunpack.c.l.b16 %v29_v7  ;;  %v143_v12 = vld [vmem:[%s296_s3 + $0x8] sm:$0xf]  ;;  %v222_v13 = vld [vmem:[%s294_s2] ss:$0 sm:$0xff] }
   0x6   :  { %105 = vmatpush.bf16.msra.mxu0 %v203_v1  ;;  %215 = vmatpush.bf16.msra.mxu1 %v203_v1  ;;  %v146_v14 = vunpack.c.l.bf16 %v143_v12  ;;  %v206_v19 = vld [vmem:[%s296_s3] sm:$0xff]  }
   0x7   :  { %v53_v11 = vpack.c.b16 %v51_v8, %v51_v8  ;;  %v207_v22 = vunpack.c.l.bf16 %v206_v19  ;;  %v208_v23 = vunpack.c.h.bf16 %v206_v19 }
   0xa   :  { %106 = vmatpush.bf16.msra.mxu0 %v202_v2  ;;  %216 = vmatpush.bf16.msra.mxu1 %v202_v2 }
   0xe   :  { %107 = vmatpush.bf16.msra.mxu0 %v201_v3  ;;  %217 = vmatpush.bf16.msra.mxu1 %v201_v3 }
  0x12   :  { %108 = vmatpush.bf16.msra.mxu0 %v200_v4  ;;  %218 = vmatpush.bf16.msra.mxu1 %v200_v4 }
  0x16   :  { %109 = vmatpush.bf16.msra.mxu0 %v199_v5  ;;  %219 = vmatpush.bf16.msra.mxu1 %v199_v5 }
  0x1a   :  { %110 = vmatpush.bf16.msra.mxu0 %v198_v6  ;;  %220 = vmatpush.bf16.msra.mxu1 %v198_v6 }
  0x1e   :  { %111 = vmatpush.bf16.msra.mxu0 %v197_v9  ;;  %221 = vmatpush.bf16.msra.mxu1 %v197_v9 }
  0x21   :  { %112 = vmatmul.bf16.vlgmr.msra.gmra.mxu0 %v196_v10  ;;  %117 = vmatmul.bf16.vlgmr.msra.gmra.mxu1 %v53_v11 }
  0x9e   :  { %v113_v15 = vpop.f32.mrf.mxu0  ;;  %v118_v16 = vpop.f32.mrf.mxu1 }
  0x9f   :  { %v140_v17 = vadd.f32 %v222_v13, %v118_v16  ;;  %v138_v21 = vadd.f32 %v222_v13, %v113_v15 }
  0xa1   :  { %v149_v18 = vadd.f32 %v146_v14, %v140_v17  ;;  %v147_v27 = vadd.f32 %v207_v22, %v138_v21 }
  0xa3   :  { %v152_v20 = vpack.c.bf16 %v149_v18, %v149_v18 }
  0xa5   :  { %155 = vst [vmem:[%s297_s4 + $0x8] sm:$0xf] %v152_v20 }
  0xa6   :  { %v115_v24 = vpop.f32.mrf.mxu0  ;;  %v120_v25 = vpop.f32.mrf.mxu1 }
  0xa7   :  { %v139_v26 = vadd.f32 %v222_v13, %v115_v24 }
  0xa9   :  { %v148_v28 = vadd.f32 %v208_v23, %v139_v26 }
  0xab   :  { %v212_v29 = vpack.c.bf16 %v148_v28, %v147_v27 }
  0xad   :  { %213 = vst [vmem:[%s297_s4] sm:$0xff] %v212_v29  }

// kernel: evl_forward.35
= control target key start
LH: loop header
LB: loop body
LE: loop exit
PB: predicated region body
PF: predicated region fallthrough
CT: control target
= control target key end

     0   :  { %s1180_s18 = smov 0   ;;  %s1182_s19 = smov 0   ;;  %s1422_s0 = inlined_call_operand.vmem [shape: bf16[24,128], index: 0, kind: input, shape index: {}]   ;;  %s1423_s1 = inlined_call_operand.vmem [shape: f32[1,128], index: 1, kind: input, shape index: {}]   ;;  %s1424_s2 = inlined_call_operand.vmem [shape: f32[1,128], index: 2, kind: input, shape index: {}]   ;;  %s1425_s3 = inlined_call_operand.vmem [shape: bf16[128,512], index: 3, kind: input, shape index: {}]   ;;  %s1426_s4 = inlined_call_operand.vmem [shape: f32[1,512], index: 4, kind: input, shape index: {}]   ;;  %s1427_s5 = inlined_call_operand.vmem [shape: bf16[24,512], index: 5, kind: output, shape index: {}]  }
   0x1   :  { %s1184_s20 = smov 0   ;;  %s1186_s21 = smov 0  }
   0x2   :  { %s1188_s22 = smov 0  }
   0x3 LB: > { %s24_s23 = sadd.s32 1, %s1143_s21  ;;  %s899_s24 = sadd.s32 4294967295, %s1147_s22   ;;  %s1147_s22 = sphi %s1188_s22, %s15_s22   ;;  %s1143_s21 = sphi %s1186_s21, %s1440_s21   ;;  %s1139_s20 = sphi %s1184_s20, %s1439_s20   ;;  %s1135_s19 = sphi %s1182_s19, %s1438_s19   ;;  %s1131_s18 = sphi %s1180_s18, %s1437_s18  }
   0x4   : > { %p25_p0 = scmp.ge.s32.totalorder %s24_s23, 2  ;;  %p109_p1 = scmp.ne.s32.totalorder %s1135_s19, %s1131_s18 }
   0x5   : > { %p110_p2 = scmp.eq.s32.totalorder %s1147_s22, 0  ;;  %p167_p4 = scmp.eq.s32.totalorder %s899_s24, 1 }
   0x6   : > { %s1442_s23 = smov (%p25_p0, %s24_s23), 0  ;;  %s102_s26 = sadd.s32 1, %s1135_s19 }
   0x7   : > { %p111_p3 = por %p110_p2, %p109_p1  ;;  %s99_s25 = ssub.s32 %s1143_s21, %s1442_s23 }
   0x8   : > { %p100_p5 = scmp.eq.s32.totalorder %s99_s25, 0  ;;  %p1215_p6 = por %p167_p4, %p109_p1 }
   0x9   : > { %p903_p7 = scmp.ge.s32.totalorder %s1147_s22, 2 }
   0xa   : > { %s1220_s28 = scalar_select %p100_p5, %s1135_s19, %s102_s26  }
   0xb   : > { %204 = sbr.rel (%p903_p7) target bundleno = 36 (0x24), region = 28 }
  0x10   : > { %207 = sbr.rel (!%p111_p3) target bundleno = 36 (0x24), region = 32  ;;  %s209_s29 = sand.u32 (%p111_p3), 1, %s1135_s19  }
  0x11   : > { %s989_s30 = sshll.u32 (%p111_p3), %s1143_s21, 3  ;;  %s904_s6 = sshll.u32 (%p111_p3), %s209_s29, 7 }
  0x12   : > { %s1228_s9 = scalar_lea.vmem (%p111_p3), %s1425_s3, %s989_s30  ;;  %s211_s10 = scalar_lea.vmem (%p111_p3), [#allocation3], %s904_s6 }
  0x13   : > { %v273_v0 = vld [vmem:[%s1228_s9] sm:$0xff] (%p111_p3)  ;;  %v275_v1 = vld [vmem:[%s1228_s9 + $0x10] sm:$0xff] (%p111_p3) }
  0x14   : > { %v277_v2 = vld [vmem:[%s1228_s9 + $0x20] sm:$0xff] (%p111_p3)  ;;  %274 = vst [vmem:[%s211_s10] sm:$0xff] (%p111_p3), %v273_v0  ;;  %v279_v3 = vld [vmem:[%s1228_s9 + $0x30] sm:$0xff] (%p111_p3) }
  0x15   : > { %276 = vst [vmem:[%s211_s10 + $0x8] sm:$0xff] %v275_v1  ;;  %v281_v4 = vld [vmem:[%s1228_s9 + $0x40] sm:$0xff]  ;;  %v283_v5 = vld [vmem:[%s1228_s9 + $0x50] sm:$0xff] }
  0x16   : > { %278 = vst [vmem:[%s211_s10 + $0x10] sm:$0xff] %v277_v2  ;;  %v285_v6 = vld [vmem:[%s1228_s9 + $0x60] sm:$0xff]  ;;  %v287_v7 = vld [vmem:[%s1228_s9 + $0x70] sm:$0xff] }
  0x17   : > { %280 = vst [vmem:[%s211_s10 + $0x18] sm:$0xff] %v279_v3  ;;  %v289_v8 = vld [vmem:[%s1228_s9 + $0x80] sm:$0xff]  ;;  %v291_v9 = vld [vmem:[%s1228_s9 + $0x90] sm:$0xff] }
  0x18   : > { %282 = vst [vmem:[%s211_s10 + $0x20] sm:$0xff] %v281_v4  ;;  %v293_v10 = vld [vmem:[%s1228_s9 + $0xa0] sm:$0xff]  ;;  %v295_v11 = vld [vmem:[%s1228_s9 + $0xb0] sm:$0xff] }
  0x19   : > { %284 = vst [vmem:[%s211_s10 + $0x28] sm:$0xff] %v283_v5  ;;  %v297_v12 = vld [vmem:[%s1228_s9 + $0xc0] sm:$0xff]  ;;  %v299_v13 = vld [vmem:[%s1228_s9 + $0xd0] sm:$0xff] }
  0x1a   : > { %286 = vst [vmem:[%s211_s10 + $0x30] sm:$0xff] %v285_v6  ;;  %v301_v14 = vld [vmem:[%s1228_s9 + $0xe0] sm:$0xff]  ;;  %v303_v15 = vld [vmem:[%s1228_s9 + $0xf0] sm:$0xff] }
  0x1b   : > { %288 = vst [vmem:[%s211_s10 + $0x38] sm:$0xff] %v287_v7 }
  0x1c   : > { %290 = vst [vmem:[%s211_s10 + $0x40] sm:$0xff] %v289_v8 }
  0x1d   : > { %292 = vst [vmem:[%s211_s10 + $0x48] sm:$0xff] %v291_v9 }
  0x1e   : > { %294 = vst [vmem:[%s211_s10 + $0x50] sm:$0xff] %v293_v10 }
  0x1f   : > { %296 = vst [vmem:[%s211_s10 + $0x58] sm:$0xff] %v295_v11 }
  0x20   : > { %298 = vst [vmem:[%s211_s10 + $0x60] sm:$0xff] %v297_v12 }
  0x21   : > { %300 = vst [vmem:[%s211_s10 + $0x68] sm:$0xff] %v299_v13 }
  0x22   : > { %302 = vst [vmem:[%s211_s10 + $0x70] sm:$0xff] %v301_v14 }
  0x23   : > { %304 = vst [vmem:[%s211_s10 + $0x78] sm:$0xff] %v303_v15 }
  0x24 PF: > { %p907_p8 = scmp.ge.s32.totalorder %s1147_s22, 1  ;;  %p317_p9 = scmp.lt.s32.totalorder %s1147_s22, 3 }
  0x26   : > { %p318_p10 = pnand %p907_p8, %p317_p9 }
  0x27   : > { %s324_s11 = sand.u32 (!%p318_p10), 1, %s1131_s18   ;;  %s909_s12 = sshll.u32 (!%p318_p10), %s1139_s20, 1 }
  0x28   : > { %321 = sbr.rel (%p318_p10) target bundleno = 554 (0x22a), region = 74  ;;  %s908_s13 = sshll.u32 (!%p318_p10), %s324_s11, 7 }
  0x29   : > { %s1033_s14 = smul.u32 (!%p318_p10), 24, %s324_s11  ;;  %p367_p11 = scmp.lt.s32.totalorder (!%p318_p10), %s909_s12, 3 }
  0x2a   : > { %s1256_s24 = scalar_lea.vmem (!%p318_p10), [#allocation3], %s908_s13  ;;  %p910_p12 = scmp.ne.s32.totalorder (!%p318_p10), %s1139_s20, 0 }
  0x2b   : > { %s1258_s25 = scalar_lea.vmem (!%p318_p10), [#allocation4], %s1033_s14 }
  0x2d   : > { %s1444_s12 = smov (!%p367_p11, %s909_s12), 3  ;;  %376 = sbr.rel (%p910_p12) target bundleno = 338 (0x152), region = 82 }
  0x2e   : > { %s369_s17 = scalar_lea.vmem %s1426_s4, %s1444_s12 }
  0x32   : > { %v1009_v16 = vld [vmem:[%s1422_s0] sm:$0xff]   ;;  %v379_v17 = vld [vmem:[%s1422_s0 + $0x8] sm:$0xf]  ;;  %v1149_v21 = vmov 128.0  }
  0x33   : > { %v1010_v18 = vunpack.c.l.bf16 %v1009_v16  ;;  %v382_v19 = vunpack.c.l.bf16 %v379_v17  ;;  %v1011_v20 = vunpack.c.h.bf16 %v1009_v16  ;;  %1077 = vrcp.f32 %v1149_v21  ;;  %v1075_v62 = vld [vmem:[%s1423_s1] ss:$0 sm:$0xff] }
  0x34   : > { %v1076_v4 = vld [vmem:[%s1424_s2] ss:$0 sm:$0xff] }
  0x35   : > { %383 = vadd.xlane.f32.xlu0 %v1010_v18  ;;  %387 = vadd.xlane.f32.xlu1 %v382_v19 }
  0x39   : > { %v1078_v22 = vpop.eup %1077 }
  0x3a   : > { %v390_v23 = vmul.f32 128.0, %v1078_v22  ;;  %vm394_vm0 = vweird.f32 %v1078_v22 }
  0x3c   : > { %v391_v24 = vsub.f32 1.0, %v390_v23 }
  0x3d   : > { %385 = vadd.xlane.f32.xlu0 %v1011_v20 }
  0x3e   : > { %v392_v25 = vmul.f32 %v1078_v22, %v391_v24 }
  0x40   : > { %v393_v26 = vadd.f32 %v1078_v22, %v392_v25 }
  0x42   : > { %v395_v27 = vsel %vm394_vm0, %v1078_v22, %v393_v26 }
  0xa8   : > { %v384_v28 = vpop.xlane.xlu0 %383  ;;  %v388_v33 = vpop.xlane.xlu1 %387 }
  0xa9   : > { %v396_v29 = vmul.f32 %v395_v27, %v384_v28  ;;  %v398_v36 = vmul.f32 %v395_v27, %v388_v33 }
  0xab   : > { %v399_v30 = vsub.f32 %v1010_v18, %v396_v29  ;;  %v401_v38 = vsub.f32 %v382_v19, %v398_v36 }
  0xad   : > { %v402_v31 = vmul.f32 %v399_v30, %v399_v30  ;;  %v404_v39 = vmul.f32 %v401_v38, %v401_v38 }
  0xaf   : > { %405 = vadd.xlane.f32.xlu1 %v402_v31 }
  0xb0   : > { %v386_v32 = vpop.xlane.xlu0 %385 }
  0xb1   : > { %v397_v34 = vmul.f32 %v395_v27, %v386_v32 }
  0xb3   : > { %v400_v35 = vsub.f32 %v1011_v20, %v397_v34 }
  0xb5   : > { %v403_v37 = vmul.f32 %v400_v35, %v400_v35 }
  0xb7   : > { %407 = vadd.xlane.f32.xlu2 %v403_v37 }
  0xbf   : > { %409 = vadd.xlane.f32.xlu2 %v404_v39 }
 0x122   : > { %v406_v40 = vpop.xlane.xlu1 %405 }
 0x123   : > { %v411_v41 = vmul.f32 %v406_v40, %v395_v27 }
 0x125   : > { %v414_v42 = vadd.f32 1e-05, %v411_v41 }
 0x127   : > { %1079 = vrsqrt.f32 %v414_v42  ;;  %vm423_vm2 = vweird.f32 %v414_v42 }
 0x12a   : > { %v408_v43 = vpop.xlane.xlu2 %407 }
 0x12b   : > { %v412_v44 = vmul.f32 %v408_v43, %v395_v27 }
 0x12d   : > { %v1080_v45 = vpop.eup %1079  ;;  %v415_v46 = vadd.f32 1e-05, %v412_v44 }
 0x12e   : > { %v418_v47 = vmul.f32 %v1080_v45, %v414_v42  ;;  %vm424_vm1 = vweird.f32 %v1080_v45 }
 0x12f   : > { %1081 = vrsqrt.f32 %v415_v46  ;;  %vm425_vm3 = vmor %vm423_vm2, %vm424_vm1  ;;  %vm433_vm5 = vweird.f32 %v415_v46 }
 0x130   : > { %v419_v48 = vmul.f32 %v1080_v45, %v418_v47 }
 0x132   : > { %v420_v49 = vmul.f32 0.5, %v419_v48  ;;  %v410_v50 = vpop.xlane.xlu2 %409 }
 0x133   : > { %v413_v51 = vmul.f32 %v410_v50, %v395_v27 }
 0x134   : > { %v421_v52 = vsub.f32 1.5, %v420_v49 }
 0x135   : > { %v1082_v53 = vpop.eup %1081  ;;  %v416_v54 = vadd.f32 1e-05, %v413_v51 }
 0x136   : > { %v422_v55 = vmul.f32 %v1080_v45, %v421_v52  ;;  %v428_v56 = vmul.f32 %v1082_v53, %v415_v46  ;;  %vm434_vm4 = vweird.f32 %v1082_v53 }
 0x137   : > { %1083 = vrsqrt.f32 %v416_v54  ;;  %vm435_vm6 = vmor %vm433_vm5, %vm434_vm4  ;;  %vm443_vm8 = vweird.f32 %v416_v54 }
 0x138   : > { %v429_v57 = vmul.f32 %v1082_v53, %v428_v56  ;;  %v426_v58 = vsel %vm425_vm3, %v1080_v45, %v422_v55 }
 0x139   : > { %v447_v63 = vmul.f32 %v426_v58, %v399_v30 }
 0x13a   : > { %v430_v59 = vmul.f32 0.5, %v429_v57 }
 0x13b   : > { %v454_v5 = vmul.f32 %v1075_v62, %v447_v63 }
 0x13c   : > { %v431_v60 = vsub.f32 1.5, %v430_v59 }
 0x13d   : > { %v1084_v61 = vpop.eup %1083  ;;  %v461_v10 = vadd.f32 %v1076_v4, %v454_v5 }
 0x13e   : > { %v432_v0 = vmul.f32 %v1082_v53, %v431_v60  ;;  %v438_v1 = vmul.f32 %v1084_v61, %v416_v54  ;;  %vm444_vm7 = vweird.f32 %v1084_v61 }
 0x13f   : > { %vm445_vm9 = vmor %vm443_vm8, %vm444_vm7 }
 0x140   : > { %v436_v2 = vsel %vm435_vm6, %v1082_v53, %v432_v0  ;;  %v439_v3 = vmul.f32 %v1084_v61, %v438_v1 }
 0x141   : > { %v448_v6 = vmul.f32 %v436_v2, %v400_v35 }
 0x142   : > { %v440_v7 = vmul.f32 0.5, %v439_v3 }
 0x143   : > { %v455_v8 = vmul.f32 %v1075_v62, %v448_v6 }
 0x144   : > { %v441_v9 = vsub.f32 1.5, %v440_v7 }
 0x145   : > { %v462_v11 = vadd.f32 %v1076_v4, %v455_v8 }
 0x146   : > { %v442_v12 = vmul.f32 %v1084_v61, %v441_v9 }
 0x147   : > { %v1015_v13 = vpack.c.bf16 %v462_v11, %v461_v10 }
 0x148   : > { %v446_v14 = vsel %vm445_vm9, %v1084_v61, %v442_v12 }
 0x149   : > { %1016 = vst [vmem:[#allocation2] sm:$0xff] %v1015_v13   ;;  %v449_v15 = vmul.f32 %v446_v14, %v401_v38 }
 0x14b   : > { %v456_v16 = vmul.f32 %v1075_v62, %v449_v15 }
 0x14d   : > { %v463_v17 = vadd.f32 %v1076_v4, %v456_v16 }
 0x14f   : > { %v466_v18 = vpack.c.bf16 %v463_v17, %v463_v17 }
 0x151   : > { %469 = vst [vmem:[#allocation2 + $0x8] sm:$0xf] %v466_v18 }
 0x152 PF: > { %v973_v19 = vld [vmem:[%s1256_s24 + $0x70] sm:$0xf]  ;;  %v1006_v20 = vld [vmem:[%s1256_s24 + $0x74] sm:$0xf0]  ;;  %v1005_v21 = vld [vmem:[%s1256_s24 + $0x74] sm:$0xf] }
 0x153   : > { %v974_v22 = vor.u32 %v1006_v20, %v973_v19  ;;  %v975_v23 = vld [vmem:[%s1256_s24 + $0x78] sm:$0xf0]  ;;  %v965_v24 = vld [vmem:[%s1256_s24 + $0x60] sm:$0xf]  ;;  %v1004_v25 = vld [vmem:[%s1256_s24 + $0x64] sm:$0xf0] }
 0x154   : > { %v978_v26 = vor.u32 %v1005_v21, %v975_v23  ;;  %v1003_v27 = vld [vmem:[%s1256_s24 + $0x64] sm:$0xf]  ;;  %v967_v28 = vld [vmem:[%s1256_s24 + $0x68] sm:$0xf0]  ;;  %v966_v29 = vor.u32 %v1004_v25, %v965_v24  ;;  %v957_v31 = vld [vmem:[%s1256_s24 + $0x50] sm:$0xf] }
 0x155   : > { %585 = vmatpush.bf16.msra.mxu0 %v974_v22  ;;  %1017 = vmatpush.bf16.msra.mxu2 %v974_v22  ;;  %v970_v30 = vor.u32 %v1003_v27, %v967_v28  ;;  %v1002_v32 = vld [vmem:[%s1256_s24 + $0x54] sm:$0xf0]  ;;  %v1001_v33 = vld [vmem:[%s1256_s24 + $0x54] sm:$0xf]  ;;  %v959_v34 = vld [vmem:[%s1256_s24 + $0x58] sm:$0xf0] }
 0x156   : > { %603 = vmatpush.bf16.msra.mxu1 %v978_v26  ;;  %1025 = vmatpush.bf16.msra.mxu3 %v978_v26  ;;  %v958_v35 = vor.u32 %v1002_v32, %v957_v31  ;;  %v962_v36 = vor.u32 %v1001_v33, %v959_v34  ;;  %v949_v37 = vld [vmem:[%s1256_s24 + $0x40] sm:$0xf]  ;;  %v1000_v38 = vld [vmem:[%s1256_s24 + $0x44] sm:$0xf0]  ;;  %v999_v39 = vld [vmem:[%s1256_s24 + $0x44] sm:$0xf] }
 0x157   : > { %v951_v40 = vld [vmem:[%s1256_s24 + $0x48] sm:$0xf0]  ;;  %v950_v41 = vor.u32 %v1000_v38, %v949_v37  ;;  %v941_v43 = vld [vmem:[%s1256_s24 + $0x30] sm:$0xf]  ;;  %v998_v44 = vld [vmem:[%s1256_s24 + $0x34] sm:$0xf0] }
 0x158   : > { %v954_v42 = vor.u32 %v999_v39, %v951_v40  ;;  %v997_v45 = vld [vmem:[%s1256_s24 + $0x34] sm:$0xf]  ;;  %v943_v46 = vld [vmem:[%s1256_s24 + $0x38] sm:$0xf0]  ;;  %v942_v47 = vor.u32 %v998_v44, %v941_v43  ;;  %v933_v49 = vld [vmem:[%s1256_s24 + $0x20] sm:$0xf] }
 0x159   : > { %586 = vmatpush.bf16.msra.mxu0 %v966_v29  ;;  %1018 = vmatpush.bf16.msra.mxu2 %v966_v29  ;;  %v946_v48 = vor.u32 %v997_v45, %v943_v46  ;;  %v996_v50 = vld [vmem:[%s1256_s24 + $0x24] sm:$0xf0]  ;;  %v995_v51 = vld [vmem:[%s1256_s24 + $0x24] sm:$0xf]  ;;  %v935_v52 = vld [vmem:[%s1256_s24 + $0x28] sm:$0xf0] }
 0x15a   : > { %604 = vmatpush.bf16.msra.mxu1 %v970_v30  ;;  %1026 = vmatpush.bf16.msra.mxu3 %v970_v30  ;;  %v934_v53 = vor.u32 %v996_v50, %v933_v49  ;;  %v938_v54 = vor.u32 %v995_v51, %v935_v52  ;;  %v925_v55 = vld [vmem:[%s1256_s24 + $0x10] sm:$0xf]  ;;  %v994_v56 = vld [vmem:[%s1256_s24 + $0x14] sm:$0xf0]  ;;  %v993_v57 = vld [vmem:[%s1256_s24 + $0x14] sm:$0xf] }
 0x15b   : > { %v927_v58 = vld [vmem:[%s1256_s24 + $0x18] sm:$0xf0]  ;;  %v926_v59 = vor.u32 %v994_v56, %v925_v55  ;;  %v917_v62 = vld [vmem:[%s1256_s24] sm:$0xf]  ;;  %v992_v63 = vld [vmem:[%s1256_s24 + $0x4] sm:$0xf0] }
 0x15c   : > { %v472_v60 = vld [vmem:[#allocation2 + $0x8] sm:$0xf]  ;;  %v930_v61 = vor.u32 %v993_v57, %v927_v58  ;;  %v991_v0 = vld [vmem:[%s1256_s24 + $0x4] sm:$0xf]  ;;  %v919_v1 = vld [vmem:[%s1256_s24 + $0x8] sm:$0xf0]  ;;  %v918_v3 = vor.u32 %v992_v63, %v917_v62 }
 0x15d   : > { %587 = vmatpush.bf16.msra.mxu0 %v958_v35  ;;  %1019 = vmatpush.bf16.msra.mxu2 %v958_v35  ;;  %v500_v2 = vunpack.c.l.b16 %v472_v60  ;;  %v922_v4 = vor.u32 %v991_v0, %v919_v1  ;;  %v990_v5 = vld [vmem:[#allocation2] sm:$0xff]  ;;  %s1007_s12 = sshll.u32 (%p1215_p6), %s1139_s20, 3 }
 0x15e   : > { %605 = vmatpush.bf16.msra.mxu1 %v962_v36  ;;  %1027 = vmatpush.bf16.msra.mxu3 %v962_v36  ;;  %v489_v7 = vld [vmem:[%s369_s17] sm:$0x3]  ;;  %s765_s15 = scalar_lea.vmem (%p1215_p6), %s1427_s5, %s1007_s12 }
 0x15f   : > { %v502_v6 = vpack.c.b16 %v500_v2, %v500_v2  ;;  %v491_v8 = vperm.slane %v489_v7, 0  ;;  %v492_v9 = vperm.slane %v489_v7, 1 }
 0x161   : > { %588 = vmatpush.bf16.msra.mxu0 %v950_v41  ;;  %1020 = vmatpush.bf16.msra.mxu2 %v950_v41 }
 0x162   : > { %606 = vmatpush.bf16.msra.mxu1 %v954_v42  ;;  %1028 = vmatpush.bf16.msra.mxu3 %v954_v42 }
 0x165   : > { %589 = vmatpush.bf16.msra.mxu0 %v942_v47  ;;  %1021 = vmatpush.bf16.msra.mxu2 %v942_v47 }
 0x166   : > { %607 = vmatpush.bf16.msra.mxu1 %v946_v48  ;;  %1029 = vmatpush.bf16.msra.mxu3 %v946_v48 }
 0x169   : > { %590 = vmatpush.bf16.msra.mxu0 %v934_v53  ;;  %1022 = vmatpush.bf16.msra.mxu2 %v934_v53 }
 0x16a   : > { %608 = vmatpush.bf16.msra.mxu1 %v938_v54  ;;  %1030 = vmatpush.bf16.msra.mxu3 %v938_v54 }
 0x16d   : > { %591 = vmatpush.bf16.msra.mxu0 %v926_v59  ;;  %1023 = vmatpush.bf16.msra.mxu2 %v926_v59 }
 0x16e   : > { %609 = vmatpush.bf16.msra.mxu1 %v930_v61  ;;  %1031 = vmatpush.bf16.msra.mxu3 %v930_v61 }
 0x171   : > { %592 = vmatpush.bf16.msra.mxu0 %v918_v3  ;;  %1024 = vmatpush.bf16.msra.mxu2 %v918_v3 }
 0x172   : > { %610 = vmatpush.bf16.msra.mxu1 %v922_v4  ;;  %1032 = vmatpush.bf16.msra.mxu3 %v922_v4 }
 0x174   : > { %593 = vmatmul.bf16.vlgmr.msra.gmra.mxu0 %v990_v5  ;;  %598 = vmatmul.bf16.vlgmr.msra.gmra.mxu2 %v502_v6 }
 0x175   : > { %611 = vmatmul.bf16.vlgmr.msra.gmra.mxu1 %v990_v5  ;;  %616 = vmatmul.bf16.vlgmr.msra.gmra.mxu3 %v502_v6 }
 0x1f1   : > { %v594_v10 = vpop.f32.mrf.mxu0 }
 0x1f2   : > { %v1310_v11 = vadd.f32 %v594_v10, %v491_v8  ;;  %v612_v12 = vpop.f32.mrf.mxu1 }
 0x1f3   : > { %v1312_v13 = vadd.f32 %v612_v12, %v492_v9 }
 0x1f4   : > { %v979_v14 = vmul.f32 -1.702, %v1310_v11 }
 0x1f5   : > { %v980_v15 = vmul.f32 -1.702, %v1312_v13 }
 0x1f6   : > { %v633_v16 = vmul.f32 1.442695, %v979_v14 }
 0x1f7   : > { %v635_v17 = vmul.f32 1.442695, %v980_v15  ;;  %v599_v18 = vpop.f32.mrf.mxu2 }
 0x1f8   : > { %1085 = vpow2.f32 %v633_v16  ;;  %v1316_v19 = vadd.f32 %v599_v18, %v491_v8  ;;  %v617_v20 = vpop.f32.mrf.mxu3 }
 0x1f9   : > { %1087 = vpow2.f32 %v635_v17  ;;  %v1318_v21 = vadd.f32 %v617_v20, %v492_v9  ;;  %v596_v22 = vpop.f32.mrf.mxu0 }
 0x1fa   : > { %v983_v23 = vmul.f32 -1.702, %v1316_v19  ;;  %v1321_v24 = vadd.f32 %v596_v22, %v491_v8  ;;  %v614_v25 = vpop.f32.mrf.mxu1 }
 0x1fb   : > { %v984_v26 = vmul.f32 -1.702, %v1318_v21  ;;  %v1324_v27 = vadd.f32 %v614_v25, %v492_v9 }
 0x1fc   : > { %v641_v28 = vmul.f32 1.442695, %v983_v23  ;;  %v981_v29 = vmul.f32 -1.702, %v1321_v24 }
 0x1fd   : > { %v643_v30 = vmul.f32 1.442695, %v984_v26  ;;  %v982_v31 = vmul.f32 -1.702, %v1324_v27 }
 0x1fe   : > { %v1086_v32 = vpop.eup %1085  ;;  %1089 = vpow2.f32 %v641_v28  ;;  %v637_v33 = vmul.f32 1.442695, %v981_v29 }
 0x1ff   : > { %v1088_v34 = vpop.eup %1087  ;;  %v645_v35 = vadd.f32 1.0, %v1086_v32  ;;  %1091 = vpow2.f32 %v643_v30  ;;  %v639_v36 = vmul.f32 1.442695, %v982_v31  ;;  %v601_v37 = vpop.f32.mrf.mxu2 }
 0x200   : > { %v646_v38 = vadd.f32 1.0, %v1088_v34  ;;  %1093 = vpow2.f32 %v637_v33  ;;  %v619_v39 = vpop.f32.mrf.mxu3 }
 0x201   : > { %1095 = vrcp.f32 %v645_v35  ;;  %v660_v44 = vand.u32 2147483647, %v645_v35  ;;  %v662_v47 = vand.u32 2147483648, %v645_v35  ;;  %vm656_vm10 = vweird.f32 %v645_v35 }
 0x202   : > { %1097 = vrcp.f32 %v646_v38  ;;  %v675_v50 = vand.u32 2147483647, %v646_v38  ;;  %v677_v53 = vand.u32 2147483648, %v646_v38  ;;  %vm671_vm12 = vweird.f32 %v646_v38 }
 0x203   : > { %1099 = vpow2.f32 %v639_v36  ;;  %vm1334_vm11 = vcmp.eq.f32.partialorder %v660_v44, 8.507059e+37  ;;  %v663_v57 = vor.u32 1.1754944e-38, %v662_v47 }
 0x204   : > { %v1090_v40 = vpop.eup %1089  ;;  %vm1343_vm14 = vcmp.eq.f32.partialorder %v675_v50, 8.507059e+37  ;;  %v678_v1 = vor.u32 1.1754944e-38, %v677_v53 }
 0x205   : > { %v1092_v41 = vpop.eup %1091  ;;  %v1328_v42 = vadd.f32 1.0, %v1090_v40 }
 0x206   : > { %v1094_v43 = vpop.eup %1093  ;;  %v1330_v45 = vadd.f32 1.0, %v1092_v41 }
 0x207   : > { %v1096_v46 = vpop.eup %1095  ;;  %1101 = vrcp.f32 %v1328_v42  ;;  %v1338_v56 = vadd.f32 1.0, %v1094_v43  ;;  %v720_v59 = vand.u32 2147483647, %v1328_v42  ;;  %v722_v2 = vand.u32 2147483648, %v1328_v42 }
 0x208   : > { %v1098_v48 = vpop.eup %1097  ;;  %v652_v49 = vmul.f32 %v1096_v46, %v645_v35  ;;  %1103 = vrcp.f32 %v1330_v45  ;;  %vm657_vm13 = vweird.f32 %v1096_v46  ;;  %vm716_vm0 = vweird.f32 %v1328_v42 }
 0x209   : > { %v1100_v51 = vpop.eup %1099  ;;  %v667_v52 = vmul.f32 %v1098_v48, %v646_v38  ;;  %1105 = vrcp.f32 %v1338_v56  ;;  %vm672_vm15 = vweird.f32 %v1098_v48  ;;  %vm658_vm1 = vmor %vm656_vm10, %vm657_vm13  ;;  %vm1353_vm2 = vcmp.eq.f32.partialorder %v720_v59, 8.507059e+37 }
 0x20a   : > { %v653_v54 = vsub.f32 1.0, %v652_v49  ;;  %v1341_v60 = vadd.f32 1.0, %v1100_v51  ;;  %vm731_vm3 = vweird.f32 %v1330_v45  ;;  %vm673_vm4 = vmor %vm671_vm12, %vm672_vm15  ;;  %v735_v12 = vand.u32 2147483647, %v1330_v45 }
 0x20b   : > { %v668_v58 = vsub.f32 1.0, %v667_v52  ;;  %v737_v14 = vand.u32 2147483648, %v1330_v45  ;;  %v723_v17 = vor.u32 1.1754944e-38, %v722_v2  ;;  %vm686_vm8 = vweird.f32 %v1338_v56 }
 0x20c   : > { %v654_v61 = vmul.f32 %v1096_v46, %v653_v54  ;;  %1107 = vrcp.f32 %v1341_v60  ;;  %vm1369_vm7 = vcmp.eq.f32.partialorder %v735_v12, 8.507059e+37  ;;  %v690_v37 = vand.u32 2147483647, %v1338_v56 }
 0x20d   : > { %v1102_v63 = vpop.eup %1101  ;;  %v669_v0 = vmul.f32 %v1098_v48, %v668_v58  ;;  %v738_v33 = vor.u32 1.1754944e-38, %v737_v14  ;;  %v692_v38 = vand.u32 2147483648, %v1338_v56  ;;  %vm701_vm15 = vweird.f32 %v1341_v60 }
 0x20e   : > { %v1104_v3 = vpop.eup %1103  ;;  %v655_v4 = vadd.f32 %v1096_v46, %v654_v61  ;;  %v712_v5 = vmul.f32 %v1102_v63, %v1328_v42  ;;  %vm717_vm5 = vweird.f32 %v1102_v63 }
 0x20f   : > { %v670_v6 = vadd.f32 %v1098_v48, %v669_v0  ;;  %v727_v8 = vmul.f32 %v1104_v3, %v1330_v45  ;;  %v1106_v20 = vpop.eup %1105  ;;  %vm732_vm6 = vweird.f32 %v1104_v3  ;;  %vm718_vm9 = vmor %vm716_vm0, %vm717_vm5  ;;  %v705_v45 = vand.u32 2147483647, %v1341_v60 }
 0x210   : > { %v659_v9 = vsel %vm658_vm1, %v1096_v46, %v655_v4  ;;  %v713_v10 = vsub.f32 1.0, %v712_v5  ;;  %v682_v29 = vmul.f32 %v1106_v20, %v1338_v56  ;;  %vm733_vm10 = vmor %vm731_vm3, %vm732_vm6  ;;  %v707_v46 = vand.u32 2147483648, %v1341_v60 }
 0x211   : > { %v664_v15 = vsel %vm1334_vm11, %v663_v57, %v659_v9  ;;  %v674_v16 = vsel %vm673_vm4, %v1098_v48, %v670_v6  ;;  %v728_v18 = vsub.f32 1.0, %v727_v8  ;;  %vm687_vm11 = vweird.f32 %v1106_v20 }
 0x212   : > { %v741_v22 = vmul.f32 %v664_v15, %v1310_v11  ;;  %v679_v23 = vsel %vm1343_vm14, %v678_v1, %v674_v16  ;;  %v714_v25 = vmul.f32 %v1102_v63, %v713_v10  ;;  %v1108_v30 = vpop.eup %1107  ;;  %vm688_vm13 = vmor %vm686_vm8, %vm687_vm11  ;;  %vm691_vm14 = vcmp.eq.f32.partialorder %v690_v37, 8.507059e+37 }
 0x213   : > { %v742_v26 = vmul.f32 %v679_v23, %v1312_v13  ;;  %v729_v28 = vmul.f32 %v1104_v3, %v728_v18  ;;  %v683_v13 = vsub.f32 1.0, %v682_v29  ;;  %v697_v35 = vmul.f32 %v1108_v30, %v1341_v60 }
 0x214   : > { %v715_v31 = vadd.f32 %v1102_v63, %v714_v25  ;;  %vm702_vm12 = vweird.f32 %v1108_v30  ;;  %v708_v54 = vor.u32 1.1754944e-38, %v707_v46  ;;  %vm706_vm1 = vcmp.eq.f32.partialorder %v705_v45, 8.507059e+37 }
 0x215   : > { %v747_v11 = vpack.c.bf16 %v742_v26, %v741_v22  ;;  %v730_v34 = vadd.f32 %v1104_v3, %v729_v28  ;;  %v684_v41 = vmul.f32 %v1106_v20, %v683_v13  ;;  %v698_v42 = vsub.f32 1.0, %v697_v35  ;;  %vm703_vm0 = vmor %vm701_vm15, %vm702_vm12 }
 0x216   : > { %v719_v36 = vsel %vm718_vm9, %v1102_v63, %v715_v31 }
 0x217   : > { %750 = vst [vmem:[%s1258_s25] sm:$0xff] %v747_v11  ;;  %v724_v39 = vsel %vm1353_vm2, %v723_v17, %v719_v36  ;;  %v734_v40 = vsel %vm733_vm10, %v1104_v3, %v730_v34  ;;  %v685_v48 = vadd.f32 %v1106_v20, %v684_v41  ;;  %v699_v49 = vmul.f32 %v1108_v30, %v698_v42 }
 0x218   : > { %v745_v43 = vmul.f32 %v724_v39, %v1316_v19  ;;  %v739_v44 = vsel %vm1369_vm7, %v738_v33, %v734_v40  ;;  %v693_v19 = vor.u32 1.1754944e-38, %v692_v38 }
 0x219   : > { %v746_v47 = vmul.f32 %v739_v44, %v1318_v21  ;;  %v689_v51 = vsel %vm688_vm13, %v1106_v20, %v685_v48  ;;  %v700_v52 = vadd.f32 %v1108_v30, %v699_v49 }
 0x21a   : > { %v694_v53 = vsel %vm691_vm14, %v693_v19, %v689_v51 }
 0x21b   : > { %v749_v50 = vpack.c.bf16 %v746_v47, %v745_v43  ;;  %v743_v21 = vmul.f32 %v694_v53, %v1321_v24  ;;  %v704_v55 = vsel %vm703_vm0, %v1108_v30, %v700_v52 }
 0x21c   : > { %v709_v57 = vsel %vm706_vm1, %v708_v54, %v704_v55 }
 0x21d   : > { %752 = vst [vmem:[%s1258_s25 + $0x10] sm:$0xff] %v749_v50  ;;  %v744_v56 = vmul.f32 %v709_v57, %v1324_v27  ;;  %759 = sbr.rel (!%p1215_p6) target bundleno = 554 (0x22a), region = 86 }
 0x21e   : > { %v798_v59 = vld [vmem:[%s1258_s25] sm:$0xff] (%p1215_p6) }
 0x21f   : > { %v748_v58 = vpack.c.bf16 %v744_v56, %v743_v21  ;;  %799 = vst [vmem:[%s765_s15] sm:$0xff] (%p1215_p6), %v798_v59 }
 0x221   : > { %751 = vst [vmem:[%s1258_s25 + $0x8] sm:$0xff] %v748_v58 }
 0x224   : > { %v802_v24 = vld [vmem:[%s1258_s25 + $0x10] sm:$0xff] }
 0x225   : > { %803 = vst [vmem:[%s765_s15 + $0x20] sm:$0xff] %v802_v24 }
 0x228   : > { %v800_v60 = vld [vmem:[%s1258_s25 + $0x8] sm:$0xff] }
 0x229   : > { %801 = vst [vmem:[%s765_s15 + $0x10] sm:$0xff] %v800_v60 }
 0x22a PF: > { %s15_s22 = sadd.s32 1, %s1147_s22   ;;  %s1437_s18 = smov %s1135_s19 }
 0x22b   : > { %p12_p13 = scmp.ge.s32.totalorder %s15_s22, 4   ;;  %s1438_s19 = smov %s1220_s28 }
 0x22c   : > { %s1439_s20 = smov %s1143_s21  ;;  %s1440_s21 = smov %s1442_s23 }
 0x22d   :  { %14 = sbr.rel (!%p12_p13) target bundleno = 3 (0x3), region = 161 }

// kernel: evl_forward.36
= control target key start
LH: loop header
LB: loop body
LE: loop exit
PB: predicated region body
PF: predicated region fallthrough
CT: control target
= control target key end

     0   :  { %s789_s1 = inlined_call_operand.vmem [shape: bf16[512,128], index: 1, kind: input, shape index: {}]   ;;  %s790_s0 = inlined_call_operand.vmem [shape: bf16[24,512], index: 0, kind: input, shape index: {}]   ;;  %s791_s2 = inlined_call_operand.vmem [shape: f32[1,128], index: 2, kind: input, shape index: {}]   ;;  %s792_s3 = inlined_call_operand.vmem [shape: bf16[24,128], index: 3, kind: input, shape index: {}]   ;;  %s793_s4 = inlined_call_operand.vmem [shape: bf16[24,128], index: 4, kind: output, shape index: {}]  }
   0x1   :  { %v588_v0 = vld [vmem:[%s789_s1 + $0x38] sm:$0xff]  ;;  %v587_v4 = vld [vmem:[%s789_s1 + $0x30] sm:$0xff]  ;;  %v586_v8 = vld [vmem:[%s789_s1 + $0x28] sm:$0xff] }
   0x2   :  { %v596_v1 = vld [vmem:[%s789_s1 + $0x78] sm:$0xff]  ;;  %323 = vmatpush.bf16.msra.mxu0 %v588_v0  ;;  %v595_v5 = vld [vmem:[%s789_s1 + $0x70] sm:$0xff]  ;;  %v594_v9 = vld [vmem:[%s789_s1 + $0x68] sm:$0xff] }
   0x3   :  { %v604_v2 = vld [vmem:[%s789_s1 + $0xb8] sm:$0xff]  ;;  %341 = vmatpush.bf16.msra.mxu1 %v596_v1  ;;  %v603_v6 = vld [vmem:[%s789_s1 + $0xb0] sm:$0xff]  ;;  %v602_v10 = vld [vmem:[%s789_s1 + $0xa8] sm:$0xff] }
   0x4   :  { %v612_v3 = vld [vmem:[%s789_s1 + $0xf8] sm:$0xff]  ;;  %359 = vmatpush.bf16.msra.mxu2 %v604_v2  ;;  %v611_v7 = vld [vmem:[%s789_s1 + $0xf0] sm:$0xff]  ;;  %v610_v11 = vld [vmem:[%s789_s1 + $0xe8] sm:$0xff] }
   0x5   :  { %377 = vmatpush.bf16.msra.mxu3 %v612_v3  ;;  %v585_v12 = vld [vmem:[%s789_s1 + $0x20] sm:$0xff]  ;;  %v584_v16 = vld [vmem:[%s789_s1 + $0x18] sm:$0xff]  ;;  %v583_v20 = vld [vmem:[%s789_s1 + $0x10] sm:$0xff] }
   0x6   :  { %324 = vmatpush.bf16.msra.mxu0 %v587_v4  ;;  %v593_v13 = vld [vmem:[%s789_s1 + $0x60] sm:$0xff]  ;;  %v592_v17 = vld [vmem:[%s789_s1 + $0x58] sm:$0xff]  ;;  %v591_v21 = vld [vmem:[%s789_s1 + $0x50] sm:$0xff] }
   0x7   :  { %342 = vmatpush.bf16.msra.mxu1 %v595_v5  ;;  %v601_v14 = vld [vmem:[%s789_s1 + $0xa0] sm:$0xff]  ;;  %v600_v18 = vld [vmem:[%s789_s1 + $0x98] sm:$0xff]  ;;  %v599_v22 = vld [vmem:[%s789_s1 + $0x90] sm:$0xff] }
   0x8   :  { %360 = vmatpush.bf16.msra.mxu2 %v603_v6  ;;  %v609_v15 = vld [vmem:[%s789_s1 + $0xe0] sm:$0xff]  ;;  %v608_v19 = vld [vmem:[%s789_s1 + $0xd8] sm:$0xff]  ;;  %v607_v23 = vld [vmem:[%s789_s1 + $0xd0] sm:$0xff] }
   0x9   :  { %378 = vmatpush.bf16.msra.mxu3 %v611_v7  ;;  %v582_v24 = vld [vmem:[%s789_s1 + $0x8] sm:$0xff]  ;;  %v581_v28 = vld [vmem:[%s789_s1] sm:$0xff]  ;;  %v579_v33 = vld [vmem:[%s790_s0 + $0xc] sm:$0xf0] }
   0xa   :  { %325 = vmatpush.bf16.msra.mxu0 %v586_v8  ;;  %v590_v25 = vld [vmem:[%s789_s1 + $0x48] sm:$0xff]  ;;  %v589_v29 = vld [vmem:[%s789_s1 + $0x40] sm:$0xff]  ;;  %v437_v35 = vld [vmem:[%s790_s0 + $0x10] sm:$0xf0] }
   0xb   :  { %343 = vmatpush.bf16.msra.mxu1 %v594_v9  ;;  %v598_v26 = vld [vmem:[%s789_s1 + $0x88] sm:$0xff]  ;;  %v597_v30 = vld [vmem:[%s789_s1 + $0x80] sm:$0xff]  ;;  %v580_v37 = vld [vmem:[%s790_s0 + $0x14] sm:$0xf0] }
   0xc   :  { %361 = vmatpush.bf16.msra.mxu2 %v602_v10  ;;  %v606_v27 = vld [vmem:[%s789_s1 + $0xc8] sm:$0xff]  ;;  %v605_v31 = vld [vmem:[%s789_s1 + $0xc0] sm:$0xff]  ;;  %v445_v39 = vld [vmem:[%s790_s0 + $0x18] sm:$0xf0] }
   0xd   :  { %379 = vmatpush.bf16.msra.mxu3 %v610_v11  ;;  %v435_v32 = vld [vmem:[%s790_s0] sm:$0xf]  ;;  %v577_v34 = vld [vmem:[%s790_s0 + $0x4] sm:$0xf]  ;;  %v443_v36 = vld [vmem:[%s790_s0 + $0x8] sm:$0xf] }
   0xe   :  { %326 = vmatpush.bf16.msra.mxu0 %v585_v12  ;;  %v578_v38 = vld [vmem:[%s790_s0 + $0xc] sm:$0xf]  ;;  %v436_v40 = vor.u32 %v579_v33, %v435_v32  ;;  %v440_v41 = vor.u32 %v577_v34, %v437_v35  ;;  %v444_v42 = vor.u32 %v580_v37, %v443_v36  ;;  %v31_v44 = vld [vmem:[%s790_s0 + $0x20] sm:$0xff] }
   0xf   :  { %344 = vmatpush.bf16.msra.mxu1 %v593_v13  ;;  %v448_v43 = vor.u32 %v578_v38, %v445_v39  ;;  %v32_v45 = vld [vmem:[%s790_s0 + $0x28] sm:$0xff]  ;;  %v111_v46 = vunpack.c.l.b16 %v31_v44  ;;  %v112_v47 = vunpack.c.h.b16 %v31_v44  ;;  %v622_v63 = vld [vmem:[%s791_s2] ss:$0 sm:$0xff] }
  0x10   :  { %362 = vmatpush.bf16.msra.mxu2 %v601_v14  ;;  %v113_v48 = vunpack.c.l.b16 %v32_v45  ;;  %v114_v49 = vunpack.c.h.b16 %v32_v45  ;;  %v614_v1 = vld [vmem:[%s792_s3] sm:$0xff]  }
  0x11   :  { %380 = vmatpush.bf16.msra.mxu3 %v609_v15  ;;  %v119_v50 = vpack.c.b16 %v111_v46, %v111_v46  ;;  %v120_v51 = vpack.c.b16 %v112_v47, %v112_v47  ;;  %v615_v8 = vunpack.c.l.bf16 %v614_v1  ;;  %v616_v10 = vunpack.c.h.bf16 %v614_v1 }
  0x12   :  { %327 = vmatpush.bf16.msra.mxu0 %v584_v16  ;;  %v121_v52 = vpack.c.b16 %v113_v48, %v113_v48  ;;  %v122_v53 = vpack.c.b16 %v114_v49, %v114_v49 }
  0x13   :  { %345 = vmatpush.bf16.msra.mxu1 %v592_v17  ;;  %v416_v17 = vld [vmem:[%s792_s3 + $0x8] sm:$0xf] }
  0x14   :  { %363 = vmatpush.bf16.msra.mxu2 %v600_v18 }
  0x15   :  { %381 = vmatpush.bf16.msra.mxu3 %v608_v19 }
  0x16   :  { %328 = vmatpush.bf16.msra.mxu0 %v583_v20 }
  0x17   :  { %346 = vmatpush.bf16.msra.mxu1 %v591_v21 }
  0x18   :  { %364 = vmatpush.bf16.msra.mxu2 %v599_v22 }
  0x19   :  { %382 = vmatpush.bf16.msra.mxu3 %v607_v23  ;;  %v419_v23 = vunpack.c.l.bf16 %v416_v17 }
  0x1a   :  { %329 = vmatpush.bf16.msra.mxu0 %v582_v24 }
  0x1b   :  { %347 = vmatpush.bf16.msra.mxu1 %v590_v25 }
  0x1c   :  { %365 = vmatpush.bf16.msra.mxu2 %v598_v26 }
  0x1d   :  { %383 = vmatpush.bf16.msra.mxu3 %v606_v27 }
  0x1e   :  { %330 = vmatpush.bf16.msra.mxu0 %v581_v28 }
  0x1f   :  { %348 = vmatpush.bf16.msra.mxu1 %v589_v29 }
  0x20   :  { %366 = vmatpush.bf16.msra.mxu2 %v597_v30 }
  0x21   :  { %384 = vmatpush.bf16.msra.mxu3 %v605_v31  ;;  %331 = vmatmul.bf16.vlgmr.msra.gmra.mxu0 %v436_v40 }
  0x22   :  { %349 = vmatmul.bf16.vlgmr.msra.gmra.mxu1 %v440_v41 }
  0x23   :  { %367 = vmatmul.bf16.vlgmr.msra.gmra.mxu2 %v444_v42 }
  0x24   :  { %385 = vmatmul.bf16.vlgmr.msra.gmra.mxu3 %v448_v43 }
  0x31   :  { %336 = vmatmul.bf16.gmra.mxu0 %v119_v50 }
  0x32   :  { %354 = vmatmul.bf16.gmra.mxu1 %v120_v51 }
  0x33   :  { %372 = vmatmul.bf16.gmra.mxu2 %v121_v52 }
  0x34   :  { %390 = vmatmul.bf16.gmra.mxu3 %v122_v53 }
  0x9e   :  { %v332_v54 = vpop.f32.mrf.mxu0 }
  0x9f   :  { %v350_v55 = vpop.f32.mrf.mxu1 }
  0xa0   :  { %v351_v56 = vadd.f32 %v350_v55, %v332_v54 }
  0xa6   :  { %v368_v57 = vpop.f32.mrf.mxu2  ;;  %v334_v59 = vpop.f32.mrf.mxu0 }
  0xa7   :  { %v386_v58 = vpop.f32.mrf.mxu3  ;;  %v352_v60 = vpop.f32.mrf.mxu1  ;;  %v369_v61 = vadd.f32 %v368_v57, %v351_v56 }
  0xa8   :  { %v353_v0 = vadd.f32 %v352_v60, %v334_v59 }
  0xa9   :  { %v387_v62 = vadd.f32 %v386_v58, %v369_v61 }
  0xab   :  { %v411_v7 = vadd.f32 %v622_v63, %v387_v62 }
  0xad   :  { %v420_v13 = vadd.f32 %v615_v8, %v411_v7 }
  0xae   :  { %v370_v2 = vpop.f32.mrf.mxu2  ;;  %v337_v5 = vpop.f32.mrf.mxu0 }
  0xaf   :  { %v388_v3 = vpop.f32.mrf.mxu3  ;;  %v371_v4 = vadd.f32 %v370_v2, %v353_v0  ;;  %v355_v6 = vpop.f32.mrf.mxu1 }
  0xb0   :  { %v356_v12 = vadd.f32 %v355_v6, %v337_v5 }
  0xb1   :  { %v389_v9 = vadd.f32 %v388_v3, %v371_v4 }
  0xb3   :  { %v412_v11 = vadd.f32 %v622_v63, %v389_v9 }
  0xb5   :  { %v421_v14 = vadd.f32 %v616_v10, %v412_v11 }
  0xb6   :  { %v373_v15 = vpop.f32.mrf.mxu2  ;;  %v339_v20 = vpop.f32.mrf.mxu0 }
  0xb7   :  { %v391_v16 = vpop.f32.mrf.mxu3  ;;  %v620_v18 = vpack.c.bf16 %v421_v14, %v420_v13  ;;  %v374_v19 = vadd.f32 %v373_v15, %v356_v12  ;;  %v357_v21 = vpop.f32.mrf.mxu1 }
  0xb9   :  { %v392_v22 = vadd.f32 %v391_v16, %v374_v19  ;;  %621 = vst [vmem:[%s793_s4] sm:$0xff] %v620_v18  }
  0xbb   :  { %v413_v24 = vadd.f32 %v622_v63, %v392_v22 }
  0xbd   :  { %v422_v25 = vadd.f32 %v419_v23, %v413_v24 }
  0xbe   :  { %v375_v26 = vpop.f32.mrf.mxu2 }
  0xbf   :  { %v393_v27 = vpop.f32.mrf.mxu3  ;;  %v425_v28 = vpack.c.bf16 %v422_v25, %v422_v25 }
  0xc1   :  { %428 = vst [vmem:[%s793_s4 + $0x8] sm:$0xf] %v425_v28 }

// kernel: evl_forward.37
= control target key start
LH: loop header
LB: loop body
LE: loop exit
PB: predicated region body
PF: predicated region fallthrough
CT: control target
= control target key end

     0   :  { %10 = vsyncpa [#allocation4], 0  ;;  %s1053_s0 = inlined_call_operand.vmem [shape: bf16[24,128], index: 0, kind: input, shape index: {}]   ;;  %s1054_s1 = inlined_call_operand.vmem [shape: f32[1,128], index: 1, kind: input, shape index: {}]   ;;  %s1055_s2 = inlined_call_operand.vmem [shape: f32[1,128], index: 2, kind: input, shape index: {}]   ;;  %s1056_s3 = inlined_call_operand.hbm [shape: bf16[128,384], index: 3, kind: input, shape index: {}]   ;;  %s1057_s4 = inlined_call_operand.vmem [shape: f32[1,384], index: 4, kind: input, shape index: {}]   ;;  %s1058_s5 = inlined_call_operand.vmem [shape: bf16[24,384], index: 5, kind: output, shape index: {}]  }
   0x1   :  { %12 = vsyncpa [#allocation4 + $0x1], 0  ;;  %s917_s18 = smov 0   ;;  %s919_s19 = smov 0  }
   0x2   :  { %s921_s20 = smov 0   ;;  %s923_s21 = smov 0  }
   0x3   :  { %s925_s22 = smov 0   ;;  %s927_s23 = smov 0  }
   0x4 LB: > { %s650_s24 = sadd.s32 4294967295, %s881_s23   ;;  %s27_s25 = sadd.s32 1, %s877_s22  ;;  %s881_s23 = sphi %s927_s23, %s18_s23   ;;  %s877_s22 = sphi %s925_s22, %s1066_s22   ;;  %s873_s21 = sphi %s923_s21, %s1065_s21   ;;  %s869_s20 = sphi %s921_s20, %s1064_s20   ;;  %s865_s19 = sphi %s919_s19, %s1063_s19   ;;  %s861_s18 = sphi %s917_s18, %s1062_s18  }
   0x5   : > { %p28_p0 = scmp.ge.s32.totalorder %s27_s25, 3  ;;  %s105_s26 = sadd.s32 1, %s869_s20 }
   0x6   : > { %p112_p1 = scmp.ne.s32.totalorder %s869_s20, %s865_s19  ;;  %p113_p2 = scmp.eq.s32.totalorder %s881_s23, 0 }
   0x7   : > { %s1068_s25 = smov (%p28_p0, %s27_s25), 0  ;;  %p118_p4 = scmp.ne.s32.totalorder %s865_s19, %s861_s18 }
   0x8   : > { %p953_p3 = por %p113_p2, %p112_p1  ;;  %s102_s28 = ssub.s32 %s877_s22, %s1068_s25 }
   0x9   : > { %p119_p5 = scmp.eq.s32.totalorder %s650_s24, 0  ;;  %p103_p6 = scmp.eq.s32.totalorder %s102_s28, 0 }
   0xa   : > { %p170_p7 = scmp.eq.s32.totalorder %s650_s24, 2  ;;  %p737_p10 = scmp.lt.s32.totalorder %s881_s23, 3 }
   0xb   : > { %p960_p8 = por %p119_p5, %p118_p4  ;;  %s211_s7 = sand.u32 1, %s869_s20  }
   0xc   : > { %s965_s30 = scalar_select %p103_p6, %s869_s20, %s105_s26  }
   0xd   : > { %p967_p9 = por %p170_p7, %p112_p1  ;;  %s656_s8 = sshll.u32 %s877_s22, 2 }
   0xe   : > { %s655_s9 = sshll.u32 %s211_s7, 6  ;;  %s219_s12 = scalar_lea.hbm %s1056_s3, %s656_s8 }
   0xf   : > { %s220_s13 = sshll.u32 %s219_s12, 4  ;;  %s215_s14 = scalar_lea.vmem [#allocation3], %s655_s9  ;;  %s221_s13 = int_to_ptr.hbm [resolvable:$true] %s220_s13 }
  0x10   : > { %s222_s15 = sshll.u32 %s215_s14, 4  ;;  %p734_p11 = pnand %p737_p10, %p953_p3  ;;  %s223_s15 = int_to_ptr.vmem [resolvable:$true] %s222_s15 }
  0x11   : > { %p657_p12 = scmp.ge.s32.totalorder %s881_s23, 1  ;;  %s212_s16 = scalar_lea.sflag [#allocation4], %s211_s7 }
  0x12   : > { %s883_s17 = smov 192   ;;  %s884_s18 = smov 64  }
  0x13   : > { %s885_s24 = smov 4   ;;  %p236_p13 = scmp.lt.s32.totalorder %s881_s23, 4 }
  0x14   : > { %736 = dma.hbm_to_vmem [thread:$0]  (!%p734_p11), %s221_s13, 1024, %s223_s15, %s212_s16, %s883_s17, %s884_s18, %s885_s24  }
  0x15   : > { %p237_p0 = pnand %p657_p12, %p236_p13 }
  0x16   : > { %s242_s26 = sand.u32 (!%p237_p0), 1, %s865_s19  }
  0x17   : > { %240 = sbr.rel (%p237_p0) target bundleno = 505 (0x1f9), region = 40  ;;  %s658_s28 = sshll.u32 (!%p237_p0), %s242_s26, 6 }
  0x18   : > { %s243_s8 = scalar_lea.sflag (!%p237_p0), [#allocation4], %s242_s26  ;;  %s982_s9 = scalar_lea.vmem (!%p237_p0), [#allocation3], %s658_s28 }
  0x1c   : > { %856 = dma.done.wait (%p960_p8), %s243_s8, 1024  }
  0x1d   : > { %858 = vsyncadd (%p960_p8), %s243_s8, 4294966272  ;;  %s730_s27 = smul.u32 12, %s242_s26  ;;  %p287_p1 = scmp.lt.s32.totalorder %s873_s21, 2 }
  0x1e   : > { %p659_p2 = scmp.ne.s32.totalorder %s873_s21, 0 }
  0x1f   : > { %s990_s7 = scalar_select %p287_p1, %s873_s21, 2 }
  0x20   : > { %s996_s13 = scalar_lea.vmem [#allocation5], %s730_s27  ;;  %294 = sbr.rel (%p659_p2) target bundleno = 325 (0x145), region = 48 }
  0x21   : > { %s289_s12 = scalar_lea.vmem %s1057_s4, %s990_s7 }
  0x25   : > { %v709_v0 = vld [vmem:[%s1053_s0] sm:$0xff]   ;;  %v297_v1 = vld [vmem:[%s1053_s0 + $0x8] sm:$0xf]  ;;  %v886_v5 = vmov 128.0  }
  0x26   : > { %v710_v2 = vunpack.c.l.bf16 %v709_v0  ;;  %v300_v3 = vunpack.c.l.bf16 %v297_v1  ;;  %v711_v4 = vunpack.c.h.bf16 %v709_v0  ;;  %792 = vrcp.f32 %v886_v5  ;;  %v790_v46 = vld [vmem:[%s1054_s1] ss:$0 sm:$0xff] }
  0x27   : > { %v791_v52 = vld [vmem:[%s1055_s2] ss:$0 sm:$0xff] }
  0x28   : > { %301 = vadd.xlane.f32.xlu0 %v710_v2  ;;  %305 = vadd.xlane.f32.xlu1 %v300_v3 }
  0x2c   : > { %v793_v6 = vpop.eup %792 }
  0x2d   : > { %v308_v7 = vmul.f32 128.0, %v793_v6  ;;  %vm312_vm0 = vweird.f32 %v793_v6 }
  0x2f   : > { %v309_v8 = vsub.f32 1.0, %v308_v7 }
  0x30   : > { %303 = vadd.xlane.f32.xlu0 %v711_v4 }
  0x31   : > { %v310_v9 = vmul.f32 %v793_v6, %v309_v8 }
  0x33   : > { %v311_v10 = vadd.f32 %v793_v6, %v310_v9 }
  0x35   : > { %v313_v11 = vsel %vm312_vm0, %v793_v6, %v311_v10 }
  0x9b   : > { %v302_v12 = vpop.xlane.xlu0 %301  ;;  %v306_v17 = vpop.xlane.xlu1 %305 }
  0x9c   : > { %v314_v13 = vmul.f32 %v313_v11, %v302_v12  ;;  %v316_v20 = vmul.f32 %v313_v11, %v306_v17 }
  0x9e   : > { %v317_v14 = vsub.f32 %v710_v2, %v314_v13  ;;  %v319_v22 = vsub.f32 %v300_v3, %v316_v20 }
  0xa0   : > { %v320_v15 = vmul.f32 %v317_v14, %v317_v14  ;;  %v322_v23 = vmul.f32 %v319_v22, %v319_v22 }
  0xa2   : > { %323 = vadd.xlane.f32.xlu1 %v320_v15 }
  0xa3   : > { %v304_v16 = vpop.xlane.xlu0 %303 }
  0xa4   : > { %v315_v18 = vmul.f32 %v313_v11, %v304_v16 }
  0xa6   : > { %v318_v19 = vsub.f32 %v711_v4, %v315_v18 }
  0xa8   : > { %v321_v21 = vmul.f32 %v318_v19, %v318_v19 }
  0xaa   : > { %325 = vadd.xlane.f32.xlu2 %v321_v21 }
  0xb2   : > { %327 = vadd.xlane.f32.xlu2 %v322_v23 }
 0x115   : > { %v324_v24 = vpop.xlane.xlu1 %323 }
 0x116   : > { %v329_v25 = vmul.f32 %v324_v24, %v313_v11 }
 0x118   : > { %v332_v26 = vadd.f32 1e-05, %v329_v25 }
 0x11a   : > { %794 = vrsqrt.f32 %v332_v26  ;;  %vm341_vm2 = vweird.f32 %v332_v26 }
 0x11d   : > { %v326_v27 = vpop.xlane.xlu2 %325 }
 0x11e   : > { %v330_v28 = vmul.f32 %v326_v27, %v313_v11 }
 0x120   : > { %v795_v29 = vpop.eup %794  ;;  %v333_v30 = vadd.f32 1e-05, %v330_v28 }
 0x121   : > { %v336_v31 = vmul.f32 %v795_v29, %v332_v26  ;;  %vm342_vm1 = vweird.f32 %v795_v29 }
 0x122   : > { %796 = vrsqrt.f32 %v333_v30  ;;  %vm343_vm3 = vmor %vm341_vm2, %vm342_vm1  ;;  %vm351_vm5 = vweird.f32 %v333_v30 }
 0x123   : > { %v337_v32 = vmul.f32 %v795_v29, %v336_v31 }
 0x125   : > { %v338_v33 = vmul.f32 0.5, %v337_v32  ;;  %v328_v34 = vpop.xlane.xlu2 %327 }
 0x126   : > { %v331_v35 = vmul.f32 %v328_v34, %v313_v11 }
 0x127   : > { %v339_v36 = vsub.f32 1.5, %v338_v33 }
 0x128   : > { %v797_v37 = vpop.eup %796  ;;  %v334_v38 = vadd.f32 1e-05, %v331_v35 }
 0x129   : > { %v340_v39 = vmul.f32 %v795_v29, %v339_v36  ;;  %v346_v40 = vmul.f32 %v797_v37, %v333_v30  ;;  %vm352_vm4 = vweird.f32 %v797_v37 }
 0x12a   : > { %798 = vrsqrt.f32 %v334_v38  ;;  %vm353_vm6 = vmor %vm351_vm5, %vm352_vm4  ;;  %vm361_vm8 = vweird.f32 %v334_v38 }
 0x12b   : > { %v347_v41 = vmul.f32 %v797_v37, %v346_v40  ;;  %v344_v42 = vsel %vm343_vm3, %v795_v29, %v340_v39 }
 0x12c   : > { %v365_v47 = vmul.f32 %v344_v42, %v317_v14 }
 0x12d   : > { %v348_v43 = vmul.f32 0.5, %v347_v41 }
 0x12e   : > { %v372_v53 = vmul.f32 %v790_v46, %v365_v47 }
 0x12f   : > { %v349_v44 = vsub.f32 1.5, %v348_v43 }
 0x130   : > { %v799_v45 = vpop.eup %798  ;;  %v379_v58 = vadd.f32 %v791_v52, %v372_v53 }
 0x131   : > { %v350_v48 = vmul.f32 %v797_v37, %v349_v44  ;;  %v356_v49 = vmul.f32 %v799_v45, %v334_v38  ;;  %vm362_vm7 = vweird.f32 %v799_v45 }
 0x132   : > { %vm363_vm9 = vmor %vm361_vm8, %vm362_vm7 }
 0x133   : > { %v354_v50 = vsel %vm353_vm6, %v797_v37, %v350_v48  ;;  %v357_v51 = vmul.f32 %v799_v45, %v356_v49 }
 0x134   : > { %v366_v54 = vmul.f32 %v354_v50, %v318_v19 }
 0x135   : > { %v358_v55 = vmul.f32 0.5, %v357_v51 }
 0x136   : > { %v373_v56 = vmul.f32 %v790_v46, %v366_v54 }
 0x137   : > { %v359_v57 = vsub.f32 1.5, %v358_v55 }
 0x138   : > { %v380_v59 = vadd.f32 %v791_v52, %v373_v56 }
 0x139   : > { %v360_v60 = vmul.f32 %v799_v45, %v359_v57 }
 0x13a   : > { %v715_v61 = vpack.c.bf16 %v380_v59, %v379_v58 }
 0x13b   : > { %v364_v62 = vsel %vm363_vm9, %v799_v45, %v360_v60 }
 0x13c   : > { %716 = vst [vmem:[#allocation2] sm:$0xff] %v715_v61   ;;  %v367_v63 = vmul.f32 %v364_v62, %v319_v22 }
 0x13e   : > { %v374_v0 = vmul.f32 %v790_v46, %v367_v63 }
 0x140   : > { %v381_v1 = vadd.f32 %v791_v52, %v374_v0 }
 0x142   : > { %v384_v2 = vpack.c.bf16 %v381_v1, %v381_v1 }
 0x144   : > { %387 = vst [vmem:[#allocation2 + $0x8] sm:$0xf] %v384_v2 }
 0x145 PF: > { %v707_v3 = vld [vmem:[%s982_s9 + $0x38] sm:$0xff]  ;;  %v706_v4 = vld [vmem:[%s982_s9 + $0x30] sm:$0xff]  ;;  %v705_v5 = vld [vmem:[%s982_s9 + $0x28] sm:$0xff] }
 0x146   : > { %469 = vmatpush.bf16.msra.mxu0 %v707_v3  ;;  %722 = vmatpush.bf16.msra.mxu1 %v707_v3  ;;  %v704_v6 = vld [vmem:[%s982_s9 + $0x20] sm:$0xff]  ;;  %v703_v7 = vld [vmem:[%s982_s9 + $0x18] sm:$0xff]  ;;  %v702_v8 = vld [vmem:[%s982_s9 + $0x10] sm:$0xff] }
 0x147   : > { %v701_v9 = vld [vmem:[%s982_s9 + $0x8] sm:$0xff]  ;;  %v700_v12 = vld [vmem:[%s982_s9] sm:$0xff]  ;;  %v699_v13 = vld [vmem:[#allocation2] sm:$0xff]  ;;  %s696_s9 = sshll.u32 (%p967_p9), %s873_s21, 2 }
 0x148   : > { %v800_v15 = vld [vmem:[%s289_s12] ss:$0 sm:$0xff]  ;;  %s504_s10 = scalar_lea.vmem (%p967_p9), %s1058_s5, %s696_s9 }
 0x14a   : > { %470 = vmatpush.bf16.msra.mxu0 %v706_v4  ;;  %723 = vmatpush.bf16.msra.mxu1 %v706_v4 }
 0x14b   : > { %v390_v10 = vld [vmem:[#allocation2 + $0x8] sm:$0xf] }
 0x14c   : > { %v416_v11 = vunpack.c.l.b16 %v390_v10 }
 0x14e   : > { %471 = vmatpush.bf16.msra.mxu0 %v705_v5  ;;  %724 = vmatpush.bf16.msra.mxu1 %v705_v5  ;;  %v418_v14 = vpack.c.b16 %v416_v11, %v416_v11 }
 0x152   : > { %472 = vmatpush.bf16.msra.mxu0 %v704_v6  ;;  %725 = vmatpush.bf16.msra.mxu1 %v704_v6 }
 0x156   : > { %473 = vmatpush.bf16.msra.mxu0 %v703_v7  ;;  %726 = vmatpush.bf16.msra.mxu1 %v703_v7 }
 0x15a   : > { %474 = vmatpush.bf16.msra.mxu0 %v702_v8  ;;  %727 = vmatpush.bf16.msra.mxu1 %v702_v8 }
 0x15e   : > { %475 = vmatpush.bf16.msra.mxu0 %v701_v9  ;;  %728 = vmatpush.bf16.msra.mxu1 %v701_v9 }
 0x162   : > { %476 = vmatpush.bf16.msra.mxu0 %v700_v12  ;;  %729 = vmatpush.bf16.msra.mxu1 %v700_v12 }
 0x165   : > { %477 = vmatmul.bf16.vlgmr.msra.gmra.mxu0 %v699_v13  ;;  %482 = vmatmul.bf16.vlgmr.msra.gmra.mxu1 %v418_v14 }
 0x1e2   : > { %v478_v16 = vpop.f32.mrf.mxu0  ;;  %v483_v17 = vpop.f32.mrf.mxu1 }
 0x1e3   : > { %v484_v18 = vadd.f32 %v800_v15, %v483_v17  ;;  %v479_v22 = vadd.f32 %v800_v15, %v478_v16 }
 0x1e5   : > { %v489_v19 = vpack.c.bf16 %v484_v18, %v484_v18 }
 0x1e7   : > { %492 = vst [vmem:[%s996_s13 + $0x8] sm:$0xf] %v489_v19 }
 0x1ea   : > { %v480_v20 = vpop.f32.mrf.mxu0  ;;  %v485_v21 = vpop.f32.mrf.mxu1 }
 0x1eb   : > { %v481_v23 = vadd.f32 %v800_v15, %v480_v20  ;;  %499 = sbr.rel (!%p967_p9) target bundleno = 505 (0x1f9), region = 52 }
 0x1ed   : > { %v720_v24 = vpack.c.bf16 %v481_v23, %v479_v22 }
 0x1ee   : > { %v525_v27 = vld [vmem:[%s996_s13 + $0x8] sm:$0xf] (%p967_p9) }
 0x1ef   : > { %721 = vst [vmem:[%s996_s13] sm:$0xff] %v720_v24  }
 0x1f0   : > { %526 = vst [vmem:[%s504_s10 + $0x18] sm:$0xf] %v525_v27 }
 0x1f6   : > { %v521_v25 = vld [vmem:[%s996_s13] sm:$0xf]  ;;  %v523_v26 = vld [vmem:[%s996_s13 + $0x4] sm:$0xf] }
 0x1f7   : > { %522 = vst [vmem:[%s504_s10] sm:$0xf] %v521_v25 }
 0x1f8   : > { %524 = vst [vmem:[%s504_s10 + $0xc] sm:$0xf] %v523_v26 }
 0x1f9 PF: > { %s18_s23 = sadd.s32 1, %s881_s23   ;;  %s1062_s18 = smov %s865_s19 }
 0x1fa   : > { %p15_p3 = scmp.ge.s32.totalorder %s18_s23, 5   ;;  %s1063_s19 = smov %s869_s20 }
 0x1fb   : > { %s1064_s20 = smov %s965_s30  ;;  %s1065_s21 = smov %s877_s22 }
 0x1fc   : > { %s1066_s22 = smov %s1068_s25  ;;  %17 = sbr.rel (!%p15_p3) target bundleno = 4 (0x4), region = 131 }
 0x201   :  { %566 = vsyncpa [#allocation4], 1 }
 0x202   :  { %568 = vsyncpa [#allocation4 + $0x1], 1 }

// kernel: evl_forward.42
= control target key start
LH: loop header
LB: loop body
LE: loop exit
PB: predicated region body
PF: predicated region fallthrough
CT: control target
= control target key end

     0   :  { %v67_v0 = vmov 0.0   ;;  %s92_s0 = inlined_call_operand.vmem [shape: bf16[16,128], index: 0, kind: input, shape index: {}]   ;;  %s93_s1 = inlined_call_operand.vmem [shape: f32[1,128], index: 1, kind: output, shape index: {0}]   ;;  %s94_s2 = inlined_call_operand.vmem [shape: f32[1,128], index: 2, kind: output, shape index: {1}]  }
   0x1   :  { %14 = vst [vmem:[#allocation2] sm:$0x1] %v67_v0  ;;  %v63_v1 = vld [vmem:[%s92_s0] sm:$0xff]  }
   0x2   :  { %15 = vst [vmem:[#allocation3] sm:$0x1] %v67_v0  ;;  %v64_v2 = vunpack.c.l.bf16 %v63_v1  ;;  %v65_v3 = vunpack.c.h.bf16 %v63_v1 }
   0x4   :  { %v21_v4 = vadd.f32 %v65_v3, %v64_v2  ;;  %v31_v5 = vmul.f32 %v64_v2, %v64_v2  ;;  %v32_v6 = vmul.f32 %v65_v3, %v65_v3 }
   0x6   :  { %v22_v7 = vrot.slane %v21_v4, 4  ;;  %v33_v8 = vadd.f32 %v32_v6, %v31_v5 }
   0x8   :  { %v23_v9 = vadd.f32 %v22_v7, %v21_v4  ;;  %v34_v10 = vrot.slane %v33_v8, 4  ;;  %v20_v17 = vld [vmem:[#allocation2] sm:$0x1] }
   0x9   :  { %v30_v20 = vld [vmem:[#allocation3] sm:$0x1] }
   0xa   :  { %v24_v11 = vrot.slane %v23_v9, 2  ;;  %v35_v12 = vadd.f32 %v34_v10, %v33_v8 }
   0xc   :  { %v25_v13 = vadd.f32 %v24_v11, %v23_v9  ;;  %v36_v14 = vrot.slane %v35_v12, 2 }
   0xe   :  { %v26_v15 = vrot.slane %v25_v13, 1  ;;  %v37_v16 = vadd.f32 %v36_v14, %v35_v12 }
  0x10   :  { %v27_v18 = vadd.f32 %v26_v15, %v25_v13  ;;  %v38_v19 = vrot.slane %v37_v16, 1 }
  0x12   :  { %v28_v21 = vadd.f32 %v27_v18, %v20_v17  ;;  %v39_v22 = vadd.f32 %v38_v19, %v37_v16 }
  0x14   :  { %29 = vst [vmem:[#allocation2] sm:$0x1] %v28_v21  ;;  %v40_v23 = vadd.f32 %v39_v22, %v30_v20 }
  0x16   :  { %41 = vst [vmem:[#allocation3] sm:$0x1] %v40_v23 }
  0x1b   :  { %v45_v24 = vld [vmem:[#allocation2] sm:$0x1] }
  0x1c   :  { %v46_v25 = vmul.f32 0.0625, %v45_v24 }
  0x1d   :  { %v48_v26 = vld [vmem:[#allocation3] sm:$0x1] }
  0x1e   :  { %47 = vst [vmem:[%s93_s1] sm:$0x1] %v46_v25  ;;  %v50_v27 = vmul.f32 %v46_v25, %v46_v25  ;;  %v49_v28 = vmul.f32 0.0625, %v48_v26 }
  0x20   :  { %v51_v29 = vsub.f32 %v49_v28, %v50_v27 }
  0x22   :  { %v52_v30 = vmax.f32 %v51_v29, 0.0 }
  0x24   :  { %53 = vst [vmem:[%s94_s2] sm:$0x1] %v52_v30 }

// kernel: evl_forward.44
= control target key start
LH: loop header
LB: loop body
LE: loop exit
PB: predicated region body
PF: predicated region fallthrough
CT: control target
= control target key end

     0   :  { %s405_s12 = smov 0   ;;  %s407_s13 = smov 0   ;;  %s450_s0 = inlined_call_operand.vmem [shape: bf16[2,2,4,128], index: 0, kind: input, shape index: {}]   ;;  %s451_s1 = inlined_call_operand.vmem [shape: f32[3,128], index: 1, kind: input, shape index: {}]   ;;  %s452_s2 = inlined_call_operand.vmem [shape: f32[1,128], index: 2, kind: input, shape index: {}]   ;;  %s453_s3 = inlined_call_operand.vmem [shape: bf16[2,2,4,128], index: 3, kind: output, shape index: {}]  }
   0x1   :  { %s409_s14 = smov 0  }
   0x2 LB: > { %s25_s15 = sadd.s32 1, %s379_s13  ;;  %p321_p0 = scmp.ge.s32.totalorder %s383_s14, 1  ;;  %s383_s14 = sphi %s409_s14, %s13_s14   ;;  %s379_s13 = sphi %s407_s13, %s455_s13   ;;  %s375_s12 = sphi %s405_s12, %s454_s12  }
   0x3   : > { %p27_p1 = scmp.ge.s32.totalorder %s25_s15, 2  ;;  %p156_p2 = scmp.lt.s32.totalorder %s383_s14, 3 }
   0x5   : > { %s457_s15 = smov (%p27_p1, %s25_s15), 0  ;;  %p157_p3 = pnand %p321_p0, %p156_p2 }
   0x6   : > { %p186_p4 = scmp.lt.s32.totalorder (!%p157_p3), %s375_s12, 1 }
   0x7   : > { %160 = sbr.rel (%p157_p3) target bundleno = 28 (0x1c), region = 32 }
   0xc   : > { %s459_s12 = smov (!%p186_p4, %s375_s12), 1  ;;  %v357_v0 = vld [vmem:[%s451_s1 + $0x1] ss:$0 sm:$0xff]  ;;  %v358_v1 = vld [vmem:[%s451_s1 + $0x2] ss:$0 sm:$0xff] }
   0xd   : > { %s331_s16 = sshll.u32 %s459_s12, 2  ;;  %v360_v2 = vld [vmem:[%s451_s1] ss:$0 sm:$0xff] }
   0xe   : > { %s193_s19 = scalar_lea.vmem %s450_s0, %s331_s16  ;;  %v359_v13 = vld [vmem:[%s452_s2] ss:$0 sm:$0xff]  ;;  %s201_s30 = scalar_lea.vmem %s453_s3, %s331_s16 }
   0xf   : > { %v206_v3 = vld [vmem:[%s193_s19] sm:$0x3]  ;;  %v326_v4 = vld [vmem:[%s193_s19 + $0x2] sm:$0x3] }
  0x10   : > { %v222_v5 = vld [vmem:[%s193_s19] sm:$0x3]  ;;  %v207_v6 = vunpack.c.l.bf16 %v206_v3  ;;  %v212_v7 = vunpack.c.l.bf16 %v326_v4  ;;  %v327_v9 = vld [vmem:[%s193_s19 + $0x2] sm:$0x3] }
  0x11   : > { %v223_v8 = vunpack.c.l.bf16 %v222_v5  ;;  %v227_v10 = vunpack.c.l.bf16 %v327_v9 }
  0x12   : > { %v209_v11 = vmul.f32 %v357_v0, %v207_v6  ;;  %v214_v12 = vmul.f32 %v358_v1, %v212_v7 }
  0x13   : > { %v225_v14 = vmul.f32 %v360_v2, %v223_v8  ;;  %v228_v15 = vmul.f32 %v357_v0, %v227_v10 }
  0x14   : > { %v215_v16 = vadd.f32 %v214_v12, %v209_v11 }
  0x15   : > { %v229_v17 = vadd.f32 %v228_v15, %v225_v14 }
  0x16   : > { %v219_v18 = vadd.f32 %v359_v13, %v215_v16 }
  0x17   : > { %v230_v19 = vadd.f32 %v359_v13, %v229_v17 }
  0x18   : > { %v220_v20 = vpack.c.bf16 %v219_v18, %v219_v18 }
  0x19   : > { %v231_v21 = vpack.c.bf16 %v230_v19, %v230_v19 }
  0x1a   : > { %221 = vst [vmem:[%s201_s30] sm:$0x3] %v220_v20 }
  0x1b   : > { %328 = vst [vmem:[%s201_s30 + $0x2] sm:$0x3] %v231_v21 }
  0x1c PF: > { %s13_s14 = sadd.s32 1, %s383_s14   ;;  %s454_s12 = smov %s379_s13 }
  0x1d   : > { %p10_p5 = scmp.ge.s32.totalorder %s13_s14, 4   ;;  %s455_s13 = smov %s457_s15 }
  0x1f   :  { %12 = sbr.rel (!%p10_p5) target bundleno = 2 (0x2), region = 64 }

// kernel: evl_forward.43
= control target key start
LH: loop header
LB: loop body
LE: loop exit
PB: predicated region body
PF: predicated region fallthrough
CT: control target
= control target key end

     0   :  { %s235_s1 = inlined_call_operand.vmem [shape: bf16[128,128], index: 1, kind: input, shape index: {}]   ;;  %s236_s2 = inlined_call_operand.vmem [shape: f32[1,128], index: 2, kind: input, shape index: {}]   ;;  %s237_s0 = inlined_call_operand.vmem [shape: bf16[16,128], index: 0, kind: input, shape index: {}]   ;;  %s238_s3 = inlined_call_operand.vmem [shape: bf16[16,128], index: 3, kind: output, shape index: {}]  }
   0x1   :  { %v175_v0 = vld [vmem:[%s235_s1 + $0x38] sm:$0xff]  ;;  %v174_v1 = vld [vmem:[%s235_s1 + $0x30] sm:$0xff]  ;;  %v173_v2 = vld [vmem:[%s235_s1 + $0x28] sm:$0xff] }
   0x2   :  { %94 = vmatpush.bf16.msra.mxu0 %v175_v0  ;;  %v172_v3 = vld [vmem:[%s235_s1 + $0x20] sm:$0xff]  ;;  %v171_v4 = vld [vmem:[%s235_s1 + $0x18] sm:$0xff]  ;;  %v170_v5 = vld [vmem:[%s235_s1 + $0x10] sm:$0xff] }
   0x3   :  { %v169_v6 = vld [vmem:[%s235_s1 + $0x8] sm:$0xff]  ;;  %v168_v7 = vld [vmem:[%s235_s1] sm:$0xff] }
   0x4   :  { %v167_v8 = vld [vmem:[%s237_s0] sm:$0xff] }
   0x5   :  { %v181_v10 = vld [vmem:[%s236_s2] ss:$0 sm:$0xff] }
   0x6   :  { %95 = vmatpush.bf16.msra.mxu0 %v174_v1 }
   0xa   :  { %96 = vmatpush.bf16.msra.mxu0 %v173_v2 }
   0xe   :  { %97 = vmatpush.bf16.msra.mxu0 %v172_v3 }
  0x12   :  { %98 = vmatpush.bf16.msra.mxu0 %v171_v4 }
  0x16   :  { %99 = vmatpush.bf16.msra.mxu0 %v170_v5 }
  0x1a   :  { %100 = vmatpush.bf16.msra.mxu0 %v169_v6 }
  0x1e   :  { %101 = vmatpush.bf16.msra.mxu0 %v168_v7 }
  0x21   :  { %102 = vmatmul.bf16.vlgmr.msra.gmra.mxu0 %v167_v8 }
  0x9e   :  { %v103_v9 = vpop.f32.mrf.mxu0 }
  0x9f   :  { %v121_v12 = vadd.f32 %v181_v10, %v103_v9 }
  0xa6   :  { %v105_v11 = vpop.f32.mrf.mxu0 }
  0xa7   :  { %v122_v13 = vadd.f32 %v181_v10, %v105_v11 }
  0xa9   :  { %v179_v14 = vpack.c.bf16 %v122_v13, %v121_v12 }
  0xab   :  { %180 = vst [vmem:[%s238_s3] sm:$0xff] %v179_v14  }

// kernel: evl_forward.48
= control target key start
LH: loop header
LB: loop body
LE: loop exit
PB: predicated region body
PF: predicated region fallthrough
CT: control target
= control target key end

     0   :  { %9 = vsyncpa [#allocation4], 0  ;;  %s269_s18 = smov [#allocation3]   ;;  %s270_s20 = smov 64   ;;  %s321_s0 = inlined_call_operand.vmem [shape: bf16[24,128], index: 0, kind: input, shape index: {}]   ;;  %s322_s1 = inlined_call_operand.hbm [shape: bf16[128,128], index: 1, kind: input, shape index: {}]   ;;  %s323_s2 = inlined_call_operand.vmem [shape: f32[1,128], index: 2, kind: input, shape index: {}]   ;;  %s324_s3 = inlined_call_operand.vmem [shape: bf16[24,128], index: 3, kind: input, shape index: {}]   ;;  %s325_s4 = inlined_call_operand.vmem [shape: bf16[24,128], index: 4, kind: output, shape index: {}]  }
   0x1   :  { %s16_s17 = sshll.u32 %s322_s1, 4  ;;  %s18_s19 = sshll.u32 %s269_s18, 4  ;;  %s17_s17 = int_to_ptr.hbm [resolvable:$true] %s16_s17  ;;  %s19_s19 = int_to_ptr.vmem [resolvable:$true] %s18_s19 }
   0x2   :  { %s271_s21 = smov 4  }
   0x3   :  { %24 = dma.hbm_to_vmem [thread:$0]  %s17_s17, 1024, %s19_s19, [#allocation4], %s270_s20, %s270_s20, %s271_s21  }
   0x4   :  { %267 = dma.done.wait [#allocation4], 1024  }
   0x5   :  { %268 = vsyncadd [#allocation4], 4294966272  ;;  %v221_v0 = vld [vmem:[#allocation3 + $0x38] sm:$0xff]  ;;  %v220_v1 = vld [vmem:[#allocation3 + $0x30] sm:$0xff] }
   0x6   :  { %120 = vmatpush.bf16.msra.mxu0 %v221_v0  ;;  %231 = vmatpush.bf16.msra.mxu1 %v221_v0  ;;  %v219_v2 = vld [vmem:[#allocation3 + $0x28] sm:$0xff]  ;;  %v218_v3 = vld [vmem:[#allocation3 + $0x20] sm:$0xff]  ;;  %v217_v4 = vld [vmem:[#allocation3 + $0x18] sm:$0xff] }
   0x7   :  { %v216_v5 = vld [vmem:[#allocation3 + $0x10] sm:$0xff]  ;;  %v215_v6 = vld [vmem:[#allocation3 + $0x8] sm:$0xff]  ;;  %v214_v9 = vld [vmem:[#allocation3] sm:$0xff] }
   0x8   :  { %v45_v7 = vld [vmem:[%s321_s0 + $0x8] sm:$0xf]  ;;  %v213_v10 = vld [vmem:[%s321_s0] sm:$0xff] }
   0x9   :  { %v67_v8 = vunpack.c.l.b16 %v45_v7  ;;  %v159_v12 = vld [vmem:[%s324_s3 + $0x8] sm:$0xf]  ;;  %v242_v13 = vld [vmem:[%s323_s2] ss:$0 sm:$0xff] }
   0xa   :  { %121 = vmatpush.bf16.msra.mxu0 %v220_v1  ;;  %232 = vmatpush.bf16.msra.mxu1 %v220_v1  ;;  %v162_v14 = vunpack.c.l.bf16 %v159_v12  ;;  %v223_v19 = vld [vmem:[%s324_s3] sm:$0xff]  }
   0xb   :  { %v69_v11 = vpack.c.b16 %v67_v8, %v67_v8  ;;  %v224_v22 = vunpack.c.l.bf16 %v223_v19  ;;  %v225_v23 = vunpack.c.h.bf16 %v223_v19 }
   0xe   :  { %122 = vmatpush.bf16.msra.mxu0 %v219_v2  ;;  %233 = vmatpush.bf16.msra.mxu1 %v219_v2 }
  0x12   :  { %123 = vmatpush.bf16.msra.mxu0 %v218_v3  ;;  %234 = vmatpush.bf16.msra.mxu1 %v218_v3 }
  0x16   :  { %124 = vmatpush.bf16.msra.mxu0 %v217_v4  ;;  %235 = vmatpush.bf16.msra.mxu1 %v217_v4 }
  0x1a   :  { %125 = vmatpush.bf16.msra.mxu0 %v216_v5  ;;  %236 = vmatpush.bf16.msra.mxu1 %v216_v5 }
  0x1e   :  { %126 = vmatpush.bf16.msra.mxu0 %v215_v6  ;;  %237 = vmatpush.bf16.msra.mxu1 %v215_v6 }
  0x22   :  { %127 = vmatpush.bf16.msra.mxu0 %v214_v9  ;;  %238 = vmatpush.bf16.msra.mxu1 %v214_v9 }
  0x25   :  { %128 = vmatmul.bf16.vlgmr.msra.gmra.mxu0 %v213_v10  ;;  %133 = vmatmul.bf16.vlgmr.msra.gmra.mxu1 %v69_v11 }
  0xa2   :  { %v129_v15 = vpop.f32.mrf.mxu0  ;;  %v134_v16 = vpop.f32.mrf.mxu1 }
  0xa3   :  { %v156_v17 = vadd.f32 %v242_v13, %v134_v16  ;;  %v154_v21 = vadd.f32 %v242_v13, %v129_v15 }
  0xa5   :  { %v165_v18 = vadd.f32 %v162_v14, %v156_v17  ;;  %v163_v27 = vadd.f32 %v224_v22, %v154_v21 }
  0xa7   :  { %v168_v20 = vpack.c.bf16 %v165_v18, %v165_v18 }
  0xa9   :  { %171 = vst [vmem:[%s325_s4 + $0x8] sm:$0xf] %v168_v20 }
  0xaa   :  { %v131_v24 = vpop.f32.mrf.mxu0  ;;  %v136_v25 = vpop.f32.mrf.mxu1 }
  0xab   :  { %v155_v26 = vadd.f32 %v242_v13, %v131_v24 }
  0xad   :  { %v164_v28 = vadd.f32 %v225_v23, %v155_v26 }
  0xaf   :  { %v229_v29 = vpack.c.bf16 %v164_v28, %v163_v27 }
  0xb1   :  { %230 = vst [vmem:[%s325_s4] sm:$0xff] %v229_v29  }
  0xb2   :  { %176 = vsyncpa [#allocation4], 1 }

// kernel: evl_forward.45
= control target key start
LH: loop header
LB: loop body
LE: loop exit
PB: predicated region body
PF: predicated region fallthrough
CT: control target
= control target key end

     0   :  { %9 = vsyncpa [#allocation4], 0  ;;  %s241_s18 = smov [#allocation3]   ;;  %s242_s20 = smov 64   ;;  %s284_s0 = inlined_call_operand.vmem [shape: bf16[16,128], index: 0, kind: input, shape index: {}]   ;;  %s285_s1 = inlined_call_operand.hbm [shape: bf16[128,128], index: 1, kind: input, shape index: {}]   ;;  %s286_s2 = inlined_call_operand.vmem [shape: f32[1,128], index: 2, kind: input, shape index: {}]   ;;  %s287_s3 = inlined_call_operand.vmem [shape: bf16[16,128], index: 3, kind: input, shape index: {}]   ;;  %s288_s4 = inlined_call_operand.vmem [shape: bf16[16,128], index: 4, kind: output, shape index: {}]  }
   0x1   :  { %s16_s17 = sshll.u32 %s285_s1, 4  ;;  %s18_s19 = sshll.u32 %s241_s18, 4  ;;  %s17_s17 = int_to_ptr.hbm [resolvable:$true] %s16_s17  ;;  %s19_s19 = int_to_ptr.vmem [resolvable:$true] %s18_s19 }
   0x2   :  { %s243_s21 = smov 4  }
   0x3   :  { %24 = dma.hbm_to_vmem [thread:$0]  %s17_s17, 1024, %s19_s19, [#allocation4], %s242_s20, %s242_s20, %s243_s21  }
   0x4   :  { %239 = dma.done.wait [#allocation4], 1024  }
   0x5   :  { %240 = vsyncadd [#allocation4], 4294966272  ;;  %v201_v0 = vld [vmem:[#allocation3 + $0x38] sm:$0xff]  ;;  %v200_v1 = vld [vmem:[#allocation3 + $0x30] sm:$0xff] }
   0x6   :  { %113 = vmatpush.bf16.msra.mxu0 %v201_v0  ;;  %v199_v2 = vld [vmem:[#allocation3 + $0x28] sm:$0xff]  ;;  %v198_v3 = vld [vmem:[#allocation3 + $0x20] sm:$0xff]  ;;  %v197_v4 = vld [vmem:[#allocation3 + $0x18] sm:$0xff] }
   0x7   :  { %v196_v5 = vld [vmem:[#allocation3 + $0x10] sm:$0xff]  ;;  %v195_v6 = vld [vmem:[#allocation3 + $0x8] sm:$0xff]  ;;  %v194_v7 = vld [vmem:[#allocation3] sm:$0xff] }
   0x8   :  { %v193_v8 = vld [vmem:[%s284_s0] sm:$0xff] }
   0x9   :  { %v214_v10 = vld [vmem:[%s286_s2] ss:$0 sm:$0xff] }
   0xa   :  { %114 = vmatpush.bf16.msra.mxu0 %v200_v1  ;;  %v203_v11 = vld [vmem:[%s287_s3] sm:$0xff]  }
   0xb   :  { %v204_v13 = vunpack.c.l.bf16 %v203_v11  ;;  %v205_v14 = vunpack.c.h.bf16 %v203_v11 }
   0xe   :  { %115 = vmatpush.bf16.msra.mxu0 %v199_v2 }
  0x12   :  { %116 = vmatpush.bf16.msra.mxu0 %v198_v3 }
  0x16   :  { %117 = vmatpush.bf16.msra.mxu0 %v197_v4 }
  0x1a   :  { %118 = vmatpush.bf16.msra.mxu0 %v196_v5 }
  0x1e   :  { %119 = vmatpush.bf16.msra.mxu0 %v195_v6 }
  0x22   :  { %120 = vmatpush.bf16.msra.mxu0 %v194_v7 }
  0x25   :  { %121 = vmatmul.bf16.vlgmr.msra.gmra.mxu0 %v193_v8 }
  0xa2   :  { %v122_v9 = vpop.f32.mrf.mxu0 }
  0xa3   :  { %v140_v12 = vadd.f32 %v214_v10, %v122_v9 }
  0xa5   :  { %v146_v17 = vadd.f32 %v204_v13, %v140_v12 }
  0xaa   :  { %v124_v15 = vpop.f32.mrf.mxu0 }
  0xab   :  { %v141_v16 = vadd.f32 %v214_v10, %v124_v15 }
  0xad   :  { %v147_v18 = vadd.f32 %v205_v14, %v141_v16 }
  0xaf   :  { %v209_v19 = vpack.c.bf16 %v147_v18, %v146_v17 }
  0xb1   :  { %210 = vst [vmem:[%s288_s4] sm:$0xff] %v209_v19  }
  0xb2   :  { %156 = vsyncpa [#allocation4], 1 }

</bundles_post_ra>
